<compile_context>
chip_gen: v6e
topology: v6e:2x2x1
jax: 0.10.0
libtpu: 0.0.40
codegen_flags: <defaults>
</compile_context>

<pallas_src>
import math

import jax
import jax.numpy as jnp
from jax.experimental import pallas as pl
from jax.experimental.pallas import tpu as pltpu


# ----------------------------------------------------------------------------
# helpers
# ----------------------------------------------------------------------------
def _round_up(x, m):
    return ((x + m - 1) // m) * m


def _tile(dim, cap):
    """Largest multiple-of-128 tile <= cap that divides dim (dim % 128 == 0)."""
    t = min(cap, dim)
    while dim % t:
        t -= 128
    return t


# ----------------------------------------------------------------------------
# Kernel 1: tiled matmul  y = x @ w   (x: [M,K], w: [K,N], all mult-of-128)
# ----------------------------------------------------------------------------
def _matmul_kernel(x_ref, w_ref, o_ref, acc_ref):
    @pl.when(pl.program_id(2) == 0)
    def _():
        acc_ref[...] = jnp.zeros_like(acc_ref)

    acc_ref[...] += jnp.dot(x_ref[...], w_ref[...],
                            preferred_element_type=jnp.float32)

    @pl.when(pl.program_id(2) == pl.num_programs(2) - 1)
    def _():
        o_ref[...] = acc_ref[...].astype(o_ref.dtype)


def pallas_matmul(x, w, *, tm_cap=256, tn_cap=256, tk_cap=512):
    M, K = x.shape
    _, N = w.shape
    tm, tn, tk = _tile(M, tm_cap), _tile(N, tn_cap), _tile(K, tk_cap)
    return pl.pallas_call(
        _matmul_kernel,
        out_shape=jax.ShapeDtypeStruct((M, N), x.dtype),
        grid_spec=pltpu.PrefetchScalarGridSpec(
            num_scalar_prefetch=0,
            grid=(M // tm, N // tn, K // tk),
            in_specs=[pl.BlockSpec((tm, tk), lambda i, j, k: (i, k)),
                      pl.BlockSpec((tk, tn), lambda i, j, k: (k, j))],
            out_specs=pl.BlockSpec((tm, tn), lambda i, j, k: (i, j)),
            scratch_shapes=[pltpu.VMEM((tm, tn), jnp.float32)]),
        compiler_params=pltpu.CompilerParams(
            dimension_semantics=("parallel", "parallel", "arbitrary")),
        cost_estimate=pl.CostEstimate(
            flops=2 * M * N * K, transcendentals=0,
            bytes_accessed=4 * (M * K + K * N + M * N)),
    )(x, w)


# ----------------------------------------------------------------------------
# Kernel 2: batched matmul  a = adj @ x   (adj: [B,Np,Np], x: [B,Np,D])
# ----------------------------------------------------------------------------
def _bmm_kernel(adj_ref, x_ref, o_ref, acc_ref):
    @pl.when(pl.program_id(3) == 0)
    def _():
        acc_ref[...] = jnp.zeros_like(acc_ref)

    acc_ref[...] += jnp.dot(adj_ref[0], x_ref[0],
                            preferred_element_type=jnp.float32)

    @pl.when(pl.program_id(3) == pl.num_programs(3) - 1)
    def _():
        o_ref[0] = acc_ref[...].astype(o_ref.dtype)


def pallas_bmm(adj, x, *, tm_cap=256, tn_cap=256, tk_cap=512):
    B, Np, _ = adj.shape
    D = x.shape[-1]
    tm, tn, tk = _tile(Np, tm_cap), _tile(D, tn_cap), _tile(Np, tk_cap)
    return pl.pallas_call(
        _bmm_kernel,
        out_shape=jax.ShapeDtypeStruct((B, Np, D), x.dtype),
        grid_spec=pltpu.PrefetchScalarGridSpec(
            num_scalar_prefetch=0,
            grid=(B, Np // tm, D // tn, Np // tk),
            in_specs=[pl.BlockSpec((1, tm, tk), lambda b, i, j, k: (b, i, k)),
                      pl.BlockSpec((1, tk, tn), lambda b, i, j, k: (b, k, j))],
            out_specs=pl.BlockSpec((1, tm, tn), lambda b, i, j, k: (b, i, j)),
            scratch_shapes=[pltpu.VMEM((tm, tn), jnp.float32)]),
        compiler_params=pltpu.CompilerParams(
            dimension_semantics=("parallel", "parallel", "parallel",
                                 "arbitrary")),
        cost_estimate=pl.CostEstimate(
            flops=2 * B * Np * Np * D, transcendentals=0,
            bytes_accessed=4 * B * (Np * Np + 2 * Np * D)),
    )(adj, x)


# ----------------------------------------------------------------------------
# Kernel 3: fused GGNN gating (6 matmuls + sigmoid/tanh/convex blend)
# ----------------------------------------------------------------------------
def _ggnn_gate_kernel(a_ref, x_ref, wz0_ref, wz1_ref, wr0_ref, wr1_ref,
                      wh0_ref, wh1_ref, bz_ref, br_ref, bh_ref, o_ref):
    a = a_ref[...]
    x = x_ref[...]
    z = jax.nn.sigmoid(
        jnp.dot(a, wz0_ref[...], preferred_element_type=jnp.float32)
        + jnp.dot(x, wz1_ref[...], preferred_element_type=jnp.float32)
        + bz_ref[...])
    r = jax.nn.sigmoid(
        jnp.dot(a, wr0_ref[...], preferred_element_type=jnp.float32)
        + jnp.dot(x, wr1_ref[...], preferred_element_type=jnp.float32)
        + br_ref[...])
    h = jnp.tanh(
        jnp.dot(a, wh0_ref[...], preferred_element_type=jnp.float32)
        + jnp.dot(r * x, wh1_ref[...], preferred_element_type=jnp.float32)
        + bh_ref[...])
    o_ref[...] = (h * z + x * (1.0 - z)).astype(o_ref.dtype)


def pallas_ggnn_gate(a, x, wz0, wz1, wr0, wr1, wh0, wh1, bz, br, bh,
                     *, tm_cap=256):
    M, H = x.shape
    tm = _tile(M, tm_cap)
    row_spec = pl.BlockSpec((tm, H), lambda i: (i, 0))
    w_spec = pl.BlockSpec((H, H), lambda i: (0, 0))      # resident across grid
    b_spec = pl.BlockSpec((1, H), lambda i: (0, 0))
    return pl.pallas_call(
        _ggnn_gate_kernel,
        out_shape=jax.ShapeDtypeStruct((M, H), x.dtype),
        grid_spec=pltpu.PrefetchScalarGridSpec(
            num_scalar_prefetch=0,
            grid=(M // tm,),
            in_specs=[row_spec, row_spec,
                      w_spec, w_spec, w_spec, w_spec, w_spec, w_spec,
                      b_spec, b_spec, b_spec],
            out_specs=row_spec),
        compiler_params=pltpu.CompilerParams(
            dimension_semantics=("parallel",),
            vmem_limit_bytes=32 * 1024 * 1024),
        cost_estimate=pl.CostEstimate(
            flops=12 * M * H * H + 10 * M * H,
            transcendentals=3 * M * H,
            bytes_accessed=4 * (3 * M * H + 6 * H * H + 3 * H)),
    )(a, x, wz0, wz1, wr0, wr1, wh0, wh1, bz, br, bh)


# ----------------------------------------------------------------------------
# Kernel 4: GSL adjacency masking  adj * max(keep_row, keep_col)
# ----------------------------------------------------------------------------
def _gsl_mask_kernel(adj_ref, kr_ref, kc_ref, o_ref):
    mask = jnp.maximum(kr_ref[0], kc_ref[0])      # (tm,1) x (1,tn) -> (tm,tn)
    o_ref[0] = adj_ref[0] * mask


def pallas_gsl_mask(adj, keep, *, tm_cap=256, tn_cap=256):
    B, Np, _ = adj.shape
    tm, tn = _tile(Np, tm_cap), _tile(Np, tn_cap)
    keep_r = keep.reshape(B, Np, 1)
    keep_c = keep.reshape(B, 1, Np)
    return pl.pallas_call(
        _gsl_mask_kernel,
        out_shape=jax.ShapeDtypeStruct((B, Np, Np), adj.dtype),
        grid_spec=pltpu.PrefetchScalarGridSpec(
            num_scalar_prefetch=0,
            grid=(B, Np // tm, Np // tn),
            in_specs=[pl.BlockSpec((1, tm, tn), lambda b, i, j: (b, i, j)),
                      pl.BlockSpec((1, tm, 1), lambda b, i, j: (b, i, 0)),
                      pl.BlockSpec((1, 1, tn), lambda b, i, j: (b, 0, j))],
            out_specs=pl.BlockSpec((1, tm, tn), lambda b, i, j: (b, i, j))),
        compiler_params=pltpu.CompilerParams(
            dimension_semantics=("parallel", "parallel", "parallel")),
    )(adj, keep_r, keep_c)


# ----------------------------------------------------------------------------
# Parameter init (matches the PyTorch module's reset_params / defaults)
# ----------------------------------------------------------------------------
def init_linear(key, in_f, out_f, bias=True):
    kw, kb = jax.random.split(key)
    std = math.sqrt(2.0 / in_f)                       # kaiming_normal_, fan_in
    w = std * jax.random.normal(kw, (out_f, in_f), jnp.float32)
    b = None
    if bias:
        bound = 1.0 / math.sqrt(in_f)                 # nn.Linear default bias
        b = jax.random.uniform(kb, (out_f,), jnp.float32, -bound, bound)
    return w, b


def init_ggnn(key, in_f, out_f):
    keys = jax.random.split(key, 7)
    p = {}
    p['proj_w'], _ = init_linear(keys[0], in_f, out_f, bias=False)
    for name, k in zip(['z0', 'z1', 'r0', 'r1', 'h0', 'h1'], keys[1:]):
        w, b = init_linear(k, out_f, out_f, bias=True)
        p['w' + name] = w
        p['b' + name] = b
    return p


def _pad_wt(w, k_pad, n_pad):
    """PyTorch [out,in] weight -> padded, transposed [k_pad, n_pad]."""
    wt = w.T
    return jnp.pad(wt, ((0, k_pad - wt.shape[0]), (0, n_pad - wt.shape[1])))


def prepare_ggnn(p, in_f, out_f):
    """Pre-transpose / zero-pad weights once (no runtime transpose/pad)."""
    in_pad = _round_up(in_f, 128)
    h_pad = _round_up(out_f, 128)
    q = {'wp': _pad_wt(p['proj_w'], in_pad, h_pad)}
    for name in ['z0', 'z1', 'r0', 'r1', 'h0', 'h1']:
        q['w' + name] = _pad_wt(p['w' + name], h_pad, h_pad)

    def padb(b):
        return jnp.pad(b, (0, h_pad - out_f)).reshape(1, h_pad)

    q['bz'] = padb(p['bz0'] + p['bz1'])
    q['br'] = padb(p['br0'] + p['br1'])
    q['bh'] = padb(p['bh0'] + p['bh1'])
    return q


def init_model(key, input_dim, hidden_dim, output_dim):
    ks = jax.random.split(key, 4)
    raw = {'fp1': init_ggnn(ks[0], input_dim, hidden_dim),
           'ws1': init_ggnn(ks[1], hidden_dim, 1),
           'fp2': init_ggnn(ks[2], hidden_dim, hidden_dim),
           'fp3': init_ggnn(ks[3], hidden_dim, output_dim)}
    prepared = {'fp1': prepare_ggnn(raw['fp1'], input_dim, hidden_dim),
                'ws1': prepare_ggnn(raw['ws1'], hidden_dim, 1),
                'fp2': prepare_ggnn(raw['fp2'], hidden_dim, hidden_dim),
                'fp3': prepare_ggnn(raw['fp3'], hidden_dim, output_dim)}
    return raw, prepared


# ----------------------------------------------------------------------------
# Pallas forward pass (operates on padded, lane-dense arrays)
# ----------------------------------------------------------------------------
def ggnn_pallas(q, adj_p, feat_p):
    # TODO(synk): Dropout(p=0.2) is training-time only; inference == identity.
    B, Np, d_in_pad = feat_p.shape
    h_pad = q['wp'].shape[1]
    M = B * Np
    x2 = pallas_matmul(feat_p.reshape(M, d_in_pad), q['wp'])     # proj
    a3 = pallas_bmm(adj_p, x2.reshape(B, Np, h_pad))             # adj @ x
    feat2 = pallas_ggnn_gate(a3.reshape(M, h_pad), x2,
                             q['wz0'], q['wz1'], q['wr0'], q['wr1'],
                             q['wh0'], q['wh1'], q['bz'], q['br'], q['bh'])
    return feat2.reshape(B, Np, h_pad)


def gsl_pallas(adj_p, score_p, n_real, rate):
    B, Np, _ = adj_p.shape
    k = int(rate * n_real)
    score = score_p[:, :n_real, 0]                        # real nodes, lane 0
    _, idx = jax.lax.top_k(score, k)                      # top-k in plain JAX
    keep = jnp.zeros((B, Np), jnp.float32).at[
        jnp.arange(B)[:, None], idx].set(1.0)
    return pallas_gsl_mask(adj_p, keep)


def ggnn_with_gsl_pallas(params, adj, feat, out_dim, rate=0.6):
    B, N, d_in = feat.shape
    n_pad = _round_up(N, 128)
    d_in_pad = _round_up(d_in, 128)
    # Single pad for the whole multi-layer forward (zero rows/cols are inert).
    adj_p = jnp.pad(adj, ((0, 0), (0, n_pad - N), (0, n_pad - N)))
    feat_p = jnp.pad(feat, ((0, 0), (0, n_pad - N), (0, d_in_pad - d_in)))

    f1 = ggnn_pallas(params['fp1'], adj_p, feat_p)
    score = ggnn_pallas(params['ws1'], adj_p, f1)
    adj_r = gsl_pallas(adj_p, score, N, rate)
    f2 = ggnn_pallas(params['fp2'], adj_r, f1)
    f3 = ggnn_pallas(params['fp3'], adj_r, f2)
    return f3[:, :N, :out_dim]


# ----------------------------------------------------------------------------
# Plain-JAX reference (mirrors the PyTorch module, eval mode)
# ----------------------------------------------------------------------------
def ggnn_ref(p, adj, x):
    x = x @ p['proj_w'].T
    a = adj @ x
    z = jax.nn.sigmoid(a @ p['wz0'].T + p['bz0'] + x @ p['wz1'].T + p['bz1'])
    r = jax.nn.sigmoid(a @ p['wr0'].T + p['br0'] + x @ p['wr1'].T + p['br1'])
    h = jnp.tanh(a @ p['wh0'].T + p['bh0'] + (r * x) @ p['wh1'].T + p['bh1'])
    return h * z + x * (1.0 - z)


def gsl_ref(adj, score, rate):
    B, N, _ = adj.shape
    k = int(rate * N)
    _, idx = jax.lax.top_k(score[:, :, 0], k)
    keep = jnp.zeros((B, N), jnp.float32).at[
        jnp.arange(B)[:, None], idx].set(1.0)
    mask = jnp.maximum(keep[:, :, None], keep[:, None, :])
    return adj * mask


def ggnn_with_gsl_ref(raw, adj, feat, rate=0.6):
    f1 = ggnn_ref(raw['fp1'], adj, feat)
    score = ggnn_ref(raw['ws1'], adj, f1)
    adj_r = gsl_ref(adj, score, rate)
    f2 = ggnn_ref(raw['fp2'], adj_r, f1)
    f3 = ggnn_ref(raw['fp3'], adj_r, f2)
    return f3


# ----------------------------------------------------------------------------
if __name__ == "__main__":
    key = jax.random.PRNGKey(0)
    k_adj, k_feat, k_params = jax.random.split(key, 3)

    B, N = 2, 16                         # batch, graph nodes
    input_dim, hidden_dim, output_dim = 32, 32, 32
    rate = 0.6

    # Deterministic "normalized" adjacency: symmetric + self loops, row-norm.
    a = jax.random.uniform(k_adj, (B, N, N), jnp.float32)
    a = 0.5 * (a + jnp.swapaxes(a, 1, 2)) + jnp.eye(N, dtype=jnp.float32)[None]
    adj = a / jnp.sum(a, axis=-1, keepdims=True)

    feat = jax.random.normal(k_feat, (B, N, input_dim), jnp.float32)

    raw_params, prepared_params = init_model(k_params, input_dim, hidden_dim,
                                             output_dim)

    fwd = jax.jit(lambda adj_, feat_: ggnn_with_gsl_pallas(
        prepared_params, adj_, feat_, output_dim, rate))
    y = jax.block_until_ready(fwd(adj, feat))

    y_ref = ggnn_with_gsl_ref(raw_params, adj, feat, rate)

    assert y.shape == (B, N, output_dim)
    err = float(jnp.max(jnp.abs(y - y_ref)))
    assert err < 1e-3, f"max abs error vs reference: {err}"

    print("KERNEL_OK")
</pallas_src>

<mosaic_0001>
module attributes {stable_mosaic.version = 11 : i64} {
  func.func @_bmm_kernel(%arg0: i32, %arg1: i32, %arg2: i32, %arg3: i32, %arg4: memref<1x128x128xf32, #tpu.memory_space<vmem>>, %arg5: memref<1x128x128xf32, #tpu.memory_space<vmem>>, %arg6: memref<1x128x128xf32, #tpu.memory_space<vmem>>, %arg7: memref<128x128xf32, #tpu.memory_space<vmem>>) attributes {dimension_semantics = [#tpu.dimension_semantics<parallel>, #tpu.dimension_semantics<parallel>, #tpu.dimension_semantics<parallel>, #tpu.dimension_semantics<arbitrary>], iteration_bounds = array<i64: 2, 1, 1, 1>, scalar_prefetch = 0 : i64, scratch_operands = 1 : i64, tpu.core_type = #tpu.core_type<tc>, window_params = [{transform_indices = @transform_0, window_bounds = array<i64: 1, 128, 128>}, {transform_indices = @transform_1, window_bounds = array<i64: 1, 128, 128>}, {transform_indices = @transform_2, window_bounds = array<i64: 1, 128, 128>}]} {
    %c0_i32 = arith.constant 0 : i32
    %0 = arith.cmpi eq, %arg3, %c0_i32 : i32
    %1 = arith.extui %0 : i1 to i32
    %c0_i32_0 = arith.constant 0 : i32
    %2 = arith.cmpi ne, %1, %c0_i32_0 : i32
    scf.if %2 {
      %cst_12 = arith.constant 0.000000e+00 : f32
      %14 = vector.broadcast %cst_12 : f32 to vector<128x128xf32>
      %c0_13 = arith.constant 0 : index
      %c0_14 = arith.constant 0 : index
      %15 = vector.load %arg7[%c0_13, %c0_14] : memref<128x128xf32, #tpu.memory_space<vmem>>, vector<128x128xf32>
      tpu.vector_store %arg7[%c0_13, %c0_14], %14 {strides = array<i32>} : memref<128x128xf32, #tpu.memory_space<vmem>>, vector<128x128xf32>,
    } else {
    }
    %c0 = arith.constant 0 : index
    %c0_1 = arith.constant 0 : index
    %3 = vector.load %arg7[%c0, %c0_1] : memref<128x128xf32, #tpu.memory_space<vmem>>, vector<128x128xf32>
    %c0_2 = arith.constant 0 : index
    %c0_3 = arith.constant 0 : index
    %c0_4 = arith.constant 0 : index
    %4 = vector.load %arg4[%c0_2, %c0_3, %c0_4] : memref<1x128x128xf32, #tpu.memory_space<vmem>>, vector<1x128x128xf32>
    %5 = vector.shape_cast %4 : vector<1x128x128xf32> to vector<128x128xf32>
    %c0_5 = arith.constant 0 : index
    %c0_6 = arith.constant 0 : index
    %c0_7 = arith.constant 0 : index
    %6 = vector.load %arg5[%c0_5, %c0_6, %c0_7] : memref<1x128x128xf32, #tpu.memory_space<vmem>>, vector<1x128x128xf32>
    %7 = vector.shape_cast %6 : vector<1x128x128xf32> to vector<128x128xf32>
    %cst = arith.constant dense<0.000000e+00> : vector<128x128xf32>
    %8 = tpu.matmul %5, %7, %cst {dimension_numbers = #tpu.dot_dimension_numbers<[1], [0], [0], [1], [0, 0, 1, 1], [], []>} : vector<128x128xf32>, vector<128x128xf32>, vector<128x128xf32> -> vector<128x128xf32>
    %9 = arith.addf %3, %8 : vector<128x128xf32>
    %c0_8 = arith.constant 0 : index
    %c0_9 = arith.constant 0 : index
    %10 = vector.load %arg7[%c0_8, %c0_9] : memref<128x128xf32, #tpu.memory_space<vmem>>, vector<128x128xf32>
    tpu.vector_store %arg7[%c0_8, %c0_9], %9 {strides = array<i32>} : memref<128x128xf32, #tpu.memory_space<vmem>>, vector<128x128xf32>,
    %c0_i32_10 = arith.constant 0 : i32
    %11 = arith.cmpi eq, %arg3, %c0_i32_10 : i32
    %12 = arith.extui %11 : i1 to i32
    %c0_i32_11 = arith.constant 0 : i32
    %13 = arith.cmpi ne, %12, %c0_i32_11 : i32
    scf.if %13 {
      %c0_12 = arith.constant 0 : index
      %c0_13 = arith.constant 0 : index
      %14 = vector.load %arg7[%c0_12, %c0_13] : memref<128x128xf32, #tpu.memory_space<vmem>>, vector<128x128xf32>
      %c0_14 = arith.constant 0 : index
      %c0_15 = arith.constant 0 : index
      %c0_16 = arith.constant 0 : index
      %15 = vector.load %arg6[%c0_14, %c0_15, %c0_16] : memref<1x128x128xf32, #tpu.memory_space<vmem>>, vector<1x128x128xf32>
      %16 = vector.shape_cast %15 : vector<1x128x128xf32> to vector<128x128xf32>
      %17 = vector.shape_cast %14 : vector<128x128xf32> to vector<1x128x128xf32>
      tpu.vector_store %arg6[%c0_14, %c0_15, %c0_16], %17 {strides = array<i32>} : memref<1x128x128xf32, #tpu.memory_space<vmem>>, vector<1x128x128xf32>,
    } else {
    }
    return
  }
  func.func @transform_0(%arg0: i32, %arg1: i32, %arg2: i32, %arg3: i32) -> (i32, i32, i32) {
    %c0_i32 = arith.constant 0 : i32
    return %arg0, %arg1, %arg3 : i32, i32, i32
  }
  func.func @transform_1(%arg0: i32, %arg1: i32, %arg2: i32, %arg3: i32) -> (i32, i32, i32) {
    %c0_i32 = arith.constant 0 : i32
    return %arg0, %arg3, %arg2 : i32, i32, i32
  }
  func.func @transform_2(%arg0: i32, %arg1: i32, %arg2: i32, %arg3: i32) -> (i32, i32, i32) {
    %c0_i32 = arith.constant 0 : i32
    return %arg0, %arg1, %arg2 : i32, i32, i32
  }
}

module attributes {stable_mosaic.version = 11 : i64} {
  func.func @_matmul_kernel(%arg0: i32, %arg1: i32, %arg2: i32, %arg3: memref<256x128xf32, #tpu.memory_space<vmem>>, %arg4: memref<128x128xf32, #tpu.memory_space<vmem>>, %arg5: memref<256x128xf32, #tpu.memory_space<vmem>>, %arg6: memref<256x128xf32, #tpu.memory_space<vmem>>) attributes {dimension_semantics = [#tpu.dimension_semantics<parallel>, #tpu.dimension_semantics<parallel>, #tpu.dimension_semantics<arbitrary>], iteration_bounds = array<i64: 1, 1, 1>, scalar_prefetch = 0 : i64, scratch_operands = 1 : i64, tpu.core_type = #tpu.core_type<tc>, window_params = [{transform_indices = @transform_0, window_bounds = array<i64: 256, 128>}, {transform_indices = @transform_1, window_bounds = array<i64: 128, 128>}, {transform_indices = @transform_2, window_bounds = array<i64: 256, 128>}]} {
    %c0_i32 = arith.constant 0 : i32
    %0 = arith.cmpi eq, %arg2, %c0_i32 : i32
    %1 = arith.extui %0 : i1 to i32
    %c0_i32_0 = arith.constant 0 : i32
    %2 = arith.cmpi ne, %1, %c0_i32_0 : i32
    scf.if %2 {
      %cst_10 = arith.constant 0.000000e+00 : f32
      %12 = vector.broadcast %cst_10 : f32 to vector<256x128xf32>
      %c0_11 = arith.constant 0 : index
      %c0_12 = arith.constant 0 : index
      %13 = vector.load %arg6[%c0_11, %c0_12] : memref<256x128xf32, #tpu.memory_space<vmem>>, vector<256x128xf32>
      tpu.vector_store %arg6[%c0_11, %c0_12], %12 {strides = array<i32>} : memref<256x128xf32, #tpu.memory_space<vmem>>, vector<256x128xf32>,
    } else {
    }
    %c0 = arith.constant 0 : index
    %c0_1 = arith.constant 0 : index
    %3 = vector.load %arg6[%c0, %c0_1] : memref<256x128xf32, #tpu.memory_space<vmem>>, vector<256x128xf32>
    %c0_2 = arith.constant 0 : index
    %c0_3 = arith.constant 0 : index
    %4 = vector.load %arg3[%c0_2, %c0_3] : memref<256x128xf32, #tpu.memory_space<vmem>>, vector<256x128xf32>
    %c0_4 = arith.constant 0 : index
    %c0_5 = arith.constant 0 : index
    %5 = vector.load %arg4[%c0_4, %c0_5] : memref<128x128xf32, #tpu.memory_space<vmem>>, vector<128x128xf32>
    %cst = arith.constant dense<0.000000e+00> : vector<256x128xf32>
    %6 = tpu.matmul %4, %5, %cst {dimension_numbers = #tpu.dot_dimension_numbers<[1], [0], [0], [1], [0, 0, 1, 1], [], []>} : vector<256x128xf32>, vector<128x128xf32>, vector<256x128xf32> -> vector<256x128xf32>
    %7 = arith.addf %3, %6 : vector<256x128xf32>
    %c0_6 = arith.constant 0 : index
    %c0_7 = arith.constant 0 : index
    %8 = vector.load %arg6[%c0_6, %c0_7] : memref<256x128xf32, #tpu.memory_space<vmem>>, vector<256x128xf32>
    tpu.vector_store %arg6[%c0_6, %c0_7], %7 {strides = array<i32>} : memref<256x128xf32, #tpu.memory_space<vmem>>, vector<256x128xf32>,
    %c0_i32_8 = arith.constant 0 : i32
    %9 = arith.cmpi eq, %arg2, %c0_i32_8 : i32
    %10 = arith.extui %9 : i1 to i32
    %c0_i32_9 = arith.constant 0 : i32
    %11 = arith.cmpi ne, %10, %c0_i32_9 : i32
    scf.if %11 {
      %c0_10 = arith.constant 0 : index
      %c0_11 = arith.constant 0 : index
      %12 = vector.load %arg6[%c0_10, %c0_11] : memref<256x128xf32, #tpu.memory_space<vmem>>, vector<256x128xf32>
      %c0_12 = arith.constant 0 : index
      %c0_13 = arith.constant 0 : index
      %13 = vector.load %arg5[%c0_12, %c0_13] : memref<256x128xf32, #tpu.memory_space<vmem>>, vector<256x128xf32>
      tpu.vector_store %arg5[%c0_12, %c0_13], %12 {strides = array<i32>} : memref<256x128xf32, #tpu.memory_space<vmem>>, vector<256x128xf32>,
    } else {
    }
    return
  }
  func.func @transform_0(%arg0: i32, %arg1: i32, %arg2: i32) -> (i32, i32) {
    %c0_i32 = arith.constant 0 : i32
    return %arg0, %arg2 : i32, i32
  }
  func.func @transform_1(%arg0: i32, %arg1: i32, %arg2: i32) -> (i32, i32) {
    %c0_i32 = arith.constant 0 : i32
    return %arg2, %arg1 : i32, i32
  }
  func.func @transform_2(%arg0: i32, %arg1: i32, %arg2: i32) -> (i32, i32) {
    %c0_i32 = arith.constant 0 : i32
    return %arg0, %arg1 : i32, i32
  }
}

module attributes {stable_mosaic.version = 11 : i64} {
  func.func @_ggnn_gate_kernel(%arg0: i32, %arg1: memref<256x128xf32, #tpu.memory_space<vmem>>, %arg2: memref<256x128xf32, #tpu.memory_space<vmem>>, %arg3: memref<128x128xf32, #tpu.memory_space<vmem>>, %arg4: memref<128x128xf32, #tpu.memory_space<vmem>>, %arg5: memref<128x128xf32, #tpu.memory_space<vmem>>, %arg6: memref<128x128xf32, #tpu.memory_space<vmem>>, %arg7: memref<128x128xf32, #tpu.memory_space<vmem>>, %arg8: memref<128x128xf32, #tpu.memory_space<vmem>>, %arg9: memref<1x128xf32, #tpu.memory_space<vmem>>, %arg10: memref<1x128xf32, #tpu.memory_space<vmem>>, %arg11: memref<1x128xf32, #tpu.memory_space<vmem>>, %arg12: memref<256x128xf32, #tpu.memory_space<vmem>>) attributes {dimension_semantics = [#tpu.dimension_semantics<parallel>], iteration_bounds = array<i64: 1>, scalar_prefetch = 0 : i64, scratch_operands = 0 : i64, tpu.core_type = #tpu.core_type<tc>, window_params = [{transform_indices = @transform_0, window_bounds = array<i64: 256, 128>}, {transform_indices = @transform_1, window_bounds = array<i64: 256, 128>}, {pipeline_mode = #tpu.pipeline_mode<synchronous>, transform_indices = @transform_2, window_bounds = array<i64: 128, 128>}, {pipeline_mode = #tpu.pipeline_mode<synchronous>, transform_indices = @transform_3, window_bounds = array<i64: 128, 128>}, {pipeline_mode = #tpu.pipeline_mode<synchronous>, transform_indices = @transform_4, window_bounds = array<i64: 128, 128>}, {pipeline_mode = #tpu.pipeline_mode<synchronous>, transform_indices = @transform_5, window_bounds = array<i64: 128, 128>}, {pipeline_mode = #tpu.pipeline_mode<synchronous>, transform_indices = @transform_6, window_bounds = array<i64: 128, 128>}, {pipeline_mode = #tpu.pipeline_mode<synchronous>, transform_indices = @transform_7, window_bounds = array<i64: 128, 128>}, {pipeline_mode = #tpu.pipeline_mode<synchronous>, transform_indices = @transform_8, window_bounds = array<i64: 1, 128>}, {pipeline_mode = #tpu.pipeline_mode<synchronous>, transform_indices = @transform_9, window_bounds = array<i64: 1, 128>}, {pipeline_mode = #tpu.pipeline_mode<synchronous>, transform_indices = @transform_10, window_bounds = array<i64: 1, 128>}, {transform_indices = @transform_11, window_bounds = array<i64: 256, 128>}]} {
    %c0 = arith.constant 0 : index
    %c0_0 = arith.constant 0 : index
    %0 = vector.load %arg1[%c0, %c0_0] : memref<256x128xf32, #tpu.memory_space<vmem>>, vector<256x128xf32>
    %c0_1 = arith.constant 0 : index
    %c0_2 = arith.constant 0 : index
    %1 = vector.load %arg2[%c0_1, %c0_2] : memref<256x128xf32, #tpu.memory_space<vmem>>, vector<256x128xf32>
    %c0_3 = arith.constant 0 : index
    %c0_4 = arith.constant 0 : index
    %2 = vector.load %arg3[%c0_3, %c0_4] : memref<128x128xf32, #tpu.memory_space<vmem>>, vector<128x128xf32>
    %cst = arith.constant dense<0.000000e+00> : vector<256x128xf32>
    %3 = tpu.matmul %0, %2, %cst {dimension_numbers = #tpu.dot_dimension_numbers<[1], [0], [0], [1], [0, 0, 1, 1], [], []>} : vector<256x128xf32>, vector<128x128xf32>, vector<256x128xf32> -> vector<256x128xf32>
    %c0_5 = arith.constant 0 : index
    %c0_6 = arith.constant 0 : index
    %4 = vector.load %arg4[%c0_5, %c0_6] : memref<128x128xf32, #tpu.memory_space<vmem>>, vector<128x128xf32>
    %cst_7 = arith.constant dense<0.000000e+00> : vector<256x128xf32>
    %5 = tpu.matmul %1, %4, %cst_7 {dimension_numbers = #tpu.dot_dimension_numbers<[1], [0], [0], [1], [0, 0, 1, 1], [], []>} : vector<256x128xf32>, vector<128x128xf32>, vector<256x128xf32> -> vector<256x128xf32>
    %6 = arith.addf %3, %5 : vector<256x128xf32>
    %c0_8 = arith.constant 0 : index
    %c0_9 = arith.constant 0 : index
    %7 = vector.load %arg9[%c0_8, %c0_9] : memref<1x128xf32, #tpu.memory_space<vmem>>, vector<1x128xf32>
    %8 = vector.broadcast %7 : vector<1x128xf32> to vector<256x128xf32>
    %9 = arith.addf %6, %8 : vector<256x128xf32>
    %10 = arith.negf %9 : vector<256x128xf32>
    %11 = math.exp %10 : vector<256x128xf32>
    %cst_10 = arith.constant 1.000000e+00 : f32
    %12 = vector.broadcast %cst_10 : f32 to vector<256x128xf32>
    %13 = arith.addf %12, %11 : vector<256x128xf32>
    %14 = arith.divf %12, %13 : vector<256x128xf32>
    %c0_11 = arith.constant 0 : index
    %c0_12 = arith.constant 0 : index
    %15 = vector.load %arg5[%c0_11, %c0_12] : memref<128x128xf32, #tpu.memory_space<vmem>>, vector<128x128xf32>
    %cst_13 = arith.constant dense<0.000000e+00> : vector<256x128xf32>
    %16 = tpu.matmul %0, %15, %cst_13 {dimension_numbers = #tpu.dot_dimension_numbers<[1], [0], [0], [1], [0, 0, 1, 1], [], []>} : vector<256x128xf32>, vector<128x128xf32>, vector<256x128xf32> -> vector<256x128xf32>
    %c0_14 = arith.constant 0 : index
    %c0_15 = arith.constant 0 : index
    %17 = vector.load %arg6[%c0_14, %c0_15] : memref<128x128xf32, #tpu.memory_space<vmem>>, vector<128x128xf32>
    %cst_16 = arith.constant dense<0.000000e+00> : vector<256x128xf32>
    %18 = tpu.matmul %1, %17, %cst_16 {dimension_numbers = #tpu.dot_dimension_numbers<[1], [0], [0], [1], [0, 0, 1, 1], [], []>} : vector<256x128xf32>, vector<128x128xf32>, vector<256x128xf32> -> vector<256x128xf32>
    %19 = arith.addf %16, %18 : vector<256x128xf32>
    %c0_17 = arith.constant 0 : index
    %c0_18 = arith.constant 0 : index
    %20 = vector.load %arg10[%c0_17, %c0_18] : memref<1x128xf32, #tpu.memory_space<vmem>>, vector<1x128xf32>
    %21 = vector.broadcast %20 : vector<1x128xf32> to vector<256x128xf32>
    %22 = arith.addf %19, %21 : vector<256x128xf32>
    %23 = arith.negf %22 : vector<256x128xf32>
    %24 = math.exp %23 : vector<256x128xf32>
    %cst_19 = arith.constant 1.000000e+00 : f32
    %25 = vector.broadcast %cst_19 : f32 to vector<256x128xf32>
    %26 = arith.addf %25, %24 : vector<256x128xf32>
    %27 = arith.divf %25, %26 : vector<256x128xf32>
    %c0_20 = arith.constant 0 : index
    %c0_21 = arith.constant 0 : index
    %28 = vector.load %arg7[%c0_20, %c0_21] : memref<128x128xf32, #tpu.memory_space<vmem>>, vector<128x128xf32>
    %cst_22 = arith.constant dense<0.000000e+00> : vector<256x128xf32>
    %29 = tpu.matmul %0, %28, %cst_22 {dimension_numbers = #tpu.dot_dimension_numbers<[1], [0], [0], [1], [0, 0, 1, 1], [], []>} : vector<256x128xf32>, vector<128x128xf32>, vector<256x128xf32> -> vector<256x128xf32>
    %30 = arith.mulf %27, %1 : vector<256x128xf32>
    %c0_23 = arith.constant 0 : index
    %c0_24 = arith.constant 0 : index
    %31 = vector.load %arg8[%c0_23, %c0_24] : memref<128x128xf32, #tpu.memory_space<vmem>>, vector<128x128xf32>
    %cst_25 = arith.constant dense<0.000000e+00> : vector<256x128xf32>
    %32 = tpu.matmul %30, %31, %cst_25 {dimension_numbers = #tpu.dot_dimension_numbers<[1], [0], [0], [1], [0, 0, 1, 1], [], []>} : vector<256x128xf32>, vector<128x128xf32>, vector<256x128xf32> -> vector<256x128xf32>
    %33 = arith.addf %29, %32 : vector<256x128xf32>
    %c0_26 = arith.constant 0 : index
    %c0_27 = arith.constant 0 : index
    %34 = vector.load %arg11[%c0_26, %c0_27] : memref<1x128xf32, #tpu.memory_space<vmem>>, vector<1x128xf32>
    %35 = vector.broadcast %34 : vector<1x128xf32> to vector<256x128xf32>
    %36 = arith.addf %33, %35 : vector<256x128xf32>
    %37 = math.tanh %36 : vector<256x128xf32>
    %38 = arith.mulf %37, %14 : vector<256x128xf32>
    %cst_28 = arith.constant 1.000000e+00 : f32
    %39 = vector.broadcast %cst_28 : f32 to vector<256x128xf32>
    %40 = arith.subf %39, %14 : vector<256x128xf32>
    %41 = arith.mulf %1, %40 : vector<256x128xf32>
    %42 = arith.addf %38, %41 : vector<256x128xf32>
    %c0_29 = arith.constant 0 : index
    %c0_30 = arith.constant 0 : index
    %43 = vector.load %arg12[%c0_29, %c0_30] : memref<256x128xf32, #tpu.memory_space<vmem>>, vector<256x128xf32>
    tpu.vector_store %arg12[%c0_29, %c0_30], %42 {strides = array<i32>} : memref<256x128xf32, #tpu.memory_space<vmem>>, vector<256x128xf32>,
    return
  }
  func.func @transform_0(%arg0: i32) -> (i32, i32) {
    %c0_i32 = arith.constant 0 : i32
    %c0_i32_0 = arith.constant 0 : i32
    return %arg0, %c0_i32 : i32, i32
  }
  func.func @transform_1(%arg0: i32) -> (i32, i32) {
    %c0_i32 = arith.constant 0 : i32
    %c0_i32_0 = arith.constant 0 : i32
    return %arg0, %c0_i32 : i32, i32
  }
  func.func @transform_2(%arg0: i32) -> (i32, i32) {
    %c0_i32 = arith.constant 0 : i32
    %c0_i32_0 = arith.constant 0 : i32
    %c0_i32_1 = arith.constant 0 : i32
    return %c0_i32, %c0_i32_0 : i32, i32
  }
  func.func @transform_3(%arg0: i32) -> (i32, i32) {
    %c0_i32 = arith.constant 0 : i32
    %c0_i32_0 = arith.constant 0 : i32
    %c0_i32_1 = arith.constant 0 : i32
    return %c0_i32, %c0_i32_0 : i32, i32
  }
  func.func @transform_4(%arg0: i32) -> (i32, i32) {
    %c0_i32 = arith.constant 0 : i32
    %c0_i32_0 = arith.constant 0 : i32
    %c0_i32_1 = arith.constant 0 : i32
    return %c0_i32, %c0_i32_0 : i32, i32
  }
  func.func @transform_5(%arg0: i32) -> (i32, i32) {
    %c0_i32 = arith.constant 0 : i32
    %c0_i32_0 = arith.constant 0 : i32
    %c0_i32_1 = arith.constant 0 : i32
    return %c0_i32, %c0_i32_0 : i32, i32
  }
  func.func @transform_6(%arg0: i32) -> (i32, i32) {
    %c0_i32 = arith.constant 0 : i32
    %c0_i32_0 = arith.constant 0 : i32
    %c0_i32_1 = arith.constant 0 : i32
    return %c0_i32, %c0_i32_0 : i32, i32
  }
  func.func @transform_7(%arg0: i32) -> (i32, i32) {
    %c0_i32 = arith.constant 0 : i32
    %c0_i32_0 = arith.constant 0 : i32
    %c0_i32_1 = arith.constant 0 : i32
    return %c0_i32, %c0_i32_0 : i32, i32
  }
  func.func @transform_8(%arg0: i32) -> (i32, i32) {
    %c0_i32 = arith.constant 0 : i32
    %c0_i32_0 = arith.constant 0 : i32
    %c0_i32_1 = arith.constant 0 : i32
    return %c0_i32, %c0_i32_0 : i32, i32
  }
  func.func @transform_9(%arg0: i32) -> (i32, i32) {
    %c0_i32 = arith.constant 0 : i32
    %c0_i32_0 = arith.constant 0 : i32
    %c0_i32_1 = arith.constant 0 : i32
    return %c0_i32, %c0_i32_0 : i32, i32
  }
  func.func @transform_10(%arg0: i32) -> (i32, i32) {
    %c0_i32 = arith.constant 0 : i32
    %c0_i32_0 = arith.constant 0 : i32
    %c0_i32_1 = arith.constant 0 : i32
    return %c0_i32, %c0_i32_0 : i32, i32
  }
  func.func @transform_11(%arg0: i32) -> (i32, i32) {
    %c0_i32 = arith.constant 0 : i32
    %c0_i32_0 = arith.constant 0 : i32
    return %arg0, %c0_i32 : i32, i32
  }
}

module attributes {stable_mosaic.version = 11 : i64} {
  func.func @_gsl_mask_kernel(%arg0: i32, %arg1: i32, %arg2: i32, %arg3: memref<1x128x128xf32, #tpu.memory_space<vmem>>, %arg4: memref<1x128x1xf32, #tpu.memory_space<vmem>>, %arg5: memref<1x1x128xf32, #tpu.memory_space<vmem>>, %arg6: memref<1x128x128xf32, #tpu.memory_space<vmem>>) attributes {dimension_semantics = [#tpu.dimension_semantics<parallel>, #tpu.dimension_semantics<parallel>, #tpu.dimension_semantics<parallel>], iteration_bounds = array<i64: 2, 1, 1>, scalar_prefetch = 0 : i64, scratch_operands = 0 : i64, tpu.core_type = #tpu.core_type<tc>, window_params = [{transform_indices = @transform_0, window_bounds = array<i64: 1, 128, 128>}, {transform_indices = @transform_1, window_bounds = array<i64: 1, 128, 1>}, {transform_indices = @transform_2, window_bounds = array<i64: 1, 1, 128>}, {transform_indices = @transform_3, window_bounds = array<i64: 1, 128, 128>}]} {
    %c0 = arith.constant 0 : index
    %c0_0 = arith.constant 0 : index
    %c0_1 = arith.constant 0 : index
    %0 = vector.load %arg4[%c0, %c0_0, %c0_1] : memref<1x128x1xf32, #tpu.memory_space<vmem>>, vector<1x128x1xf32>
    %1 = vector.shape_cast %0 : vector<1x128x1xf32> to vector<128x1xf32>
    %c0_2 = arith.constant 0 : index
    %c0_3 = arith.constant 0 : index
    %c0_4 = arith.constant 0 : index
    %2 = vector.load %arg5[%c0_2, %c0_3, %c0_4] : memref<1x1x128xf32, #tpu.memory_space<vmem>>, vector<1x1x128xf32>
    %3 = vector.shape_cast %2 : vector<1x1x128xf32> to vector<1x128xf32>
    %4 = vector.broadcast %1 : vector<128x1xf32> to vector<128x128xf32>
    %5 = vector.broadcast %3 : vector<1x128xf32> to vector<128x128xf32>
    %6 = arith.maximumf %4, %5 : vector<128x128xf32>
    %c0_5 = arith.constant 0 : index
    %c0_6 = arith.constant 0 : index
    %c0_7 = arith.constant 0 : index
    %7 = vector.load %arg3[%c0_5, %c0_6, %c0_7] : memref<1x128x128xf32, #tpu.memory_space<vmem>>, vector<1x128x128xf32>
    %8 = vector.shape_cast %7 : vector<1x128x128xf32> to vector<128x128xf32>
    %9 = arith.mulf %8, %6 : vector<128x128xf32>
    %c0_8 = arith.constant 0 : index
    %c0_9 = arith.constant 0 : index
    %c0_10 = arith.constant 0 : index
    %10 = vector.load %arg6[%c0_8, %c0_9, %c0_10] : memref<1x128x128xf32, #tpu.memory_space<vmem>>, vector<1x128x128xf32>
    %11 = vector.shape_cast %10 : vector<1x128x128xf32> to vector<128x128xf32>
    %12 = vector.shape_cast %9 : vector<128x128xf32> to vector<1x128x128xf32>
    tpu.vector_store %arg6[%c0_8, %c0_9, %c0_10], %12 {strides = array<i32>} : memref<1x128x128xf32, #tpu.memory_space<vmem>>, vector<1x128x128xf32>,
    return
  }
  func.func @transform_0(%arg0: i32, %arg1: i32, %arg2: i32) -> (i32, i32, i32) {
    %c0_i32 = arith.constant 0 : i32
    return %arg0, %arg1, %arg2 : i32, i32, i32
  }
  func.func @transform_1(%arg0: i32, %arg1: i32, %arg2: i32) -> (i32, i32, i32) {
    %c0_i32 = arith.constant 0 : i32
    %c0_i32_0 = arith.constant 0 : i32
    return %arg0, %arg1, %c0_i32 : i32, i32, i32
  }
  func.func @transform_2(%arg0: i32, %arg1: i32, %arg2: i32) -> (i32, i32, i32) {
    %c0_i32 = arith.constant 0 : i32
    %c0_i32_0 = arith.constant 0 : i32
    return %arg0, %c0_i32, %arg2 : i32, i32, i32
  }
  func.func @transform_3(%arg0: i32, %arg1: i32, %arg2: i32) -> (i32, i32, i32) {
    %c0_i32 = arith.constant 0 : i32
    return %arg0, %arg1, %arg2 : i32, i32, i32
  }
}

</mosaic_0001>

<bundles_post_ra>
// kernel: _lambda_.14
= control target key start
LH: loop header
LB: loop body
LE: loop exit
PB: predicated region body
PF: predicated region fallthrough
CT: control target
= control target key end

     0   :  { %s869_s9 = smov 0   ;;  %s871_s10 = smov 0   ;;  %s964_s0 = inlined_call_operand.vmem [shape: f32[2,128,128], index: 0, kind: input, shape index: {}]   ;;  %s965_s1 = inlined_call_operand.vmem [shape: f32[2,128,128], index: 1, kind: input, shape index: {}]   ;;  %s966_s2 = inlined_call_operand.vmem [shape: f32[2,128,128], index: 2, kind: output, shape index: {}]  }
   0x1   :  { %s873_s11 = smov 0  }
   0x2 LB: > { %s38_s12 = sadd.s32 1, %s848_s10  ;;  %p674_p0 = scmp.ge.s32.totalorder %s852_s11, 1  ;;  %s852_s11 = sphi %s873_s11, %s12_s11   ;;  %s848_s10 = sphi %s871_s10, %s968_s10   ;;  %s844_s9 = sphi %s869_s9, %s967_s9  }
   0x3   : > { %p40_p1 = scmp.ge.s32.totalorder %s38_s12, 2  ;;  %p176_p2 = scmp.lt.s32.totalorder %s852_s11, 3 }
   0x5   : > { %s970_s12 = smov (%p40_p1, %s38_s12), 0  ;;  %p177_p3 = pnand %p674_p0, %p176_p2 }
   0x6   : > { %p225_p4 = scmp.lt.s32.totalorder (!%p177_p3), %s844_s9, 1 }
   0x7   : > { %180 = sbr.rel (%p177_p3) target bundleno = 257 (0x101), region = 28 }
   0xc   : > { %s972_s9 = smov (!%p225_p4, %s844_s9), 1 }
   0xd   : > { %s887_s13 = sshll.u32 %s972_s9, 7 }
   0xe   : > { %s893_s16 = scalar_lea.vmem %s965_s1, %s887_s13  ;;  %s914_s19 = scalar_lea.vmem %s964_s0, %s887_s13 }
   0xf   : > { %v330_v0 = vld [vmem:[%s893_s16 + $0x78] sm:$0xff]  ;;  %v329_v1 = vld [vmem:[%s893_s16 + $0x70] sm:$0xff]  ;;  %v328_v2 = vld [vmem:[%s893_s16 + $0x68] sm:$0xff]  ;;  %s937_s22 = scalar_lea.vmem %s966_s2, %s887_s13 }
  0x10   : > { %718 = vmatprep.subr.mxu0 %v330_v0  ;;  %774 = vmatprep.subr.mxu1 %v330_v0  ;;  %v327_v3 = vld [vmem:[%s893_s16 + $0x60] sm:$0xff]  ;;  %v326_v4 = vld [vmem:[%s893_s16 + $0x58] sm:$0xff]  ;;  %v325_v5 = vld [vmem:[%s893_s16 + $0x50] sm:$0xff] }
  0x11   : > { %719 = vmatpush3.msra.mxu0 %v330_v0  ;;  %790 = vmatpush3.msra.mxu1 %v330_v0  ;;  %v324_v6 = vld [vmem:[%s893_s16 + $0x48] sm:$0xff]  ;;  %v323_v7 = vld [vmem:[%s893_s16 + $0x40] sm:$0xff]  ;;  %v322_v8 = vld [vmem:[%s893_s16 + $0x38] sm:$0xff] }
  0x12   : > { %720 = vmatprep.subr.mxu0 %v329_v1  ;;  %775 = vmatprep.subr.mxu1 %v329_v1  ;;  %v321_v9 = vld [vmem:[%s893_s16 + $0x30] sm:$0xff]  ;;  %v320_v10 = vld [vmem:[%s893_s16 + $0x28] sm:$0xff]  ;;  %v319_v11 = vld [vmem:[%s893_s16 + $0x20] sm:$0xff] }
  0x13   : > { %721 = vmatpush3.msra.mxu0 %v329_v1  ;;  %791 = vmatpush3.msra.mxu1 %v329_v1  ;;  %v318_v12 = vld [vmem:[%s893_s16 + $0x18] sm:$0xff]  ;;  %v317_v13 = vld [vmem:[%s893_s16 + $0x10] sm:$0xff]  ;;  %v316_v14 = vld [vmem:[%s893_s16 + $0x8] sm:$0xff] }
  0x14   : > { %722 = vmatprep.subr.mxu0 %v328_v2  ;;  %776 = vmatprep.subr.mxu1 %v328_v2  ;;  %v315_v15 = vld [vmem:[%s893_s16] sm:$0xff]  ;;  %v300_v18 = vld [vmem:[%s914_s19 + $0x8] sm:$0xff]  ;;  %v301_v20 = vld [vmem:[%s914_s19 + $0x10] sm:$0xff] }
  0x15   : > { %723 = vmatpush3.msra.mxu0 %v328_v2  ;;  %792 = vmatpush3.msra.mxu1 %v328_v2  ;;  %v299_v16 = vld [vmem:[%s914_s19] sm:$0xff]  ;;  %v308_v19 = vld [vmem:[%s914_s19 + $0x48] sm:$0xff]  ;;  %v309_v21 = vld [vmem:[%s914_s19 + $0x50] sm:$0xff] }
  0x16   : > { %724 = vmatprep.subr.mxu0 %v327_v3  ;;  %777 = vmatprep.subr.mxu1 %v327_v3  ;;  %v307_v17 = vld [vmem:[%s914_s19 + $0x40] sm:$0xff]  ;;  %v302_v22 = vld [vmem:[%s914_s19 + $0x18] sm:$0xff]  ;;  %v304_v26 = vld [vmem:[%s914_s19 + $0x28] sm:$0xff] }
  0x17   : > { %725 = vmatpush3.msra.mxu0 %v327_v3  ;;  %793 = vmatpush3.msra.mxu1 %v327_v3  ;;  %v310_v23 = vld [vmem:[%s914_s19 + $0x58] sm:$0xff]  ;;  %v303_v24 = vld [vmem:[%s914_s19 + $0x20] sm:$0xff]  ;;  %v312_v27 = vld [vmem:[%s914_s19 + $0x68] sm:$0xff] }
  0x18   : > { %726 = vmatprep.subr.mxu0 %v326_v4  ;;  %778 = vmatprep.subr.mxu1 %v326_v4  ;;  %v311_v25 = vld [vmem:[%s914_s19 + $0x60] sm:$0xff]  ;;  %v305_v28 = vld [vmem:[%s914_s19 + $0x30] sm:$0xff]  ;;  %v306_v30 = vld [vmem:[%s914_s19 + $0x38] sm:$0xff] }
  0x19   : > { %727 = vmatpush3.msra.mxu0 %v326_v4  ;;  %794 = vmatpush3.msra.mxu1 %v326_v4  ;;  %v313_v29 = vld [vmem:[%s914_s19 + $0x70] sm:$0xff]  ;;  %v314_v31 = vld [vmem:[%s914_s19 + $0x78] sm:$0xff] }
  0x1a   : > { %728 = vmatprep.subr.mxu0 %v325_v5  ;;  %779 = vmatprep.subr.mxu1 %v325_v5 }
  0x1b   : > { %729 = vmatpush3.msra.mxu0 %v325_v5  ;;  %795 = vmatpush3.msra.mxu1 %v325_v5 }
  0x1c   : > { %730 = vmatprep.subr.mxu0 %v324_v6  ;;  %780 = vmatprep.subr.mxu1 %v324_v6 }
  0x1d   : > { %731 = vmatpush3.msra.mxu0 %v324_v6  ;;  %796 = vmatpush3.msra.mxu1 %v324_v6 }
  0x1e   : > { %732 = vmatprep.subr.mxu0 %v323_v7  ;;  %781 = vmatprep.subr.mxu1 %v323_v7 }
  0x1f   : > { %733 = vmatpush3.msra.mxu0 %v323_v7  ;;  %797 = vmatpush3.msra.mxu1 %v323_v7 }
  0x20   : > { %734 = vmatprep.subr.mxu0 %v322_v8  ;;  %782 = vmatprep.subr.mxu1 %v322_v8 }
  0x21   : > { %735 = vmatpush3.msra.mxu0 %v322_v8  ;;  %798 = vmatpush3.msra.mxu1 %v322_v8 }
  0x22   : > { %736 = vmatprep.subr.mxu0 %v321_v9  ;;  %783 = vmatprep.subr.mxu1 %v321_v9 }
  0x23   : > { %737 = vmatpush3.msra.mxu0 %v321_v9  ;;  %799 = vmatpush3.msra.mxu1 %v321_v9 }
  0x24   : > { %738 = vmatprep.subr.mxu0 %v320_v10  ;;  %784 = vmatprep.subr.mxu1 %v320_v10 }
  0x25   : > { %739 = vmatpush3.msra.mxu0 %v320_v10  ;;  %800 = vmatpush3.msra.mxu1 %v320_v10 }
  0x26   : > { %740 = vmatprep.subr.mxu0 %v319_v11  ;;  %785 = vmatprep.subr.mxu1 %v319_v11 }
  0x27   : > { %741 = vmatpush3.msra.mxu0 %v319_v11  ;;  %801 = vmatpush3.msra.mxu1 %v319_v11 }
  0x28   : > { %742 = vmatprep.subr.mxu0 %v318_v12  ;;  %786 = vmatprep.subr.mxu1 %v318_v12 }
  0x29   : > { %743 = vmatpush3.msra.mxu0 %v318_v12  ;;  %802 = vmatpush3.msra.mxu1 %v318_v12 }
  0x2a   : > { %744 = vmatprep.subr.mxu0 %v317_v13  ;;  %787 = vmatprep.subr.mxu1 %v317_v13 }
  0x2b   : > { %745 = vmatpush3.msra.mxu0 %v317_v13  ;;  %803 = vmatpush3.msra.mxu1 %v317_v13 }
  0x2c   : > { %746 = vmatprep.subr.mxu0 %v316_v14  ;;  %788 = vmatprep.subr.mxu1 %v316_v14 }
  0x2d   : > { %747 = vmatpush3.msra.mxu0 %v316_v14  ;;  %804 = vmatpush3.msra.mxu1 %v316_v14 }
  0x2e   : > { %748 = vmatprep.subr.mxu0 %v315_v15  ;;  %789 = vmatprep.subr.mxu1 %v315_v15 }
  0x2f   : > { %749 = vmatpush3.msra.mxu0 %v315_v15  ;;  %805 = vmatpush3.msra.mxu1 %v315_v15 }
  0x30   : > { %750 = vmatprep.mubr.f32.mxu0 %v299_v16  ;;  %762 = vmatprep.mubr.f32.mxu1 %v307_v17 }
  0x31   : > { %751 = vmatmul.mubr.f32.vlgmr.msra.gmra.mxu0 %v300_v18  ;;  %763 = vmatmul.mubr.f32.vlgmr.msra.gmra.mxu1 %v308_v19 }
  0x32   : > { %753 = vmatprep.mubr.f32.mxu0 %v301_v20  ;;  %765 = vmatprep.mubr.f32.mxu1 %v309_v21 }
  0x35   : > { %754 = vmatmul.mubr.f32.gmra.mxu0 %v302_v22  ;;  %766 = vmatmul.mubr.f32.gmra.mxu1 %v310_v23 }
  0x36   : > { %756 = vmatprep.mubr.f32.mxu0 %v303_v24  ;;  %768 = vmatprep.mubr.f32.mxu1 %v311_v25 }
  0x39   : > { %757 = vmatmul.mubr.f32.gmra.mxu0 %v304_v26  ;;  %769 = vmatmul.mubr.f32.gmra.mxu1 %v312_v27 }
  0x3a   : > { %759 = vmatprep.mubr.f32.mxu0 %v305_v28  ;;  %771 = vmatprep.mubr.f32.mxu1 %v313_v29 }
  0x3d   : > { %760 = vmatmul.mubr.f32.gmra.mxu0 %v306_v30  ;;  %772 = vmatmul.mubr.f32.gmra.mxu1 %v314_v31 }
  0xf1   : > { %v752_v32 = vpop.f32.mrf.mxu0  ;;  %v764_v33 = vpop.f32.mrf.mxu1 }
  0xf2   : > { %528 = vst [vmem:[%s937_s22 + $0x8] sm:$0xff] %v752_v32  ;;  %536 = vst [vmem:[%s937_s22 + $0x48] sm:$0xff] %v764_v33 }
  0xf3   : > { %v397_v34 = vpop.f32.mrf.mxu0  ;;  %v437_v35 = vpop.f32.mrf.mxu1 }
  0xf4   : > { %527 = vst [vmem:[%s937_s22] sm:$0xff] %v397_v34  ;;  %535 = vst [vmem:[%s937_s22 + $0x40] sm:$0xff] %v437_v35 }
  0xf5   : > { %v755_v36 = vpop.f32.mrf.mxu0  ;;  %v767_v37 = vpop.f32.mrf.mxu1 }
  0xf6   : > { %530 = vst [vmem:[%s937_s22 + $0x18] sm:$0xff] %v755_v36  ;;  %538 = vst [vmem:[%s937_s22 + $0x58] sm:$0xff] %v767_v37 }
  0xf7   : > { %v407_v38 = vpop.f32.mrf.mxu0  ;;  %v447_v39 = vpop.f32.mrf.mxu1 }
  0xf8   : > { %529 = vst [vmem:[%s937_s22 + $0x10] sm:$0xff] %v407_v38  ;;  %537 = vst [vmem:[%s937_s22 + $0x50] sm:$0xff] %v447_v39 }
  0xf9   : > { %v758_v40 = vpop.f32.mrf.mxu0  ;;  %v770_v41 = vpop.f32.mrf.mxu1 }
  0xfa   : > { %532 = vst [vmem:[%s937_s22 + $0x28] sm:$0xff] %v758_v40  ;;  %540 = vst [vmem:[%s937_s22 + $0x68] sm:$0xff] %v770_v41 }
  0xfb   : > { %v417_v42 = vpop.f32.mrf.mxu0  ;;  %v457_v43 = vpop.f32.mrf.mxu1 }
  0xfc   : > { %531 = vst [vmem:[%s937_s22 + $0x20] sm:$0xff] %v417_v42  ;;  %539 = vst [vmem:[%s937_s22 + $0x60] sm:$0xff] %v457_v43 }
  0xfd   : > { %v761_v44 = vpop.f32.mrf.mxu0  ;;  %v773_v45 = vpop.f32.mrf.mxu1 }
  0xfe   : > { %534 = vst [vmem:[%s937_s22 + $0x38] sm:$0xff] %v761_v44  ;;  %542 = vst [vmem:[%s937_s22 + $0x78] sm:$0xff] %v773_v45 }
  0xff   : > { %v427_v46 = vpop.f32.mrf.mxu0  ;;  %v467_v47 = vpop.f32.mrf.mxu1 }
 0x100   : > { %533 = vst [vmem:[%s937_s22 + $0x30] sm:$0xff] %v427_v46  ;;  %541 = vst [vmem:[%s937_s22 + $0x70] sm:$0xff] %v467_v47 }
 0x101 PF: > { %s12_s11 = sadd.s32 1, %s852_s11   ;;  %s967_s9 = smov %s848_s10 }
 0x102   : > { %p9_p5 = scmp.ge.s32.totalorder %s12_s11, 4   ;;  %s968_s10 = smov %s970_s12 }
 0x104   :  { %11 = sbr.rel (!%p9_p5) target bundleno = 2 (0x2), region = 69 }

// kernel: _lambda_.13
= control target key start
LH: loop header
LB: loop body
LE: loop exit
PB: predicated region body
PF: predicated region fallthrough
CT: control target
= control target key end

     0   :  { %s902_s1 = inlined_call_operand.vmem [shape: f32[128,128], index: 1, kind: input, shape index: {}]   ;;  %s903_s0 = inlined_call_operand.vmem [shape: f32[256,128], index: 0, kind: input, shape index: {}]   ;;  %s904_s2 = inlined_call_operand.vmem [shape: f32[256,128], index: 2, kind: output, shape index: {}]  }
   0x1   :  { %v126_v0 = vld [vmem:[%s902_s1 + $0x78] sm:$0xff]  ;;  %v125_v1 = vld [vmem:[%s902_s1 + $0x70] sm:$0xff]  ;;  %v124_v2 = vld [vmem:[%s902_s1 + $0x68] sm:$0xff] }
   0x2   :  { %535 = vmatprep.subr.mxu0 %v126_v0  ;;  %615 = vmatprep.subr.mxu1 %v126_v0  ;;  %v123_v3 = vld [vmem:[%s902_s1 + $0x60] sm:$0xff]  ;;  %v122_v4 = vld [vmem:[%s902_s1 + $0x58] sm:$0xff]  ;;  %v121_v5 = vld [vmem:[%s902_s1 + $0x50] sm:$0xff] }
   0x3   :  { %536 = vmatpush3.msra.mxu0 %v126_v0  ;;  %631 = vmatpush3.msra.mxu1 %v126_v0  ;;  %v120_v6 = vld [vmem:[%s902_s1 + $0x48] sm:$0xff]  ;;  %v119_v7 = vld [vmem:[%s902_s1 + $0x40] sm:$0xff]  ;;  %v118_v8 = vld [vmem:[%s902_s1 + $0x38] sm:$0xff] }
   0x4   :  { %537 = vmatprep.subr.mxu0 %v125_v1  ;;  %616 = vmatprep.subr.mxu1 %v125_v1  ;;  %v117_v9 = vld [vmem:[%s902_s1 + $0x30] sm:$0xff]  ;;  %v116_v10 = vld [vmem:[%s902_s1 + $0x28] sm:$0xff]  ;;  %v115_v11 = vld [vmem:[%s902_s1 + $0x20] sm:$0xff] }
   0x5   :  { %538 = vmatpush3.msra.mxu0 %v125_v1  ;;  %632 = vmatpush3.msra.mxu1 %v125_v1  ;;  %v114_v12 = vld [vmem:[%s902_s1 + $0x18] sm:$0xff]  ;;  %v113_v13 = vld [vmem:[%s902_s1 + $0x10] sm:$0xff]  ;;  %v112_v14 = vld [vmem:[%s902_s1 + $0x8] sm:$0xff] }
   0x6   :  { %539 = vmatprep.subr.mxu0 %v124_v2  ;;  %617 = vmatprep.subr.mxu1 %v124_v2  ;;  %v111_v15 = vld [vmem:[%s902_s1] sm:$0xff]  ;;  %v80_v18 = vld [vmem:[%s903_s0 + $0x8] sm:$0xff]  ;;  %v81_v20 = vld [vmem:[%s903_s0 + $0x10] sm:$0xff] }
   0x7   :  { %540 = vmatpush3.msra.mxu0 %v124_v2  ;;  %633 = vmatpush3.msra.mxu1 %v124_v2  ;;  %v79_v16 = vld [vmem:[%s903_s0] sm:$0xff]  ;;  %v96_v19 = vld [vmem:[%s903_s0 + $0x88] sm:$0xff]  ;;  %v97_v21 = vld [vmem:[%s903_s0 + $0x90] sm:$0xff] }
   0x8   :  { %541 = vmatprep.subr.mxu0 %v123_v3  ;;  %618 = vmatprep.subr.mxu1 %v123_v3  ;;  %v95_v17 = vld [vmem:[%s903_s0 + $0x80] sm:$0xff]  ;;  %v82_v22 = vld [vmem:[%s903_s0 + $0x18] sm:$0xff]  ;;  %v84_v26 = vld [vmem:[%s903_s0 + $0x28] sm:$0xff] }
   0x9   :  { %542 = vmatpush3.msra.mxu0 %v123_v3  ;;  %634 = vmatpush3.msra.mxu1 %v123_v3  ;;  %v98_v23 = vld [vmem:[%s903_s0 + $0x98] sm:$0xff]  ;;  %v83_v24 = vld [vmem:[%s903_s0 + $0x20] sm:$0xff]  ;;  %v100_v27 = vld [vmem:[%s903_s0 + $0xa8] sm:$0xff] }
   0xa   :  { %543 = vmatprep.subr.mxu0 %v122_v4  ;;  %619 = vmatprep.subr.mxu1 %v122_v4  ;;  %v99_v25 = vld [vmem:[%s903_s0 + $0xa0] sm:$0xff]  ;;  %v85_v28 = vld [vmem:[%s903_s0 + $0x30] sm:$0xff]  ;;  %v86_v30 = vld [vmem:[%s903_s0 + $0x38] sm:$0xff] }
   0xb   :  { %544 = vmatpush3.msra.mxu0 %v122_v4  ;;  %635 = vmatpush3.msra.mxu1 %v122_v4  ;;  %v101_v29 = vld [vmem:[%s903_s0 + $0xb0] sm:$0xff]  ;;  %v102_v31 = vld [vmem:[%s903_s0 + $0xb8] sm:$0xff]  ;;  %v87_v32 = vld [vmem:[%s903_s0 + $0x40] sm:$0xff] }
   0xc   :  { %545 = vmatprep.subr.mxu0 %v121_v5  ;;  %620 = vmatprep.subr.mxu1 %v121_v5  ;;  %v103_v33 = vld [vmem:[%s903_s0 + $0xc0] sm:$0xff]  ;;  %v88_v34 = vld [vmem:[%s903_s0 + $0x48] sm:$0xff]  ;;  %v89_v36 = vld [vmem:[%s903_s0 + $0x50] sm:$0xff] }
   0xd   :  { %546 = vmatpush3.msra.mxu0 %v121_v5  ;;  %636 = vmatpush3.msra.mxu1 %v121_v5  ;;  %v104_v35 = vld [vmem:[%s903_s0 + $0xc8] sm:$0xff]  ;;  %v105_v37 = vld [vmem:[%s903_s0 + $0xd0] sm:$0xff]  ;;  %v90_v38 = vld [vmem:[%s903_s0 + $0x58] sm:$0xff] }
   0xe   :  { %547 = vmatprep.subr.mxu0 %v120_v6  ;;  %621 = vmatprep.subr.mxu1 %v120_v6  ;;  %v106_v39 = vld [vmem:[%s903_s0 + $0xd8] sm:$0xff]  ;;  %v91_v40 = vld [vmem:[%s903_s0 + $0x60] sm:$0xff]  ;;  %v92_v42 = vld [vmem:[%s903_s0 + $0x68] sm:$0xff] }
   0xf   :  { %548 = vmatpush3.msra.mxu0 %v120_v6  ;;  %637 = vmatpush3.msra.mxu1 %v120_v6  ;;  %v107_v41 = vld [vmem:[%s903_s0 + $0xe0] sm:$0xff]  ;;  %v108_v43 = vld [vmem:[%s903_s0 + $0xe8] sm:$0xff]  ;;  %v93_v44 = vld [vmem:[%s903_s0 + $0x70] sm:$0xff] }
  0x10   :  { %549 = vmatprep.subr.mxu0 %v119_v7  ;;  %622 = vmatprep.subr.mxu1 %v119_v7  ;;  %v109_v45 = vld [vmem:[%s903_s0 + $0xf0] sm:$0xff]  ;;  %v94_v46 = vld [vmem:[%s903_s0 + $0x78] sm:$0xff] }
  0x11   :  { %550 = vmatpush3.msra.mxu0 %v119_v7  ;;  %638 = vmatpush3.msra.mxu1 %v119_v7  ;;  %v110_v47 = vld [vmem:[%s903_s0 + $0xf8] sm:$0xff] }
  0x12   :  { %551 = vmatprep.subr.mxu0 %v118_v8  ;;  %623 = vmatprep.subr.mxu1 %v118_v8 }
  0x13   :  { %552 = vmatpush3.msra.mxu0 %v118_v8  ;;  %639 = vmatpush3.msra.mxu1 %v118_v8 }
  0x14   :  { %553 = vmatprep.subr.mxu0 %v117_v9  ;;  %624 = vmatprep.subr.mxu1 %v117_v9 }
  0x15   :  { %554 = vmatpush3.msra.mxu0 %v117_v9  ;;  %640 = vmatpush3.msra.mxu1 %v117_v9 }
  0x16   :  { %555 = vmatprep.subr.mxu0 %v116_v10  ;;  %625 = vmatprep.subr.mxu1 %v116_v10 }
  0x17   :  { %556 = vmatpush3.msra.mxu0 %v116_v10  ;;  %641 = vmatpush3.msra.mxu1 %v116_v10 }
  0x18   :  { %557 = vmatprep.subr.mxu0 %v115_v11  ;;  %626 = vmatprep.subr.mxu1 %v115_v11 }
  0x19   :  { %558 = vmatpush3.msra.mxu0 %v115_v11  ;;  %642 = vmatpush3.msra.mxu1 %v115_v11 }
  0x1a   :  { %559 = vmatprep.subr.mxu0 %v114_v12  ;;  %627 = vmatprep.subr.mxu1 %v114_v12 }
  0x1b   :  { %560 = vmatpush3.msra.mxu0 %v114_v12  ;;  %643 = vmatpush3.msra.mxu1 %v114_v12 }
  0x1c   :  { %561 = vmatprep.subr.mxu0 %v113_v13  ;;  %628 = vmatprep.subr.mxu1 %v113_v13 }
  0x1d   :  { %562 = vmatpush3.msra.mxu0 %v113_v13  ;;  %644 = vmatpush3.msra.mxu1 %v113_v13 }
  0x1e   :  { %563 = vmatprep.subr.mxu0 %v112_v14  ;;  %629 = vmatprep.subr.mxu1 %v112_v14 }
  0x1f   :  { %564 = vmatpush3.msra.mxu0 %v112_v14  ;;  %645 = vmatpush3.msra.mxu1 %v112_v14 }
  0x20   :  { %565 = vmatprep.subr.mxu0 %v111_v15  ;;  %630 = vmatprep.subr.mxu1 %v111_v15 }
  0x21   :  { %566 = vmatpush3.msra.mxu0 %v111_v15  ;;  %646 = vmatpush3.msra.mxu1 %v111_v15 }
  0x22   :  { %567 = vmatprep.mubr.f32.mxu0 %v79_v16  ;;  %591 = vmatprep.mubr.f32.mxu1 %v95_v17 }
  0x23   :  { %568 = vmatmul.mubr.f32.vlgmr.msra.gmra.mxu0 %v80_v18  ;;  %592 = vmatmul.mubr.f32.vlgmr.msra.gmra.mxu1 %v96_v19 }
  0x24   :  { %570 = vmatprep.mubr.f32.mxu0 %v81_v20  ;;  %594 = vmatprep.mubr.f32.mxu1 %v97_v21 }
  0x27   :  { %571 = vmatmul.mubr.f32.gmra.mxu0 %v82_v22  ;;  %595 = vmatmul.mubr.f32.gmra.mxu1 %v98_v23 }
  0x28   :  { %573 = vmatprep.mubr.f32.mxu0 %v83_v24  ;;  %597 = vmatprep.mubr.f32.mxu1 %v99_v25 }
  0x2b   :  { %574 = vmatmul.mubr.f32.gmra.mxu0 %v84_v26  ;;  %598 = vmatmul.mubr.f32.gmra.mxu1 %v100_v27 }
  0x2c   :  { %576 = vmatprep.mubr.f32.mxu0 %v85_v28  ;;  %600 = vmatprep.mubr.f32.mxu1 %v101_v29 }
  0x2f   :  { %577 = vmatmul.mubr.f32.gmra.mxu0 %v86_v30  ;;  %601 = vmatmul.mubr.f32.gmra.mxu1 %v102_v31 }
  0x30   :  { %579 = vmatprep.mubr.f32.mxu0 %v87_v32  ;;  %603 = vmatprep.mubr.f32.mxu1 %v103_v33 }
  0x33   :  { %580 = vmatmul.mubr.f32.gmra.mxu0 %v88_v34  ;;  %604 = vmatmul.mubr.f32.gmra.mxu1 %v104_v35 }
  0x34   :  { %582 = vmatprep.mubr.f32.mxu0 %v89_v36  ;;  %606 = vmatprep.mubr.f32.mxu1 %v105_v37 }
  0x37   :  { %583 = vmatmul.mubr.f32.gmra.mxu0 %v90_v38  ;;  %607 = vmatmul.mubr.f32.gmra.mxu1 %v106_v39 }
  0x38   :  { %585 = vmatprep.mubr.f32.mxu0 %v91_v40  ;;  %609 = vmatprep.mubr.f32.mxu1 %v107_v41 }
  0x3b   :  { %586 = vmatmul.mubr.f32.gmra.mxu0 %v92_v42  ;;  %610 = vmatmul.mubr.f32.gmra.mxu1 %v108_v43 }
  0x3c   :  { %588 = vmatprep.mubr.f32.mxu0 %v93_v44  ;;  %612 = vmatprep.mubr.f32.mxu1 %v109_v45 }
  0x3f   :  { %589 = vmatmul.mubr.f32.gmra.mxu0 %v94_v46  ;;  %613 = vmatmul.mubr.f32.gmra.mxu1 %v110_v47 }
  0xe3   :  { %v569_v48 = vpop.f32.mrf.mxu0  ;;  %v593_v49 = vpop.f32.mrf.mxu1 }
  0xe4   :  { %452 = vst [vmem:[%s904_s2 + $0x8] sm:$0xff] %v569_v48  ;;  %468 = vst [vmem:[%s904_s2 + $0x88] sm:$0xff] %v593_v49 }
  0xe5   :  { %v193_v50 = vpop.f32.mrf.mxu0  ;;  %v273_v51 = vpop.f32.mrf.mxu1 }
  0xe6   :  { %451 = vst [vmem:[%s904_s2] sm:$0xff] %v193_v50  ;;  %467 = vst [vmem:[%s904_s2 + $0x80] sm:$0xff] %v273_v51 }
  0xe7   :  { %v572_v52 = vpop.f32.mrf.mxu0  ;;  %v596_v53 = vpop.f32.mrf.mxu1 }
  0xe8   :  { %454 = vst [vmem:[%s904_s2 + $0x18] sm:$0xff] %v572_v52  ;;  %470 = vst [vmem:[%s904_s2 + $0x98] sm:$0xff] %v596_v53 }
  0xe9   :  { %v203_v54 = vpop.f32.mrf.mxu0  ;;  %v283_v55 = vpop.f32.mrf.mxu1 }
  0xea   :  { %453 = vst [vmem:[%s904_s2 + $0x10] sm:$0xff] %v203_v54  ;;  %469 = vst [vmem:[%s904_s2 + $0x90] sm:$0xff] %v283_v55 }
  0xeb   :  { %v575_v56 = vpop.f32.mrf.mxu0  ;;  %v599_v57 = vpop.f32.mrf.mxu1 }
  0xec   :  { %456 = vst [vmem:[%s904_s2 + $0x28] sm:$0xff] %v575_v56  ;;  %472 = vst [vmem:[%s904_s2 + $0xa8] sm:$0xff] %v599_v57 }
  0xed   :  { %v213_v58 = vpop.f32.mrf.mxu0  ;;  %v293_v59 = vpop.f32.mrf.mxu1 }
  0xee   :  { %455 = vst [vmem:[%s904_s2 + $0x20] sm:$0xff] %v213_v58  ;;  %471 = vst [vmem:[%s904_s2 + $0xa0] sm:$0xff] %v293_v59 }
  0xef   :  { %v578_v60 = vpop.f32.mrf.mxu0  ;;  %v602_v61 = vpop.f32.mrf.mxu1 }
  0xf0   :  { %458 = vst [vmem:[%s904_s2 + $0x38] sm:$0xff] %v578_v60  ;;  %474 = vst [vmem:[%s904_s2 + $0xb8] sm:$0xff] %v602_v61 }
  0xf1   :  { %v223_v62 = vpop.f32.mrf.mxu0  ;;  %v303_v63 = vpop.f32.mrf.mxu1 }
  0xf2   :  { %457 = vst [vmem:[%s904_s2 + $0x30] sm:$0xff] %v223_v62  ;;  %473 = vst [vmem:[%s904_s2 + $0xb0] sm:$0xff] %v303_v63 }
  0xf3   :  { %v581_v0 = vpop.f32.mrf.mxu0  ;;  %v605_v1 = vpop.f32.mrf.mxu1 }
  0xf4   :  { %460 = vst [vmem:[%s904_s2 + $0x48] sm:$0xff] %v581_v0  ;;  %476 = vst [vmem:[%s904_s2 + $0xc8] sm:$0xff] %v605_v1 }
  0xf5   :  { %v233_v2 = vpop.f32.mrf.mxu0  ;;  %v313_v3 = vpop.f32.mrf.mxu1 }
  0xf6   :  { %459 = vst [vmem:[%s904_s2 + $0x40] sm:$0xff] %v233_v2  ;;  %475 = vst [vmem:[%s904_s2 + $0xc0] sm:$0xff] %v313_v3 }
  0xf7   :  { %v584_v4 = vpop.f32.mrf.mxu0  ;;  %v608_v5 = vpop.f32.mrf.mxu1 }
  0xf8   :  { %462 = vst [vmem:[%s904_s2 + $0x58] sm:$0xff] %v584_v4  ;;  %478 = vst [vmem:[%s904_s2 + $0xd8] sm:$0xff] %v608_v5 }
  0xf9   :  { %v243_v6 = vpop.f32.mrf.mxu0  ;;  %v323_v7 = vpop.f32.mrf.mxu1 }
  0xfa   :  { %461 = vst [vmem:[%s904_s2 + $0x50] sm:$0xff] %v243_v6  ;;  %477 = vst [vmem:[%s904_s2 + $0xd0] sm:$0xff] %v323_v7 }
  0xfb   :  { %v587_v8 = vpop.f32.mrf.mxu0  ;;  %v611_v9 = vpop.f32.mrf.mxu1 }
  0xfc   :  { %464 = vst [vmem:[%s904_s2 + $0x68] sm:$0xff] %v587_v8  ;;  %480 = vst [vmem:[%s904_s2 + $0xe8] sm:$0xff] %v611_v9 }
  0xfd   :  { %v253_v10 = vpop.f32.mrf.mxu0  ;;  %v333_v11 = vpop.f32.mrf.mxu1 }
  0xfe   :  { %463 = vst [vmem:[%s904_s2 + $0x60] sm:$0xff] %v253_v10  ;;  %479 = vst [vmem:[%s904_s2 + $0xe0] sm:$0xff] %v333_v11 }
  0xff   :  { %v590_v12 = vpop.f32.mrf.mxu0  ;;  %v614_v13 = vpop.f32.mrf.mxu1 }
 0x100   :  { %466 = vst [vmem:[%s904_s2 + $0x78] sm:$0xff] %v590_v12  ;;  %482 = vst [vmem:[%s904_s2 + $0xf8] sm:$0xff] %v614_v13 }
 0x101   :  { %v263_v14 = vpop.f32.mrf.mxu0  ;;  %v343_v15 = vpop.f32.mrf.mxu1 }
 0x102   :  { %465 = vst [vmem:[%s904_s2 + $0x70] sm:$0xff] %v263_v14  ;;  %481 = vst [vmem:[%s904_s2 + $0xf0] sm:$0xff] %v343_v15 }

// kernel: _lambda_.19
= control target key start
LH: loop header
LB: loop body
LE: loop exit
PB: predicated region body
PF: predicated region fallthrough
CT: control target
= control target key end

     0   :  { %s686_s12 = smov 0   ;;  %s688_s13 = smov 0   ;;  %s788_s0 = inlined_call_operand.vmem [shape: f32[2,128,128], index: 0, kind: input, shape index: {}]   ;;  %s789_s1 = inlined_call_operand.vmem [shape: f32[2,128,1], index: 1, kind: input, shape index: {}]   ;;  %s790_s2 = inlined_call_operand.vmem [shape: f32[2,1,128], index: 2, kind: input, shape index: {}]   ;;  %s791_s3 = inlined_call_operand.vmem [shape: f32[2,128,128], index: 3, kind: output, shape index: {}]  }
   0x1   :  { %s690_s14 = smov 0  }
   0x2 LB: > { %s32_s15 = sadd.s32 1, %s659_s13  ;;  %p601_p0 = scmp.ge.s32.totalorder %s663_s14, 1  ;;  %s663_s14 = sphi %s690_s14, %s13_s14   ;;  %s659_s13 = sphi %s688_s13, %s793_s13   ;;  %s655_s12 = sphi %s686_s12, %s792_s12  }
   0x3   : > { %p34_p1 = scmp.ge.s32.totalorder %s32_s15, 2  ;;  %p202_p2 = scmp.lt.s32.totalorder %s663_s14, 3 }
   0x5   : > { %s795_s15 = smov (%p34_p1, %s32_s15), 0  ;;  %p203_p3 = pnand %p601_p0, %p202_p2 }
   0x6   : > { %p256_p4 = scmp.lt.s32.totalorder (!%p203_p3), %s655_s12, 1 }
   0x7   : > { %206 = sbr.rel (%p203_p3) target bundleno = 173 (0xad), region = 32 }
   0xc   : > { %v665_v0 = vmov 0   ;;  %s797_s12 = smov (!%p256_p4, %s655_s12), 1 }
   0xd   : > { %640 = vset.pattern.permute.xlu1 %v665_v0  ;;  %639 = vset.pattern.permute.xlu0 %v665_v0  ;;  %s707_s16 = sshll.u32 %s797_s12, 7  ;;  %s283_s22 = scalar_lea.vmem %s790_s2, %s797_s12 }
   0xe   : > { %s276_s19 = scalar_lea.vmem %s789_s1, %s707_s16  ;;  %s721_s25 = scalar_lea.vmem %s788_s0, %s707_s16  ;;  %v723_v17 = vld [vmem:[%s283_s22] ss:$0 sm:$0xff] }
   0xf   : > { %v299_v1 = vld [vmem:[%s276_s19 + $0x10] sm:$0xff]  ;;  %v297_v2 = vld [vmem:[%s276_s19] sm:$0xff]  ;;  %v300_v3 = vld [vmem:[%s276_s19 + $0x18] sm:$0xff]  ;;  %s733_s28 = scalar_lea.vmem %s791_s3, %s707_s16 }
  0x10   : > { %326 = vperm.xlu1 %640, %v299_v1   ;;  %316 = vperm.xlu0 %639, %v297_v2   ;;  %v298_v4 = vld [vmem:[%s276_s19 + $0x8] sm:$0xff]  ;;  %v301_v6 = vld [vmem:[%s276_s19 + $0x20] sm:$0xff]  ;;  %v304_v7 = vld [vmem:[%s276_s19 + $0x38] sm:$0xff] }
  0x11   : > { %v302_v5 = vld [vmem:[%s276_s19 + $0x28] sm:$0xff]  ;;  %v303_v8 = vld [vmem:[%s276_s19 + $0x30] sm:$0xff]  ;;  %v305_v10 = vld [vmem:[%s276_s19 + $0x40] sm:$0xff] }
  0x12   : > { %v306_v9 = vld [vmem:[%s276_s19 + $0x48] sm:$0xff]  ;;  %v308_v11 = vld [vmem:[%s276_s19 + $0x58] sm:$0xff]  ;;  %v307_v12 = vld [vmem:[%s276_s19 + $0x50] sm:$0xff] }
  0x13   : > { %v310_v13 = vld [vmem:[%s276_s19 + $0x68] sm:$0xff]  ;;  %v309_v14 = vld [vmem:[%s276_s19 + $0x60] sm:$0xff]  ;;  %v312_v15 = vld [vmem:[%s276_s19 + $0x78] sm:$0xff] }
  0x14   : > { %331 = vperm.xlu1 %640, %v300_v3   ;;  %321 = vperm.xlu0 %639, %v298_v4   ;;  %v311_v16 = vld [vmem:[%s276_s19 + $0x70] sm:$0xff]  ;;  %v416_v21 = vld [vmem:[%s721_s25] sm:$0xff]  ;;  %v419_v27 = vld [vmem:[%s721_s25 + $0x18] sm:$0xff] }
  0x15   : > { %v418_v19 = vld [vmem:[%s721_s25 + $0x10] sm:$0xff]  ;;  %v417_v29 = vld [vmem:[%s721_s25 + $0x8] sm:$0xff]  ;;  %v420_v37 = vld [vmem:[%s721_s25 + $0x20] sm:$0xff] }
  0x16   : > { %v421_v35 = vld [vmem:[%s721_s25 + $0x28] sm:$0xff]  ;;  %v423_v43 = vld [vmem:[%s721_s25 + $0x38] sm:$0xff]  ;;  %v422_v45 = vld [vmem:[%s721_s25 + $0x30] sm:$0xff] }
  0x17   : > { %v425_v51 = vld [vmem:[%s721_s25 + $0x48] sm:$0xff]  ;;  %v424_v53 = vld [vmem:[%s721_s25 + $0x40] sm:$0xff]  ;;  %v427_v59 = vld [vmem:[%s721_s25 + $0x58] sm:$0xff] }
  0x18   : > { %341 = vperm.xlu1 %640, %v302_v5   ;;  %336 = vperm.xlu0 %639, %v301_v6   ;;  %v426_v61 = vld [vmem:[%s721_s25 + $0x50] sm:$0xff]  ;;  %v429_v3 = vld [vmem:[%s721_s25 + $0x68] sm:$0xff]  ;;  %v428_v5 = vld [vmem:[%s721_s25 + $0x60] sm:$0xff] }
  0x1c   : > { %351 = vperm.xlu1 %640, %v304_v7   ;;  %346 = vperm.xlu0 %639, %v303_v8  }
  0x20   : > { %361 = vperm.xlu1 %640, %v306_v9   ;;  %356 = vperm.xlu0 %639, %v305_v10  }
  0x24   : > { %371 = vperm.xlu1 %640, %v308_v11   ;;  %366 = vperm.xlu0 %639, %v307_v12   ;;  %v431_v11 = vld [vmem:[%s721_s25 + $0x78] sm:$0xff] }
  0x28   : > { %381 = vperm.xlu1 %640, %v310_v13   ;;  %376 = vperm.xlu0 %639, %v309_v14   ;;  %v430_v13 = vld [vmem:[%s721_s25 + $0x70] sm:$0xff] }
  0x2c   : > { %391 = vperm.xlu1 %640, %v312_v15   ;;  %386 = vperm.xlu0 %639, %v311_v16  }
  0x8b   : > { %v327_v18 = vpop.permute.xlu1 %326  ;;  %v317_v20 = vpop.permute.xlu0 %316 }
  0x8c   : > { %v402_v22 = vmax.f32 %v327_v18, %v723_v17  ;;  %v400_v23 = vmax.f32 %v317_v20, %v723_v17 }
  0x8e   : > { %v434_v24 = vmul.f32 %v418_v19, %v402_v22  ;;  %v432_v25 = vmul.f32 %v416_v21, %v400_v23 }
  0x8f   : > { %v332_v26 = vpop.permute.xlu1 %331  ;;  %v322_v28 = vpop.permute.xlu0 %321 }
  0x90   : > { %450 = vst [vmem:[%s733_s28 + $0x10] sm:$0xff] %v434_v24  ;;  %448 = vst [vmem:[%s733_s28] sm:$0xff] %v432_v25  ;;  %v403_v30 = vmax.f32 %v332_v26, %v723_v17  ;;  %v401_v31 = vmax.f32 %v322_v28, %v723_v17 }
  0x92   : > { %v435_v32 = vmul.f32 %v419_v27, %v403_v30  ;;  %v433_v33 = vmul.f32 %v417_v29, %v401_v31 }
  0x93   : > { %v342_v34 = vpop.permute.xlu1 %341  ;;  %v337_v36 = vpop.permute.xlu0 %336 }
  0x94   : > { %451 = vst [vmem:[%s733_s28 + $0x18] sm:$0xff] %v435_v32  ;;  %449 = vst [vmem:[%s733_s28 + $0x8] sm:$0xff] %v433_v33  ;;  %v405_v38 = vmax.f32 %v342_v34, %v723_v17  ;;  %v404_v39 = vmax.f32 %v337_v36, %v723_v17 }
  0x96   : > { %v437_v40 = vmul.f32 %v421_v35, %v405_v38  ;;  %v436_v41 = vmul.f32 %v420_v37, %v404_v39 }
  0x97   : > { %v352_v42 = vpop.permute.xlu1 %351  ;;  %v347_v44 = vpop.permute.xlu0 %346 }
  0x98   : > { %453 = vst [vmem:[%s733_s28 + $0x28] sm:$0xff] %v437_v40  ;;  %452 = vst [vmem:[%s733_s28 + $0x20] sm:$0xff] %v436_v41  ;;  %v407_v46 = vmax.f32 %v352_v42, %v723_v17  ;;  %v406_v47 = vmax.f32 %v347_v44, %v723_v17 }
  0x9a   : > { %v439_v48 = vmul.f32 %v423_v43, %v407_v46  ;;  %v438_v49 = vmul.f32 %v422_v45, %v406_v47 }
  0x9b   : > { %v362_v50 = vpop.permute.xlu1 %361  ;;  %v357_v52 = vpop.permute.xlu0 %356 }
  0x9c   : > { %455 = vst [vmem:[%s733_s28 + $0x38] sm:$0xff] %v439_v48  ;;  %454 = vst [vmem:[%s733_s28 + $0x30] sm:$0xff] %v438_v49  ;;  %v409_v54 = vmax.f32 %v362_v50, %v723_v17  ;;  %v408_v55 = vmax.f32 %v357_v52, %v723_v17 }
  0x9e   : > { %v441_v56 = vmul.f32 %v425_v51, %v409_v54  ;;  %v440_v57 = vmul.f32 %v424_v53, %v408_v55 }
  0x9f   : > { %v372_v58 = vpop.permute.xlu1 %371  ;;  %v367_v60 = vpop.permute.xlu0 %366 }
  0xa0   : > { %457 = vst [vmem:[%s733_s28 + $0x48] sm:$0xff] %v441_v56  ;;  %456 = vst [vmem:[%s733_s28 + $0x40] sm:$0xff] %v440_v57  ;;  %v411_v62 = vmax.f32 %v372_v58, %v723_v17  ;;  %v410_v63 = vmax.f32 %v367_v60, %v723_v17 }
  0xa2   : > { %v443_v0 = vmul.f32 %v427_v59, %v411_v62  ;;  %v442_v1 = vmul.f32 %v426_v61, %v410_v63 }
  0xa3   : > { %v382_v2 = vpop.permute.xlu1 %381  ;;  %v377_v4 = vpop.permute.xlu0 %376 }
  0xa4   : > { %459 = vst [vmem:[%s733_s28 + $0x58] sm:$0xff] %v443_v0  ;;  %458 = vst [vmem:[%s733_s28 + $0x50] sm:$0xff] %v442_v1  ;;  %v413_v6 = vmax.f32 %v382_v2, %v723_v17  ;;  %v412_v7 = vmax.f32 %v377_v4, %v723_v17 }
  0xa6   : > { %v445_v8 = vmul.f32 %v429_v3, %v413_v6  ;;  %v444_v9 = vmul.f32 %v428_v5, %v412_v7 }
  0xa7   : > { %v392_v10 = vpop.permute.xlu1 %391  ;;  %v387_v12 = vpop.permute.xlu0 %386 }
  0xa8   : > { %461 = vst [vmem:[%s733_s28 + $0x68] sm:$0xff] %v445_v8  ;;  %460 = vst [vmem:[%s733_s28 + $0x60] sm:$0xff] %v444_v9  ;;  %v415_v14 = vmax.f32 %v392_v10, %v723_v17  ;;  %v414_v15 = vmax.f32 %v387_v12, %v723_v17 }
  0xaa   : > { %v447_v16 = vmul.f32 %v431_v11, %v415_v14  ;;  %v446_v18 = vmul.f32 %v430_v13, %v414_v15 }
  0xac   : > { %463 = vst [vmem:[%s733_s28 + $0x78] sm:$0xff] %v447_v16  ;;  %462 = vst [vmem:[%s733_s28 + $0x70] sm:$0xff] %v446_v18 }
  0xad PF: > { %s13_s14 = sadd.s32 1, %s663_s14   ;;  %s792_s12 = smov %s659_s13 }
  0xae   : > { %p10_p5 = scmp.ge.s32.totalorder %s13_s14, 4   ;;  %s793_s13 = smov %s795_s15 }
  0xb0   :  { %12 = sbr.rel (!%p10_p5) target bundleno = 2 (0x2), region = 68 }

// kernel: _lambda_.15
= control target key start
LH: loop header
LB: loop body
LE: loop exit
PB: predicated region body
PF: predicated region fallthrough
CT: control target
= control target key end

     0   :  { %s5067_s3 = inlined_call_operand.vmem [shape: f32[128,128], index: 3, kind: input, shape index: {}]   ;;  %s5068_s2 = inlined_call_operand.vmem [shape: f32[128,128], index: 2, kind: input, shape index: {}]   ;;  %s5069_s1 = inlined_call_operand.vmem [shape: f32[256,128], index: 1, kind: input, shape index: {}]   ;;  %s5070_s0 = inlined_call_operand.vmem [shape: f32[256,128], index: 0, kind: input, shape index: {}]   ;;  %s5071_s5 = inlined_call_operand.vmem [shape: f32[128,128], index: 5, kind: input, shape index: {}]   ;;  %s5072_s4 = inlined_call_operand.vmem [shape: f32[128,128], index: 4, kind: input, shape index: {}]   ;;  %s5073_s6 = inlined_call_operand.vmem [shape: f32[128,128], index: 6, kind: input, shape index: {}]   ;;  %s5074_s7 = inlined_call_operand.vmem [shape: f32[128,128], index: 7, kind: input, shape index: {}]   ;;  %s5075_s9 = inlined_call_operand.vmem [shape: f32[1,128], index: 9, kind: input, shape index: {}]   ;;  %s5076_s8 = inlined_call_operand.vmem [shape: f32[1,128], index: 8, kind: input, shape index: {}]   ;;  %s5077_s10 = inlined_call_operand.vmem [shape: f32[1,128], index: 10, kind: input, shape index: {}]   ;;  %s5078_s11 = inlined_call_operand.vmem [shape: f32[256,128], index: 11, kind: output, shape index: {}]  }
   0x1   :  { %v133_v0 = vld [vmem:[%s5067_s3 + $0x78] sm:$0xff]  ;;  %v132_v2 = vld [vmem:[%s5067_s3 + $0x70] sm:$0xff]  ;;  %v131_v4 = vld [vmem:[%s5067_s3 + $0x68] sm:$0xff] }
   0x2   :  { %v117_v1 = vld [vmem:[%s5068_s2 + $0x78] sm:$0xff]  ;;  %2632 = vmatprep.subr.mxu0 %v133_v0  ;;  %v116_v3 = vld [vmem:[%s5068_s2 + $0x70] sm:$0xff]  ;;  %v115_v5 = vld [vmem:[%s5068_s2 + $0x68] sm:$0xff] }
   0x3   :  { %2712 = vmatprep.subr.mxu1 %v117_v1  ;;  %2633 = vmatpush3.msra.mxu0 %v133_v0  ;;  %v130_v6 = vld [vmem:[%s5067_s3 + $0x60] sm:$0xff]  ;;  %v129_v8 = vld [vmem:[%s5067_s3 + $0x58] sm:$0xff]  ;;  %v128_v10 = vld [vmem:[%s5067_s3 + $0x50] sm:$0xff] }
   0x4   :  { %2713 = vmatpush3.msra.mxu1 %v117_v1  ;;  %2634 = vmatprep.subr.mxu0 %v132_v2  ;;  %v114_v7 = vld [vmem:[%s5068_s2 + $0x60] sm:$0xff]  ;;  %v113_v9 = vld [vmem:[%s5068_s2 + $0x58] sm:$0xff]  ;;  %v112_v11 = vld [vmem:[%s5068_s2 + $0x50] sm:$0xff] }
   0x5   :  { %2714 = vmatprep.subr.mxu1 %v116_v3  ;;  %2635 = vmatpush3.msra.mxu0 %v132_v2  ;;  %v127_v12 = vld [vmem:[%s5067_s3 + $0x48] sm:$0xff]  ;;  %v126_v14 = vld [vmem:[%s5067_s3 + $0x40] sm:$0xff]  ;;  %v125_v16 = vld [vmem:[%s5067_s3 + $0x38] sm:$0xff] }
   0x6   :  { %2715 = vmatpush3.msra.mxu1 %v116_v3  ;;  %2636 = vmatprep.subr.mxu0 %v131_v4  ;;  %v111_v13 = vld [vmem:[%s5068_s2 + $0x48] sm:$0xff]  ;;  %v110_v15 = vld [vmem:[%s5068_s2 + $0x40] sm:$0xff]  ;;  %v109_v17 = vld [vmem:[%s5068_s2 + $0x38] sm:$0xff] }
   0x7   :  { %2716 = vmatprep.subr.mxu1 %v115_v5  ;;  %2637 = vmatpush3.msra.mxu0 %v131_v4  ;;  %v124_v18 = vld [vmem:[%s5067_s3 + $0x30] sm:$0xff]  ;;  %v123_v20 = vld [vmem:[%s5067_s3 + $0x28] sm:$0xff]  ;;  %v122_v22 = vld [vmem:[%s5067_s3 + $0x20] sm:$0xff] }
   0x8   :  { %2717 = vmatpush3.msra.mxu1 %v115_v5  ;;  %2638 = vmatprep.subr.mxu0 %v130_v6  ;;  %v108_v19 = vld [vmem:[%s5068_s2 + $0x30] sm:$0xff]  ;;  %v107_v21 = vld [vmem:[%s5068_s2 + $0x28] sm:$0xff]  ;;  %v106_v23 = vld [vmem:[%s5068_s2 + $0x20] sm:$0xff] }
   0x9   :  { %2718 = vmatprep.subr.mxu1 %v114_v7  ;;  %2639 = vmatpush3.msra.mxu0 %v130_v6  ;;  %v121_v24 = vld [vmem:[%s5067_s3 + $0x18] sm:$0xff]  ;;  %v120_v26 = vld [vmem:[%s5067_s3 + $0x10] sm:$0xff]  ;;  %v119_v28 = vld [vmem:[%s5067_s3 + $0x8] sm:$0xff] }
   0xa   :  { %2719 = vmatpush3.msra.mxu1 %v114_v7  ;;  %2640 = vmatprep.subr.mxu0 %v129_v8  ;;  %v105_v25 = vld [vmem:[%s5068_s2 + $0x18] sm:$0xff]  ;;  %v104_v27 = vld [vmem:[%s5068_s2 + $0x10] sm:$0xff]  ;;  %v103_v29 = vld [vmem:[%s5068_s2 + $0x8] sm:$0xff] }
   0xb   :  { %2720 = vmatprep.subr.mxu1 %v113_v9  ;;  %2641 = vmatpush3.msra.mxu0 %v129_v8  ;;  %v118_v30 = vld [vmem:[%s5067_s3] sm:$0xff]  ;;  %v3646_v34 = vld [vmem:[%s5069_s1 + $0x8] sm:$0xff]  ;;  %v846_v36 = vld [vmem:[%s5071_s5 + $0x78] sm:$0xff] }
   0xc   :  { %2721 = vmatpush3.msra.mxu1 %v113_v9  ;;  %2642 = vmatprep.subr.mxu0 %v128_v10  ;;  %v102_v31 = vld [vmem:[%s5068_s2] sm:$0xff]  ;;  %v3651_v35 = vld [vmem:[%s5070_s0 + $0x8] sm:$0xff]  ;;  %v830_v37 = vld [vmem:[%s5072_s4 + $0x78] sm:$0xff] }
   0xd   :  { %2722 = vmatprep.subr.mxu1 %v112_v11  ;;  %2643 = vmatpush3.msra.mxu0 %v128_v10  ;;  %v3636_v32 = vld [vmem:[%s5069_s1] sm:$0xff]  ;;  %v3666_v38 = vld [vmem:[%s5069_s1 + $0x10] sm:$0xff]  ;;  %v3676_v40 = vld [vmem:[%s5069_s1 + $0x18] sm:$0xff] }
   0xe   :  { %2723 = vmatpush3.msra.mxu1 %v112_v11  ;;  %2644 = vmatprep.subr.mxu0 %v127_v12  ;;  %v3641_v33 = vld [vmem:[%s5070_s0] sm:$0xff]  ;;  %v3671_v39 = vld [vmem:[%s5070_s0 + $0x10] sm:$0xff]  ;;  %v3681_v41 = vld [vmem:[%s5070_s0 + $0x18] sm:$0xff] }
   0xf   :  { %2724 = vmatprep.subr.mxu1 %v111_v13  ;;  %2645 = vmatpush3.msra.mxu0 %v127_v12  ;;  %v845_v42 = vld [vmem:[%s5071_s5 + $0x70] sm:$0xff]  ;;  %v3696_v44 = vld [vmem:[%s5069_s1 + $0x20] sm:$0xff]  ;;  %v3706_v46 = vld [vmem:[%s5069_s1 + $0x28] sm:$0xff] }
  0x10   :  { %2725 = vmatpush3.msra.mxu1 %v111_v13  ;;  %2646 = vmatprep.subr.mxu0 %v126_v14  ;;  %v829_v43 = vld [vmem:[%s5072_s4 + $0x70] sm:$0xff]  ;;  %v3701_v45 = vld [vmem:[%s5070_s0 + $0x20] sm:$0xff]  ;;  %v3711_v47 = vld [vmem:[%s5070_s0 + $0x28] sm:$0xff] }
  0x11   :  { %2726 = vmatprep.subr.mxu1 %v110_v15  ;;  %2647 = vmatpush3.msra.mxu0 %v126_v14  ;;  %v844_v48 = vld [vmem:[%s5071_s5 + $0x68] sm:$0xff]  ;;  %v3726_v50 = vld [vmem:[%s5069_s1 + $0x30] sm:$0xff]  ;;  %v3736_v52 = vld [vmem:[%s5069_s1 + $0x38] sm:$0xff] }
  0x12   :  { %2727 = vmatpush3.msra.mxu1 %v110_v15  ;;  %2648 = vmatprep.subr.mxu0 %v125_v16  ;;  %v828_v49 = vld [vmem:[%s5072_s4 + $0x68] sm:$0xff]  ;;  %v3731_v51 = vld [vmem:[%s5070_s0 + $0x30] sm:$0xff]  ;;  %v3741_v53 = vld [vmem:[%s5070_s0 + $0x38] sm:$0xff] }
  0x13   :  { %2728 = vmatprep.subr.mxu1 %v109_v17  ;;  %2649 = vmatpush3.msra.mxu0 %v125_v16  ;;  %v843_v54 = vld [vmem:[%s5071_s5 + $0x60] sm:$0xff]  ;;  %v3766_v58 = vld [vmem:[%s5069_s1 + $0x48] sm:$0xff]  ;;  %v842_v60 = vld [vmem:[%s5071_s5 + $0x58] sm:$0xff] }
  0x14   :  { %2729 = vmatpush3.msra.mxu1 %v109_v17  ;;  %2650 = vmatprep.subr.mxu0 %v124_v18  ;;  %v827_v55 = vld [vmem:[%s5072_s4 + $0x60] sm:$0xff]  ;;  %v3771_v59 = vld [vmem:[%s5070_s0 + $0x48] sm:$0xff]  ;;  %v826_v61 = vld [vmem:[%s5072_s4 + $0x58] sm:$0xff] }
  0x15   :  { %2730 = vmatprep.subr.mxu1 %v108_v19  ;;  %2651 = vmatpush3.msra.mxu0 %v124_v18  ;;  %v3756_v56 = vld [vmem:[%s5069_s1 + $0x40] sm:$0xff]  ;;  %v3786_v62 = vld [vmem:[%s5069_s1 + $0x50] sm:$0xff]  ;;  %v3796_v0 = vld [vmem:[%s5069_s1 + $0x58] sm:$0xff] }
  0x16   :  { %2731 = vmatpush3.msra.mxu1 %v108_v19  ;;  %2652 = vmatprep.subr.mxu0 %v123_v20  ;;  %v3761_v57 = vld [vmem:[%s5070_s0 + $0x40] sm:$0xff]  ;;  %v3791_v63 = vld [vmem:[%s5070_s0 + $0x50] sm:$0xff]  ;;  %v3801_v1 = vld [vmem:[%s5070_s0 + $0x58] sm:$0xff] }
  0x17   :  { %2732 = vmatprep.subr.mxu1 %v107_v21  ;;  %2653 = vmatpush3.msra.mxu0 %v123_v20  ;;  %v841_v2 = vld [vmem:[%s5071_s5 + $0x50] sm:$0xff]  ;;  %v3816_v4 = vld [vmem:[%s5069_s1 + $0x60] sm:$0xff]  ;;  %v3826_v6 = vld [vmem:[%s5069_s1 + $0x68] sm:$0xff] }
  0x18   :  { %2733 = vmatpush3.msra.mxu1 %v107_v21  ;;  %2654 = vmatprep.subr.mxu0 %v122_v22  ;;  %v825_v3 = vld [vmem:[%s5072_s4 + $0x50] sm:$0xff]  ;;  %v3821_v5 = vld [vmem:[%s5070_s0 + $0x60] sm:$0xff]  ;;  %v3831_v7 = vld [vmem:[%s5070_s0 + $0x68] sm:$0xff] }
  0x19   :  { %2734 = vmatprep.subr.mxu1 %v106_v23  ;;  %2655 = vmatpush3.msra.mxu0 %v122_v22  ;;  %v840_v8 = vld [vmem:[%s5071_s5 + $0x48] sm:$0xff]  ;;  %v3846_v10 = vld [vmem:[%s5069_s1 + $0x70] sm:$0xff]  ;;  %v3856_v12 = vld [vmem:[%s5069_s1 + $0x78] sm:$0xff] }
  0x1a   :  { %2735 = vmatpush3.msra.mxu1 %v106_v23  ;;  %2656 = vmatprep.subr.mxu0 %v121_v24  ;;  %v824_v9 = vld [vmem:[%s5072_s4 + $0x48] sm:$0xff]  ;;  %v3851_v11 = vld [vmem:[%s5070_s0 + $0x70] sm:$0xff]  ;;  %v3861_v13 = vld [vmem:[%s5070_s0 + $0x78] sm:$0xff] }
  0x1b   :  { %2736 = vmatprep.subr.mxu1 %v105_v25  ;;  %2657 = vmatpush3.msra.mxu0 %v121_v24  ;;  %v839_v14 = vld [vmem:[%s5071_s5 + $0x40] sm:$0xff]  ;;  %v3886_v18 = vld [vmem:[%s5069_s1 + $0x88] sm:$0xff]  ;;  %v838_v20 = vld [vmem:[%s5071_s5 + $0x38] sm:$0xff] }
  0x1c   :  { %2737 = vmatpush3.msra.mxu1 %v105_v25  ;;  %2658 = vmatprep.subr.mxu0 %v120_v26  ;;  %v823_v15 = vld [vmem:[%s5072_s4 + $0x40] sm:$0xff]  ;;  %v3891_v19 = vld [vmem:[%s5070_s0 + $0x88] sm:$0xff]  ;;  %v822_v21 = vld [vmem:[%s5072_s4 + $0x38] sm:$0xff] }
  0x1d   :  { %2738 = vmatprep.subr.mxu1 %v104_v27  ;;  %2659 = vmatpush3.msra.mxu0 %v120_v26  ;;  %v3876_v16 = vld [vmem:[%s5069_s1 + $0x80] sm:$0xff]  ;;  %v3906_v22 = vld [vmem:[%s5069_s1 + $0x90] sm:$0xff]  ;;  %v3916_v24 = vld [vmem:[%s5069_s1 + $0x98] sm:$0xff] }
  0x1e   :  { %2739 = vmatpush3.msra.mxu1 %v104_v27  ;;  %2660 = vmatprep.subr.mxu0 %v119_v28  ;;  %v3881_v17 = vld [vmem:[%s5070_s0 + $0x80] sm:$0xff]  ;;  %v3911_v23 = vld [vmem:[%s5070_s0 + $0x90] sm:$0xff]  ;;  %v3921_v25 = vld [vmem:[%s5070_s0 + $0x98] sm:$0xff] }
  0x1f   :  { %2740 = vmatprep.subr.mxu1 %v103_v29  ;;  %2661 = vmatpush3.msra.mxu0 %v119_v28  ;;  %v837_v26 = vld [vmem:[%s5071_s5 + $0x30] sm:$0xff]  ;;  %v3936_v28 = vld [vmem:[%s5069_s1 + $0xa0] sm:$0xff] }
  0x20   :  { %2741 = vmatpush3.msra.mxu1 %v103_v29  ;;  %2662 = vmatprep.subr.mxu0 %v118_v30  ;;  %v821_v27 = vld [vmem:[%s5072_s4 + $0x30] sm:$0xff]  ;;  %v3941_v29 = vld [vmem:[%s5070_s0 + $0xa0] sm:$0xff] }
  0x21   :  { %2742 = vmatprep.subr.mxu1 %v102_v31  ;;  %2663 = vmatpush3.msra.mxu0 %v118_v30  ;;  %v3946_v30 = vld [vmem:[%s5069_s1 + $0xa8] sm:$0xff] }
  0x22   :  { %2664 = vmatprep.mubr.f32.mxu0 %v3636_v32  ;;  %2743 = vmatpush3.msra.mxu1 %v102_v31  ;;  %v3951_v31 = vld [vmem:[%s5070_s0 + $0xa8] sm:$0xff] }
  0x23   :  { %2744 = vmatprep.mubr.f32.mxu1 %v3641_v33  ;;  %2665 = vmatmul.mubr.f32.vlgmr.msra.gmra.mxu0 %v3646_v34 }
  0x24   :  { %2745 = vmatmul.mubr.f32.vlgmr.msra.gmra.mxu1 %v3651_v35  ;;  %2792 = vmatprep.subr.mxu0 %v846_v36 }
  0x25   :  { %2872 = vmatprep.subr.mxu1 %v830_v37  ;;  %2793 = vmatpush3.msra.mxu0 %v846_v36  ;;  %v836_v36 = vld [vmem:[%s5071_s5 + $0x28] sm:$0xff] }
  0x26   :  { %2873 = vmatpush3.msra.mxu1 %v830_v37  ;;  %2667 = vmatprep.mubr.f32.mxu0 %v3666_v38  ;;  %v820_v37 = vld [vmem:[%s5072_s4 + $0x28] sm:$0xff] }
  0x27   :  { %2747 = vmatprep.mubr.f32.mxu1 %v3671_v39  ;;  %2668 = vmatmul.mubr.f32.gmra.mxu0 %v3676_v40 }
  0x28   :  { %2748 = vmatmul.mubr.f32.gmra.mxu1 %v3681_v41  ;;  %2794 = vmatprep.subr.mxu0 %v845_v42 }
  0x29   :  { %2874 = vmatprep.subr.mxu1 %v829_v43  ;;  %2795 = vmatpush3.msra.mxu0 %v845_v42  ;;  %v3966_v42 = vld [vmem:[%s5069_s1 + $0xb0] sm:$0xff] }
  0x2a   :  { %2875 = vmatpush3.msra.mxu1 %v829_v43  ;;  %2670 = vmatprep.mubr.f32.mxu0 %v3696_v44  ;;  %v3971_v43 = vld [vmem:[%s5070_s0 + $0xb0] sm:$0xff] }
  0x2b   :  { %2750 = vmatprep.mubr.f32.mxu1 %v3701_v45  ;;  %2671 = vmatmul.mubr.f32.gmra.mxu0 %v3706_v46 }
  0x2c   :  { %2751 = vmatmul.mubr.f32.gmra.mxu1 %v3711_v47  ;;  %2796 = vmatprep.subr.mxu0 %v844_v48 }
  0x2d   :  { %2876 = vmatprep.subr.mxu1 %v828_v49  ;;  %2797 = vmatpush3.msra.mxu0 %v844_v48  ;;  %v3976_v48 = vld [vmem:[%s5069_s1 + $0xb8] sm:$0xff] }
  0x2e   :  { %2877 = vmatpush3.msra.mxu1 %v828_v49  ;;  %2673 = vmatprep.mubr.f32.mxu0 %v3726_v50  ;;  %v3981_v49 = vld [vmem:[%s5070_s0 + $0xb8] sm:$0xff] }
  0x2f   :  { %2753 = vmatprep.mubr.f32.mxu1 %v3731_v51  ;;  %2674 = vmatmul.mubr.f32.gmra.mxu0 %v3736_v52 }
  0x30   :  { %2754 = vmatmul.mubr.f32.gmra.mxu1 %v3741_v53  ;;  %2798 = vmatprep.subr.mxu0 %v843_v54 }
  0x31   :  { %2878 = vmatprep.subr.mxu1 %v827_v55  ;;  %2799 = vmatpush3.msra.mxu0 %v843_v54  ;;  %v835_v54 = vld [vmem:[%s5071_s5 + $0x20] sm:$0xff] }
  0x32   :  { %2879 = vmatpush3.msra.mxu1 %v827_v55  ;;  %2676 = vmatprep.mubr.f32.mxu0 %v3756_v56  ;;  %v819_v55 = vld [vmem:[%s5072_s4 + $0x20] sm:$0xff] }
  0x33   :  { %2756 = vmatprep.mubr.f32.mxu1 %v3761_v57  ;;  %2677 = vmatmul.mubr.f32.gmra.mxu0 %v3766_v58 }
  0x34   :  { %2757 = vmatmul.mubr.f32.gmra.mxu1 %v3771_v59  ;;  %2800 = vmatprep.subr.mxu0 %v842_v60 }
  0x35   :  { %2880 = vmatprep.subr.mxu1 %v826_v61  ;;  %2801 = vmatpush3.msra.mxu0 %v842_v60  ;;  %v3996_v60 = vld [vmem:[%s5069_s1 + $0xc0] sm:$0xff] }
  0x36   :  { %2881 = vmatpush3.msra.mxu1 %v826_v61  ;;  %2679 = vmatprep.mubr.f32.mxu0 %v3786_v62  ;;  %v4001_v61 = vld [vmem:[%s5070_s0 + $0xc0] sm:$0xff] }
  0x37   :  { %2759 = vmatprep.mubr.f32.mxu1 %v3791_v63  ;;  %2680 = vmatmul.mubr.f32.gmra.mxu0 %v3796_v0 }
  0x38   :  { %2760 = vmatmul.mubr.f32.gmra.mxu1 %v3801_v1  ;;  %2802 = vmatprep.subr.mxu0 %v841_v2 }
  0x39   :  { %2882 = vmatprep.subr.mxu1 %v825_v3  ;;  %2803 = vmatpush3.msra.mxu0 %v841_v2  ;;  %v4006_v2 = vld [vmem:[%s5069_s1 + $0xc8] sm:$0xff] }
  0x3a   :  { %2883 = vmatpush3.msra.mxu1 %v825_v3  ;;  %2682 = vmatprep.mubr.f32.mxu0 %v3816_v4  ;;  %v4011_v3 = vld [vmem:[%s5070_s0 + $0xc8] sm:$0xff] }
  0x3b   :  { %2762 = vmatprep.mubr.f32.mxu1 %v3821_v5  ;;  %2683 = vmatmul.mubr.f32.gmra.mxu0 %v3826_v6 }
  0x3c   :  { %2763 = vmatmul.mubr.f32.gmra.mxu1 %v3831_v7  ;;  %2804 = vmatprep.subr.mxu0 %v840_v8 }
  0x3d   :  { %2884 = vmatprep.subr.mxu1 %v824_v9  ;;  %2805 = vmatpush3.msra.mxu0 %v840_v8  ;;  %v834_v8 = vld [vmem:[%s5071_s5 + $0x18] sm:$0xff] }
  0x3e   :  { %2885 = vmatpush3.msra.mxu1 %v824_v9  ;;  %2685 = vmatprep.mubr.f32.mxu0 %v3846_v10  ;;  %v818_v9 = vld [vmem:[%s5072_s4 + $0x18] sm:$0xff] }
  0x3f   :  { %2765 = vmatprep.mubr.f32.mxu1 %v3851_v11  ;;  %2686 = vmatmul.mubr.f32.gmra.mxu0 %v3856_v12 }
  0x40   :  { %2766 = vmatmul.mubr.f32.gmra.mxu1 %v3861_v13  ;;  %2806 = vmatprep.subr.mxu0 %v839_v14 }
  0x41   :  { %2886 = vmatprep.subr.mxu1 %v823_v15  ;;  %2807 = vmatpush3.msra.mxu0 %v839_v14  ;;  %v4026_v14 = vld [vmem:[%s5069_s1 + $0xd0] sm:$0xff] }
  0x42   :  { %2887 = vmatpush3.msra.mxu1 %v823_v15  ;;  %2688 = vmatprep.mubr.f32.mxu0 %v3876_v16  ;;  %v4031_v15 = vld [vmem:[%s5070_s0 + $0xd0] sm:$0xff] }
  0x43   :  { %2768 = vmatprep.mubr.f32.mxu1 %v3881_v17  ;;  %2689 = vmatmul.mubr.f32.gmra.mxu0 %v3886_v18 }
  0x44   :  { %2769 = vmatmul.mubr.f32.gmra.mxu1 %v3891_v19  ;;  %2808 = vmatprep.subr.mxu0 %v838_v20 }
  0x45   :  { %2888 = vmatprep.subr.mxu1 %v822_v21  ;;  %2809 = vmatpush3.msra.mxu0 %v838_v20  ;;  %v4036_v20 = vld [vmem:[%s5069_s1 + $0xd8] sm:$0xff] }
  0x46   :  { %2889 = vmatpush3.msra.mxu1 %v822_v21  ;;  %2691 = vmatprep.mubr.f32.mxu0 %v3906_v22  ;;  %v4041_v21 = vld [vmem:[%s5070_s0 + $0xd8] sm:$0xff] }
  0x47   :  { %2771 = vmatprep.mubr.f32.mxu1 %v3911_v23  ;;  %2692 = vmatmul.mubr.f32.gmra.mxu0 %v3916_v24 }
  0x48   :  { %2772 = vmatmul.mubr.f32.gmra.mxu1 %v3921_v25  ;;  %2810 = vmatprep.subr.mxu0 %v837_v26 }
  0x49   :  { %2890 = vmatprep.subr.mxu1 %v821_v27  ;;  %2811 = vmatpush3.msra.mxu0 %v837_v26  ;;  %v833_v26 = vld [vmem:[%s5071_s5 + $0x10] sm:$0xff] }
  0x4a   :  { %2891 = vmatpush3.msra.mxu1 %v821_v27  ;;  %2694 = vmatprep.mubr.f32.mxu0 %v3936_v28  ;;  %v817_v27 = vld [vmem:[%s5072_s4 + $0x10] sm:$0xff] }
  0x4b   :  { %2774 = vmatprep.mubr.f32.mxu1 %v3941_v29  ;;  %2695 = vmatmul.mubr.f32.gmra.mxu0 %v3946_v30 }
  0x4c   :  { %2775 = vmatmul.mubr.f32.gmra.mxu1 %v3951_v31  ;;  %2812 = vmatprep.subr.mxu0 %v836_v36 }
  0x4d   :  { %2892 = vmatprep.subr.mxu1 %v820_v37  ;;  %2813 = vmatpush3.msra.mxu0 %v836_v36  ;;  %v4056_v36 = vld [vmem:[%s5069_s1 + $0xe0] sm:$0xff] }
  0x4e   :  { %2893 = vmatpush3.msra.mxu1 %v820_v37  ;;  %2697 = vmatprep.mubr.f32.mxu0 %v3966_v42  ;;  %5093 = vst [vmem:[#allocation2_spill] sm:$0xff] %v4056_v36  ;;  %v4061_v37 = vld [vmem:[%s5070_s0 + $0xe0] sm:$0xff] }
  0x4f   :  { %2777 = vmatprep.mubr.f32.mxu1 %v3971_v43  ;;  %2698 = vmatmul.mubr.f32.gmra.mxu0 %v3976_v48  ;;  %5094 = vst [vmem:[#allocation3_spill] sm:$0xff] %v4061_v37 }
  0x50   :  { %2778 = vmatmul.mubr.f32.gmra.mxu1 %v3981_v49  ;;  %2814 = vmatprep.subr.mxu0 %v835_v54 }
  0x51   :  { %2894 = vmatprep.subr.mxu1 %v819_v55  ;;  %2815 = vmatpush3.msra.mxu0 %v835_v54  ;;  %v4066_v54 = vld [vmem:[%s5069_s1 + $0xe8] sm:$0xff] }
  0x52   :  { %2895 = vmatpush3.msra.mxu1 %v819_v55  ;;  %2700 = vmatprep.mubr.f32.mxu0 %v3996_v60  ;;  %5095 = vst [vmem:[#allocation4_spill] sm:$0xff] %v4066_v54  ;;  %v4071_v55 = vld [vmem:[%s5070_s0 + $0xe8] sm:$0xff] }
  0x53   :  { %2780 = vmatprep.mubr.f32.mxu1 %v4001_v61  ;;  %2701 = vmatmul.mubr.f32.gmra.mxu0 %v4006_v2  ;;  %5096 = vst [vmem:[#allocation5_spill] sm:$0xff] %v4071_v55 }
  0x54   :  { %2781 = vmatmul.mubr.f32.gmra.mxu1 %v4011_v3  ;;  %2816 = vmatprep.subr.mxu0 %v834_v8 }
  0x55   :  { %2896 = vmatprep.subr.mxu1 %v818_v9  ;;  %2817 = vmatpush3.msra.mxu0 %v834_v8  ;;  %v832_v8 = vld [vmem:[%s5071_s5 + $0x8] sm:$0xff] }
  0x56   :  { %2897 = vmatpush3.msra.mxu1 %v818_v9  ;;  %2703 = vmatprep.mubr.f32.mxu0 %v4026_v14  ;;  %v816_v9 = vld [vmem:[%s5072_s4 + $0x8] sm:$0xff] }
  0x57   :  { %2783 = vmatprep.mubr.f32.mxu1 %v4031_v15  ;;  %2704 = vmatmul.mubr.f32.gmra.mxu0 %v4036_v20 }
  0x58   :  { %2784 = vmatmul.mubr.f32.gmra.mxu1 %v4041_v21  ;;  %2818 = vmatprep.subr.mxu0 %v833_v26 }
  0x59   :  { %2898 = vmatprep.subr.mxu1 %v817_v27  ;;  %2819 = vmatpush3.msra.mxu0 %v833_v26  ;;  %v4086_v26 = vld [vmem:[%s5069_s1 + $0xf0] sm:$0xff] }
  0x5a   :  { %2899 = vmatpush3.msra.mxu1 %v817_v27  ;;  %2706 = vmatprep.mubr.f32.mxu0 %v4056_v36  ;;  %v4091_v27 = vld [vmem:[%s5070_s0 + $0xf0] sm:$0xff]  ;;  %v815_v36 = vld [vmem:[%s5072_s4] sm:$0xff] }
  0x5b   :  { %2786 = vmatprep.mubr.f32.mxu1 %v4061_v37  ;;  %2707 = vmatmul.mubr.f32.gmra.mxu0 %v4066_v54  ;;  %v4096_v37 = vld [vmem:[%s5069_s1 + $0xf8] sm:$0xff]  ;;  %v831_v54 = vld [vmem:[%s5071_s5] sm:$0xff] }
  0x5c   :  { %2787 = vmatmul.mubr.f32.gmra.mxu1 %v4071_v55  ;;  %2820 = vmatprep.subr.mxu0 %v832_v8  ;;  %v4101_v55 = vld [vmem:[%s5070_s0 + $0xf8] sm:$0xff] }
  0x5d   :  { %2900 = vmatprep.subr.mxu1 %v816_v9  ;;  %2821 = vmatpush3.msra.mxu0 %v832_v8  ;;  %v1529_v8 = vld [vmem:[%s5073_s6 + $0x8] sm:$0xff] }
  0x5e   :  { %2901 = vmatpush3.msra.mxu1 %v816_v9  ;;  %2709 = vmatprep.mubr.f32.mxu0 %v4086_v26  ;;  %v1577_v9 = vld [vmem:[%s5074_s7 + $0x8] sm:$0xff] }
  0x5f   :  { %2789 = vmatprep.mubr.f32.mxu1 %v4091_v27  ;;  %2710 = vmatmul.mubr.f32.gmra.mxu0 %v4096_v37 }
  0x60   :  { %2790 = vmatmul.mubr.f32.gmra.mxu1 %v4101_v55  ;;  %2822 = vmatprep.subr.mxu0 %v831_v54 }
  0x61   :  { %2902 = vmatprep.subr.mxu1 %v815_v36  ;;  %2823 = vmatpush3.msra.mxu0 %v831_v54  ;;  %v1578_v54 = vld [vmem:[%s5074_s7 + $0x10] sm:$0xff] }
  0x62   :  { %2903 = vmatpush3.msra.mxu1 %v815_v36  ;;  %2824 = vmatprep.mubr.f32.mxu0 %v3636_v32  ;;  %v5097_v32 = vld [vmem:[#allocation2_spill] sm:$0xff]  ;;  %v1579_v36 = vld [vmem:[%s5074_s7 + $0x18] sm:$0xff] }
  0x63   :  { %2904 = vmatprep.mubr.f32.mxu1 %v3641_v33  ;;  %2825 = vmatmul.mubr.f32.vlgmr.msra.gmra.mxu0 %v3646_v34  ;;  %v5098_v34 = vld [vmem:[#allocation3_spill] sm:$0xff] }
  0x64   :  { %2905 = vmatmul.mubr.f32.vlgmr.msra.gmra.mxu1 %v3651_v35  ;;  %2827 = vmatprep.mubr.f32.mxu0 %v3666_v38  ;;  %v5099_v38 = vld [vmem:[#allocation4_spill] sm:$0xff] }
  0x65   :  { %2907 = vmatprep.mubr.f32.mxu1 %v3671_v39 }
  0x67   :  { %2828 = vmatmul.mubr.f32.gmra.mxu0 %v3676_v40  ;;  %v5100_v40 = vld [vmem:[#allocation5_spill] sm:$0xff] }
  0x68   :  { %2908 = vmatmul.mubr.f32.gmra.mxu1 %v3681_v41  ;;  %2830 = vmatprep.mubr.f32.mxu0 %v3696_v44  ;;  %v1543_v44 = vld [vmem:[%s5073_s6 + $0x78] sm:$0xff] }
  0x69   :  { %2910 = vmatprep.mubr.f32.mxu1 %v3701_v45  ;;  %3032 = vmatprep.subr.mxu1 %v1543_v44 }
  0x6a   :  { %3033 = vmatpush3.msra.mxu1 %v1543_v44 }
  0x6b   :  { %2831 = vmatmul.mubr.f32.gmra.mxu0 %v3706_v46  ;;  %v1591_v46 = vld [vmem:[%s5074_s7 + $0x78] sm:$0xff] }
  0x6c   :  { %2911 = vmatmul.mubr.f32.gmra.mxu1 %v3711_v47  ;;  %2833 = vmatprep.mubr.f32.mxu0 %v3726_v50  ;;  %v1542_v50 = vld [vmem:[%s5073_s6 + $0x70] sm:$0xff] }
  0x6d   :  { %2913 = vmatprep.mubr.f32.mxu1 %v3731_v51  ;;  %2952 = vmatprep.subr.mxu0 %v1591_v46 }
  0x6e   :  { %3034 = vmatprep.subr.mxu1 %v1542_v50  ;;  %2953 = vmatpush3.msra.mxu0 %v1591_v46 }
  0x6f   :  { %2834 = vmatmul.mubr.f32.gmra.mxu0 %v3736_v52  ;;  %3035 = vmatpush3.msra.mxu1 %v1542_v50  ;;  %v1541_v52 = vld [vmem:[%s5073_s6 + $0x68] sm:$0xff] }
  0x70   :  { %2914 = vmatmul.mubr.f32.gmra.mxu1 %v3741_v53  ;;  %2836 = vmatprep.mubr.f32.mxu0 %v3756_v56  ;;  %v1589_v56 = vld [vmem:[%s5074_s7 + $0x68] sm:$0xff] }
  0x71   :  { %2916 = vmatprep.mubr.f32.mxu1 %v3761_v57  ;;  %3036 = vmatprep.subr.mxu1 %v1541_v52 }
  0x72   :  { %3037 = vmatpush3.msra.mxu1 %v1541_v52 }
  0x73   :  { %2837 = vmatmul.mubr.f32.gmra.mxu0 %v3766_v58  ;;  %v1540_v58 = vld [vmem:[%s5073_s6 + $0x60] sm:$0xff] }
  0x74   :  { %2917 = vmatmul.mubr.f32.gmra.mxu1 %v3771_v59  ;;  %2839 = vmatprep.mubr.f32.mxu0 %v3786_v62  ;;  %v1588_v62 = vld [vmem:[%s5074_s7 + $0x60] sm:$0xff] }
  0x75   :  { %2919 = vmatprep.mubr.f32.mxu1 %v3791_v63  ;;  %3038 = vmatprep.subr.mxu1 %v1540_v58 }
  0x76   :  { %3039 = vmatpush3.msra.mxu1 %v1540_v58 }
  0x77   :  { %2840 = vmatmul.mubr.f32.gmra.mxu0 %v3796_v0  ;;  %v1539_v0 = vld [vmem:[%s5073_s6 + $0x58] sm:$0xff] }
  0x78   :  { %2920 = vmatmul.mubr.f32.gmra.mxu1 %v3801_v1  ;;  %2842 = vmatprep.mubr.f32.mxu0 %v3816_v4  ;;  %v1587_v4 = vld [vmem:[%s5074_s7 + $0x58] sm:$0xff] }
  0x79   :  { %2922 = vmatprep.mubr.f32.mxu1 %v3821_v5  ;;  %3040 = vmatprep.subr.mxu1 %v1539_v0 }
  0x7a   :  { %3041 = vmatpush3.msra.mxu1 %v1539_v0 }
  0x7b   :  { %2843 = vmatmul.mubr.f32.gmra.mxu0 %v3826_v6  ;;  %v1538_v6 = vld [vmem:[%s5073_s6 + $0x50] sm:$0xff] }
  0x7c   :  { %2923 = vmatmul.mubr.f32.gmra.mxu1 %v3831_v7  ;;  %2845 = vmatprep.mubr.f32.mxu0 %v3846_v10  ;;  %v1586_v10 = vld [vmem:[%s5074_s7 + $0x50] sm:$0xff] }
  0x7d   :  { %2925 = vmatprep.mubr.f32.mxu1 %v3851_v11  ;;  %3042 = vmatprep.subr.mxu1 %v1538_v6 }
  0x7e   :  { %3043 = vmatpush3.msra.mxu1 %v1538_v6 }
  0x7f   :  { %2846 = vmatmul.mubr.f32.gmra.mxu0 %v3856_v12  ;;  %v1537_v12 = vld [vmem:[%s5073_s6 + $0x48] sm:$0xff] }
  0x80   :  { %2926 = vmatmul.mubr.f32.gmra.mxu1 %v3861_v13  ;;  %2848 = vmatprep.mubr.f32.mxu0 %v3876_v16  ;;  %v1585_v16 = vld [vmem:[%s5074_s7 + $0x48] sm:$0xff] }
  0x81   :  { %2928 = vmatprep.mubr.f32.mxu1 %v3881_v17  ;;  %3044 = vmatprep.subr.mxu1 %v1537_v12 }
  0x82   :  { %3045 = vmatpush3.msra.mxu1 %v1537_v12 }
  0x83   :  { %2849 = vmatmul.mubr.f32.gmra.mxu0 %v3886_v18  ;;  %v1536_v18 = vld [vmem:[%s5073_s6 + $0x40] sm:$0xff] }
  0x84   :  { %2929 = vmatmul.mubr.f32.gmra.mxu1 %v3891_v19  ;;  %2851 = vmatprep.mubr.f32.mxu0 %v3906_v22  ;;  %v1584_v22 = vld [vmem:[%s5074_s7 + $0x40] sm:$0xff] }
  0x85   :  { %2931 = vmatprep.mubr.f32.mxu1 %v3911_v23  ;;  %3046 = vmatprep.subr.mxu1 %v1536_v18 }
  0x86   :  { %3047 = vmatpush3.msra.mxu1 %v1536_v18 }
  0x87   :  { %2852 = vmatmul.mubr.f32.gmra.mxu0 %v3916_v24  ;;  %v1535_v24 = vld [vmem:[%s5073_s6 + $0x38] sm:$0xff] }
  0x88   :  { %2932 = vmatmul.mubr.f32.gmra.mxu1 %v3921_v25  ;;  %2854 = vmatprep.mubr.f32.mxu0 %v3936_v28  ;;  %v1583_v28 = vld [vmem:[%s5074_s7 + $0x38] sm:$0xff] }
  0x89   :  { %2934 = vmatprep.mubr.f32.mxu1 %v3941_v29  ;;  %3048 = vmatprep.subr.mxu1 %v1535_v24 }
  0x8a   :  { %3049 = vmatpush3.msra.mxu1 %v1535_v24 }
  0x8b   :  { %2855 = vmatmul.mubr.f32.gmra.mxu0 %v3946_v30  ;;  %v1534_v30 = vld [vmem:[%s5073_s6 + $0x30] sm:$0xff] }
  0x8c   :  { %2935 = vmatmul.mubr.f32.gmra.mxu1 %v3951_v31  ;;  %2857 = vmatprep.mubr.f32.mxu0 %v3966_v42  ;;  %v1582_v42 = vld [vmem:[%s5074_s7 + $0x30] sm:$0xff] }
  0x8d   :  { %2937 = vmatprep.mubr.f32.mxu1 %v3971_v43  ;;  %3050 = vmatprep.subr.mxu1 %v1534_v30 }
  0x8e   :  { %3051 = vmatpush3.msra.mxu1 %v1534_v30 }
  0x8f   :  { %2858 = vmatmul.mubr.f32.gmra.mxu0 %v3976_v48  ;;  %v1533_v48 = vld [vmem:[%s5073_s6 + $0x28] sm:$0xff] }
  0x90   :  { %2938 = vmatmul.mubr.f32.gmra.mxu1 %v3981_v49  ;;  %2860 = vmatprep.mubr.f32.mxu0 %v3996_v60  ;;  %v1581_v60 = vld [vmem:[%s5074_s7 + $0x28] sm:$0xff] }
  0x91   :  { %2940 = vmatprep.mubr.f32.mxu1 %v4001_v61  ;;  %3052 = vmatprep.subr.mxu1 %v1533_v48 }
  0x92   :  { %3053 = vmatpush3.msra.mxu1 %v1533_v48 }
  0x93   :  { %2861 = vmatmul.mubr.f32.gmra.mxu0 %v4006_v2  ;;  %v1532_v2 = vld [vmem:[%s5073_s6 + $0x20] sm:$0xff] }
  0x94   :  { %2941 = vmatmul.mubr.f32.gmra.mxu1 %v4011_v3  ;;  %2863 = vmatprep.mubr.f32.mxu0 %v4026_v14  ;;  %v1580_v14 = vld [vmem:[%s5074_s7 + $0x20] sm:$0xff] }
  0x95   :  { %2943 = vmatprep.mubr.f32.mxu1 %v4031_v15  ;;  %3054 = vmatprep.subr.mxu1 %v1532_v2 }
  0x96   :  { %3055 = vmatpush3.msra.mxu1 %v1532_v2 }
  0x97   :  { %2864 = vmatmul.mubr.f32.gmra.mxu0 %v4036_v20  ;;  %v1531_v20 = vld [vmem:[%s5073_s6 + $0x18] sm:$0xff] }
  0x98   :  { %2944 = vmatmul.mubr.f32.gmra.mxu1 %v4041_v21  ;;  %2866 = vmatprep.mubr.f32.mxu0 %v5097_v32  ;;  %v1576_v32 = vld [vmem:[%s5074_s7] sm:$0xff] }
  0x99   :  { %2946 = vmatprep.mubr.f32.mxu1 %v5098_v34  ;;  %3056 = vmatprep.subr.mxu1 %v1531_v20 }
  0x9a   :  { %3057 = vmatpush3.msra.mxu1 %v1531_v20 }
  0x9b   :  { %2867 = vmatmul.mubr.f32.gmra.mxu0 %v5099_v38 }
  0x9c   :  { %2947 = vmatmul.mubr.f32.gmra.mxu1 %v5100_v40  ;;  %2869 = vmatprep.mubr.f32.mxu0 %v4086_v26  ;;  %v1528_v26 = vld [vmem:[%s5073_s6] sm:$0xff] }
  0x9d   :  { %2949 = vmatprep.mubr.f32.mxu1 %v4091_v27 }
  0x9f   :  { %2870 = vmatmul.mubr.f32.gmra.mxu0 %v4096_v37  ;;  %v1530_v37 = vld [vmem:[%s5073_s6 + $0x10] sm:$0xff] }
  0xa0   :  { %2950 = vmatmul.mubr.f32.gmra.mxu1 %v4101_v55  ;;  %3058 = vmatprep.subr.mxu1 %v1530_v37 }
  0xa1   :  { %3064 = vmatprep.mubr.f32.mxu1 %v3641_v33  ;;  %v1590_v33 = vld [vmem:[%s5074_s7 + $0x70] sm:$0xff]  ;;  %3059 = vmatpush3.msra.mxu1 %v1530_v37 }
  0xa2   :  { %2954 = vmatprep.subr.mxu0 %v1590_v33  ;;  %3060 = vmatprep.subr.mxu1 %v1529_v8 }
  0xa3   :  { %2955 = vmatpush3.msra.mxu0 %v1590_v33  ;;  %3061 = vmatpush3.msra.mxu1 %v1529_v8 }
  0xa4   :  { %2956 = vmatprep.subr.mxu0 %v1589_v56  ;;  %3062 = vmatprep.subr.mxu1 %v1528_v26 }
  0xa5   :  { %2957 = vmatpush3.msra.mxu0 %v1589_v56  ;;  %3063 = vmatpush3.msra.mxu1 %v1528_v26 }
  0xa6   :  { %2958 = vmatprep.subr.mxu0 %v1588_v62  ;;  %3065 = vmatmul.mubr.f32.vlgmr.msra.gmra.mxu1 %v3651_v35 }
  0xa7   :  { %2959 = vmatpush3.msra.mxu0 %v1588_v62  ;;  %3067 = vmatprep.mubr.f32.mxu1 %v3671_v39 }
  0xa8   :  { %2960 = vmatprep.subr.mxu0 %v1587_v4 }
  0xa9   :  { %2961 = vmatpush3.msra.mxu0 %v1587_v4 }
  0xaa   :  { %2962 = vmatprep.subr.mxu0 %v1586_v10  ;;  %3068 = vmatmul.mubr.f32.gmra.mxu1 %v3681_v41 }
  0xab   :  { %2963 = vmatpush3.msra.mxu0 %v1586_v10  ;;  %3070 = vmatprep.mubr.f32.mxu1 %v3701_v45 }
  0xac   :  { %2964 = vmatprep.subr.mxu0 %v1585_v16 }
  0xad   :  { %2965 = vmatpush3.msra.mxu0 %v1585_v16 }
  0xae   :  { %2966 = vmatprep.subr.mxu0 %v1584_v22  ;;  %3071 = vmatmul.mubr.f32.gmra.mxu1 %v3711_v47 }
  0xaf   :  { %2967 = vmatpush3.msra.mxu0 %v1584_v22  ;;  %3073 = vmatprep.mubr.f32.mxu1 %v3731_v51 }
  0xb0   :  { %2968 = vmatprep.subr.mxu0 %v1583_v28 }
  0xb1   :  { %2969 = vmatpush3.msra.mxu0 %v1583_v28 }
  0xb2   :  { %2970 = vmatprep.subr.mxu0 %v1582_v42  ;;  %3074 = vmatmul.mubr.f32.gmra.mxu1 %v3741_v53 }
  0xb3   :  { %2971 = vmatpush3.msra.mxu0 %v1582_v42  ;;  %3076 = vmatprep.mubr.f32.mxu1 %v3761_v57 }
  0xb4   :  { %2972 = vmatprep.subr.mxu0 %v1581_v60 }
  0xb5   :  { %2973 = vmatpush3.msra.mxu0 %v1581_v60 }
  0xb6   :  { %2974 = vmatprep.subr.mxu0 %v1580_v14  ;;  %3077 = vmatmul.mubr.f32.gmra.mxu1 %v3771_v59 }
  0xb7   :  { %2975 = vmatpush3.msra.mxu0 %v1580_v14  ;;  %3079 = vmatprep.mubr.f32.mxu1 %v3791_v63 }
  0xb8   :  { %2976 = vmatprep.subr.mxu0 %v1579_v36 }
  0xb9   :  { %2977 = vmatpush3.msra.mxu0 %v1579_v36 }
  0xba   :  { %2978 = vmatprep.subr.mxu0 %v1578_v54  ;;  %3080 = vmatmul.mubr.f32.gmra.mxu1 %v3801_v1 }
  0xbb   :  { %2979 = vmatpush3.msra.mxu0 %v1578_v54  ;;  %3082 = vmatprep.mubr.f32.mxu1 %v3821_v5 }
  0xbc   :  { %2980 = vmatprep.subr.mxu0 %v1577_v9 }
  0xbd   :  { %2981 = vmatpush3.msra.mxu0 %v1577_v9 }
  0xbe   :  { %2982 = vmatprep.subr.mxu0 %v1576_v32  ;;  %3083 = vmatmul.mubr.f32.gmra.mxu1 %v3831_v7 }
  0xbf   :  { %2983 = vmatpush3.msra.mxu0 %v1576_v32  ;;  %3085 = vmatprep.mubr.f32.mxu1 %v3851_v11 }
  0xc2   :  { %3086 = vmatmul.mubr.f32.gmra.mxu1 %v3861_v13 }
  0xc3   :  { %3088 = vmatprep.mubr.f32.mxu1 %v3881_v17 }
  0xc6   :  { %3089 = vmatmul.mubr.f32.gmra.mxu1 %v3891_v19 }
  0xc7   :  { %3091 = vmatprep.mubr.f32.mxu1 %v3911_v23 }
  0xca   :  { %3092 = vmatmul.mubr.f32.gmra.mxu1 %v3921_v25 }
  0xcb   :  { %3094 = vmatprep.mubr.f32.mxu1 %v3941_v29 }
  0xce   :  { %3095 = vmatmul.mubr.f32.gmra.mxu1 %v3951_v31 }
  0xcf   :  { %3097 = vmatprep.mubr.f32.mxu1 %v3971_v43 }
  0xd2   :  { %3098 = vmatmul.mubr.f32.gmra.mxu1 %v3981_v49 }
  0xd3   :  { %3100 = vmatprep.mubr.f32.mxu1 %v4001_v61 }
  0xd6   :  { %3101 = vmatmul.mubr.f32.gmra.mxu1 %v4011_v3 }
  0xd7   :  { %3103 = vmatprep.mubr.f32.mxu1 %v4031_v15 }
  0xda   :  { %3104 = vmatmul.mubr.f32.gmra.mxu1 %v4041_v21 }
  0xdb   :  { %3106 = vmatprep.mubr.f32.mxu1 %v5098_v34 }
  0xde   :  { %3107 = vmatmul.mubr.f32.gmra.mxu1 %v5100_v40 }
  0xdf   :  { %3109 = vmatprep.mubr.f32.mxu1 %v4091_v27 }
  0xe2   :  { %3110 = vmatmul.mubr.f32.gmra.mxu1 %v4101_v55 }
  0xe3   :  { %v2666_v35 = vpop.f32.mrf.mxu0 }
  0xe4   :  { %v2746_v39 = vpop.f32.mrf.mxu1 }
  0xe5   :  { %v4286_v41 = vadd.f32 %v2746_v39, %v2666_v35  ;;  %v200_v45 = vpop.f32.mrf.mxu0 }
  0xe6   :  { %v425_v47 = vpop.f32.mrf.mxu1 }
  0xe7   :  { %v4289_v51 = vadd.f32 %v425_v47, %v200_v45  ;;  %v2669_v53 = vpop.f32.mrf.mxu0 }
  0xe8   :  { %v2749_v57 = vpop.f32.mrf.mxu1 }
  0xe9   :  { %v4292_v59 = vadd.f32 %v2749_v57, %v2669_v53  ;;  %v210_v63 = vpop.f32.mrf.mxu0 }
  0xea   :  { %v435_v1 = vpop.f32.mrf.mxu1 }
  0xeb   :  { %v4295_v5 = vadd.f32 %v435_v1, %v210_v63  ;;  %v2672_v38 = vpop.f32.mrf.mxu0 }
  0xec   :  { %v2752_v44 = vpop.f32.mrf.mxu1 }
  0xed   :  { %v4298_v46 = vadd.f32 %v2752_v44, %v2672_v38  ;;  %v220_v7 = vpop.f32.mrf.mxu0 }
  0xee   :  { %v445_v50 = vpop.f32.mrf.mxu1 }
  0xef   :  { %v4301_v11 = vadd.f32 %v445_v50, %v220_v7  ;;  %v2675_v33 = vpop.f32.mrf.mxu0 }
  0xf0   :  { %v2755_v52 = vpop.f32.mrf.mxu1 }
  0xf1   :  { %v4304_v56 = vadd.f32 %v2755_v52, %v2675_v33  ;;  %v230_v13 = vpop.f32.mrf.mxu0 }
  0xf2   :  { %v455_v58 = vpop.f32.mrf.mxu1 }
  0xf3   :  { %v4307_v17 = vadd.f32 %v455_v58, %v230_v13  ;;  %v2678_v62 = vpop.f32.mrf.mxu0 }
  0xf4   :  { %v2758_v0 = vpop.f32.mrf.mxu1 }
  0xf5   :  { %v4310_v4 = vadd.f32 %v2758_v0, %v2678_v62  ;;  %v240_v19 = vpop.f32.mrf.mxu0 }
  0xf6   :  { %v465_v6 = vpop.f32.mrf.mxu1 }
  0xf7   :  { %v4313_v23 = vadd.f32 %v465_v6, %v240_v19  ;;  %v2681_v10 = vpop.f32.mrf.mxu0 }
  0xf8   :  { %v2761_v12 = vpop.f32.mrf.mxu1 }
  0xf9   :  { %v4316_v16 = vadd.f32 %v2761_v12, %v2681_v10  ;;  %v250_v25 = vpop.f32.mrf.mxu0 }
  0xfa   :  { %v475_v18 = vpop.f32.mrf.mxu1 }
  0xfb   :  { %v4319_v29 = vadd.f32 %v475_v18, %v250_v25  ;;  %v2684_v22 = vpop.f32.mrf.mxu0 }
  0xfc   :  { %v2764_v24 = vpop.f32.mrf.mxu1 }
  0xfd   :  { %v4322_v28 = vadd.f32 %v2764_v24, %v2684_v22  ;;  %v260_v31 = vpop.f32.mrf.mxu0 }
  0xfe   :  { %v485_v30 = vpop.f32.mrf.mxu1 }
  0xff   :  { %v4326_v43 = vadd.f32 %v485_v30, %v260_v31  ;;  %v2687_v42 = vpop.f32.mrf.mxu0 }
 0x100   :  { %v2767_v48 = vpop.f32.mrf.mxu1 }
 0x101   :  { %v4328_v60 = vadd.f32 %v2767_v48, %v2687_v42  ;;  %v270_v49 = vpop.f32.mrf.mxu0 }
 0x102   :  { %v495_v2 = vpop.f32.mrf.mxu1 }
 0x103   :  { %v4331_v61 = vadd.f32 %v495_v2, %v270_v49  ;;  %v2690_v14 = vpop.f32.mrf.mxu0 }
 0x104   :  { %v2770_v20 = vpop.f32.mrf.mxu1 }
 0x105   :  { %v4334_v36 = vadd.f32 %v2770_v20, %v2690_v14  ;;  %v280_v3 = vpop.f32.mrf.mxu0 }
 0x106   :  { %v505_v15 = vpop.f32.mrf.mxu1 }
 0x107   :  { %v4337_v37 = vadd.f32 %v505_v15, %v280_v3  ;;  %v2693_v54 = vpop.f32.mrf.mxu0  ;;  %v4372_v3 = vld [vmem:[%s5075_s9] ss:$0 sm:$0xff] }
 0x108   :  { %v2773_v8 = vpop.f32.mrf.mxu1 }
 0x109   :  { %v4340_v9 = vadd.f32 %v2773_v8, %v2693_v54  ;;  %v290_v21 = vpop.f32.mrf.mxu0 }
 0x10a   :  { %v515_v26 = vpop.f32.mrf.mxu1 }
 0x10b   :  { %v4343_v34 = vadd.f32 %v515_v26, %v290_v21  ;;  %v2696_v32 = vpop.f32.mrf.mxu0 }
 0x10c   :  { %v2776_v35 = vpop.f32.mrf.mxu1 }
 0x10d   :  { %v4345_v39 = vadd.f32 %v2776_v35, %v2696_v32  ;;  %v300_v45 = vpop.f32.mrf.mxu0 }
 0x10e   :  { %v525_v40 = vpop.f32.mrf.mxu1 }
 0x10f   :  { %v4347_v47 = vadd.f32 %v525_v40, %v300_v45  ;;  %v2699_v53 = vpop.f32.mrf.mxu0 }
 0x110   :  { %v2779_v27 = vpop.f32.mrf.mxu1 }
 0x111   :  { %v4349_v57 = vadd.f32 %v2779_v27, %v2699_v53  ;;  %v310_v63 = vpop.f32.mrf.mxu0 }
 0x112   :  { %v535_v1 = vpop.f32.mrf.mxu1 }
 0x113   :  { %v4351_v38 = vadd.f32 %v535_v1, %v310_v63  ;;  %v2702_v44 = vpop.f32.mrf.mxu0 }
 0x114   :  { %v2782_v55 = vpop.f32.mrf.mxu1 }
 0x115   :  { %v4353_v7 = vadd.f32 %v2782_v55, %v2702_v44  ;;  %v320_v50 = vpop.f32.mrf.mxu0 }
 0x116   :  { %v545_v33 = vpop.f32.mrf.mxu1 }
 0x117   :  { %v4355_v52 = vadd.f32 %v545_v33, %v320_v50  ;;  %v2705_v13 = vpop.f32.mrf.mxu0 }
 0x118   :  { %v2785_v58 = vpop.f32.mrf.mxu1 }
 0x119   :  { %v4357_v62 = vadd.f32 %v2785_v58, %v2705_v13  ;;  %v330_v0 = vpop.f32.mrf.mxu0 }
 0x11a   :  { %v555_v19 = vpop.f32.mrf.mxu1 }
 0x11b   :  { %v4359_v6 = vadd.f32 %v555_v19, %v330_v0  ;;  %v2708_v10 = vpop.f32.mrf.mxu0 }
 0x11c   :  { %v2788_v12 = vpop.f32.mrf.mxu1 }
 0x11d   :  { %v4361_v25 = vadd.f32 %v2788_v12, %v2708_v10  ;;  %v340_v18 = vpop.f32.mrf.mxu0 }
 0x11e   :  { %v565_v22 = vpop.f32.mrf.mxu1 }
 0x11f   :  { %v4363_v24 = vadd.f32 %v565_v22, %v340_v18  ;;  %v2711_v31 = vpop.f32.mrf.mxu0 }
 0x120   :  { %v2791_v30 = vpop.f32.mrf.mxu1 }
 0x121   :  { %v4365_v42 = vadd.f32 %v2791_v30, %v2711_v31  ;;  %v350_v48 = vpop.f32.mrf.mxu0 }
 0x122   :  { %v575_v49 = vpop.f32.mrf.mxu1 }
 0x123   :  { %v4367_v2 = vadd.f32 %v575_v49, %v350_v48  ;;  %v2826_v14 = vpop.f32.mrf.mxu0 }
 0x124   :  { %v2906_v20 = vpop.f32.mrf.mxu1 }
 0x125   :  { %v1144_v15 = vadd.f32 %v2906_v20, %v2826_v14  ;;  %v913_v54 = vpop.f32.mrf.mxu0 }
 0x126   :  { %v1138_v8 = vpop.f32.mrf.mxu1 }
 0x127   :  { %v1305_v21 = vadd.f32 %v4372_v3, %v1144_v15  ;;  %v1139_v26 = vadd.f32 %v1138_v8, %v913_v54  ;;  %v2829_v32 = vpop.f32.mrf.mxu0 }
 0x128   :  { %v2909_v35 = vpop.f32.mrf.mxu1 }
 0x129   :  { %v2312_v45 = vmul.f32 -1.442695, %v1305_v21  ;;  %v1154_v40 = vadd.f32 %v2909_v35, %v2829_v32  ;;  %v1304_v53 = vadd.f32 %v4372_v3, %v1139_v26  ;;  %v923_v27 = vpop.f32.mrf.mxu0 }
 0x12a   :  { %v1148_v63 = vpop.f32.mrf.mxu1 }
 0x12b   :  { %v1307_v1 = vadd.f32 %v4372_v3, %v1154_v40  ;;  %v1149_v44 = vadd.f32 %v1148_v63, %v923_v27  ;;  %v2311_v55 = vmul.f32 -1.442695, %v1304_v53  ;;  %v2832_v50 = vpop.f32.mrf.mxu0  ;;  %3112 = vpow2.f32 %v2312_v45 }
 0x12c   :  { %v2912_v33 = vpop.f32.mrf.mxu1 }
 0x12d   :  { %v2314_v13 = vmul.f32 -1.442695, %v1307_v1  ;;  %v1306_v58 = vadd.f32 %v4372_v3, %v1149_v44  ;;  %v1164_v0 = vadd.f32 %v2912_v33, %v2832_v50  ;;  %v933_v19 = vpop.f32.mrf.mxu0  ;;  %3114 = vpow2.f32 %v2311_v55 }
 0x12e   :  { %v1158_v10 = vpop.f32.mrf.mxu1 }
 0x12f   :  { %v2313_v12 = vmul.f32 -1.442695, %v1306_v58  ;;  %v1159_v18 = vadd.f32 %v1158_v10, %v933_v19  ;;  %v1309_v22 = vadd.f32 %v4372_v3, %v1164_v0  ;;  %v2835_v31 = vpop.f32.mrf.mxu0  ;;  %3116 = vpow2.f32 %v2314_v13 }
 0x130   :  { %v2915_v30 = vpop.f32.mrf.mxu1 }
 0x131   :  { %v1308_v48 = vadd.f32 %v4372_v3, %v1159_v18  ;;  %v1174_v49 = vadd.f32 %v2915_v30, %v2835_v31  ;;  %v2316_v14 = vmul.f32 -1.442695, %v1309_v22  ;;  %v943_v20 = vpop.f32.mrf.mxu0  ;;  %3118 = vpow2.f32 %v2313_v12 }
 0x132   :  { %v1168_v15 = vpop.f32.mrf.mxu1 }
 0x133   :  { %v2315_v54 = vmul.f32 -1.442695, %v1308_v48  ;;  %v1311_v8 = vadd.f32 %v4372_v3, %v1174_v49  ;;  %v1169_v21 = vadd.f32 %v1168_v15, %v943_v20  ;;  %v2838_v26 = vpop.f32.mrf.mxu0  ;;  %3120 = vpow2.f32 %v2316_v14 }
 0x134   :  { %v2918_v32 = vpop.f32.mrf.mxu1 }
 0x135   :  { %v2318_v35 = vmul.f32 -1.442695, %v1311_v8  ;;  %v1184_v45 = vadd.f32 %v2918_v32, %v2838_v26  ;;  %v1310_v40 = vadd.f32 %v4372_v3, %v1169_v21  ;;  %v953_v53 = vpop.f32.mrf.mxu0  ;;  %3122 = vpow2.f32 %v2315_v54 }
 0x136   :  { %v1178_v27 = vpop.f32.mrf.mxu1 }
 0x137   :  { %v1313_v63 = vadd.f32 %v4372_v3, %v1184_v45  ;;  %v1179_v1 = vadd.f32 %v1178_v27, %v953_v53  ;;  %v2317_v44 = vmul.f32 -1.442695, %v1310_v40  ;;  %v2841_v55 = vpop.f32.mrf.mxu0  ;;  %3124 = vpow2.f32 %v2318_v35 }
 0x138   :  { %v2921_v50 = vpop.f32.mrf.mxu1  ;;  %v3113_v58 = vpop.eup %3112 }
 0x139   :  { %v2320_v33 = vmul.f32 -1.442695, %v1313_v63  ;;  %v1312_v13 = vadd.f32 %v4372_v3, %v1179_v1  ;;  %v1194_v0 = vadd.f32 %v2921_v50, %v2841_v55  ;;  %v963_v19 = vpop.f32.mrf.mxu0  ;;  %v1433_v12 = vadd.f32 1.0, %v3113_v58 }
 0x13a   :  { %v1188_v10 = vpop.f32.mrf.mxu1  ;;  %3126 = vpow2.f32 %v2317_v44  ;;  %v3115_v31 = vpop.eup %3114 }
 0x13b   :  { %v2319_v18 = vmul.f32 -1.442695, %v1312_v13  ;;  %v1189_v22 = vadd.f32 %v1188_v10, %v963_v19  ;;  %3128 = vpow2.f32 %v2320_v33  ;;  %v1315_v30 = vadd.f32 %v4372_v3, %v1194_v0  ;;  %v2844_v48 = vpop.f32.mrf.mxu0 }
 0x13c   :  { %v2924_v49 = vpop.f32.mrf.mxu1  ;;  %3130 = vrcp.f32 %v1433_v12  ;;  %v1432_v14 = vadd.f32 1.0, %v3115_v31  ;;  %v3117_v54 = vpop.eup %3116 }
 0x13d   :  { %v1314_v20 = vadd.f32 %v4372_v3, %v1189_v22  ;;  %v1204_v15 = vadd.f32 %v2924_v49, %v2844_v48  ;;  %3132 = vpow2.f32 %v2319_v18  ;;  %v2322_v8 = vmul.f32 -1.442695, %v1315_v30  ;;  %v973_v21 = vpop.f32.mrf.mxu0 }
 0x13e   :  { %v1198_v26 = vpop.f32.mrf.mxu1  ;;  %3134 = vrcp.f32 %v1432_v14  ;;  %v1435_v32 = vadd.f32 1.0, %v3117_v54  ;;  %v3119_v40 = vpop.eup %3118 }
 0x13f   :  { %v2321_v35 = vmul.f32 -1.442695, %v1314_v20  ;;  %v1317_v45 = vadd.f32 %v4372_v3, %v1204_v15  ;;  %3136 = vpow2.f32 %v2322_v8  ;;  %v1199_v53 = vadd.f32 %v1198_v26, %v973_v21  ;;  %v2847_v27 = vpop.f32.mrf.mxu0 }
 0x140   :  { %v2927_v63 = vpop.f32.mrf.mxu1  ;;  %3138 = vrcp.f32 %v1435_v32  ;;  %v1434_v1 = vadd.f32 1.0, %v3119_v40  ;;  %v3121_v50 = vpop.eup %3120 }
 0x141   :  { %v2324_v44 = vmul.f32 -1.442695, %v1317_v45  ;;  %v1214_v55 = vadd.f32 %v2927_v63, %v2847_v27  ;;  %3140 = vpow2.f32 %v2321_v35  ;;  %v1316_v33 = vadd.f32 %v4372_v3, %v1199_v53  ;;  %v983_v13 = vpop.f32.mrf.mxu0 }
 0x142   :  { %v1208_v58 = vpop.f32.mrf.mxu1  ;;  %3142 = vrcp.f32 %v1434_v1  ;;  %v1437_v0 = vadd.f32 1.0, %v3121_v50  ;;  %v3123_v12 = vpop.eup %3122 }
 0x143   :  { %v1319_v19 = vadd.f32 %v4372_v3, %v1214_v55  ;;  %v1209_v10 = vadd.f32 %v1208_v58, %v983_v13  ;;  %3144 = vpow2.f32 %v2324_v44  ;;  %v2323_v18 = vmul.f32 -1.442695, %v1316_v33  ;;  %v2850_v22 = vpop.f32.mrf.mxu0 }
 0x144   :  { %v2930_v31 = vpop.f32.mrf.mxu1  ;;  %3146 = vrcp.f32 %v1437_v0  ;;  %v1436_v30 = vadd.f32 1.0, %v3123_v12  ;;  %v3125_v14 = vpop.eup %3124 }
 0x145   :  { %v2326_v48 = vmul.f32 -1.442695, %v1319_v19  ;;  %v1318_v49 = vadd.f32 %v4372_v3, %v1209_v10  ;;  %3148 = vpow2.f32 %v2323_v18  ;;  %v1224_v20 = vadd.f32 %v2930_v31, %v2850_v22  ;;  %v993_v15 = vpop.f32.mrf.mxu0 }
 0x146   :  { %v1218_v54 = vpop.f32.mrf.mxu1  ;;  %3150 = vrcp.f32 %v1436_v30  ;;  %v1439_v8 = vadd.f32 1.0, %v3125_v14 }
 0x147   :  { %v2325_v21 = vmul.f32 -1.442695, %v1318_v49  ;;  %v1219_v26 = vadd.f32 %v1218_v54, %v993_v15  ;;  %v3127_v32 = vpop.eup %3126  ;;  %3152 = vpow2.f32 %v2326_v48  ;;  %v1321_v35 = vadd.f32 %v4372_v3, %v1224_v20  ;;  %v2853_v45 = vpop.f32.mrf.mxu0  ;;  %v4397_v54 = vld [vmem:[%s5069_s1] sm:$0xff] }
 0x148   :  { %v2933_v40 = vpop.f32.mrf.mxu1  ;;  %v3129_v53 = vpop.eup %3128  ;;  %3154 = vrcp.f32 %v1439_v8  ;;  %v1438_v27 = vadd.f32 1.0, %v3127_v32  ;;  %v4403_v32 = vld [vmem:[%s5069_s1 + $0x8] sm:$0xff] }
 0x149   :  { %v1320_v63 = vadd.f32 %v4372_v3, %v1219_v26  ;;  %v1234_v1 = vadd.f32 %v2933_v40, %v2853_v45  ;;  %v3131_v44 = vpop.eup %3130  ;;  %v1441_v55 = vadd.f32 1.0, %v3129_v53  ;;  %3156 = vpow2.f32 %v2325_v21  ;;  %v1003_v33 = vpop.f32.mrf.mxu0 }
 0x14a   :  { %v2328_v50 = vmul.f32 -1.442695, %v1321_v35  ;;  %v1228_v13 = vpop.f32.mrf.mxu1  ;;  %v3133_v58 = vpop.eup %3132  ;;  %3158 = vrcp.f32 %v1438_v27  ;;  %v1545_v35 = vmul.f32 %v4403_v32, %v3131_v44 }
 0x14b   :  { %v2327_v0 = vmul.f32 -1.442695, %v1320_v63  ;;  %v1323_v19 = vadd.f32 %v4372_v3, %v1234_v1  ;;  %v1229_v10 = vadd.f32 %v1228_v13, %v1003_v33  ;;  %v3135_v12 = vpop.eup %3134  ;;  %3160 = vrcp.f32 %v1441_v55  ;;  %v2856_v22 = vpop.f32.mrf.mxu0 }
 0x14c   :  { %v1440_v18 = vadd.f32 1.0, %v3133_v58  ;;  %v2936_v31 = vpop.f32.mrf.mxu1  ;;  %v3137_v30 = vpop.eup %3136  ;;  %3162 = vpow2.f32 %v2328_v50  ;;  %v1544_v8 = vmul.f32 %v4397_v54, %v3135_v12 }
 0x14d   :  { %v2330_v48 = vmul.f32 -1.442695, %v1323_v19  ;;  %v1322_v49 = vadd.f32 %v4372_v3, %v1229_v10  ;;  %v1244_v14 = vadd.f32 %v2936_v31, %v2856_v22  ;;  %v3139_v20 = vpop.eup %3138  ;;  %v1443_v15 = vadd.f32 1.0, %v3137_v30  ;;  %v1013_v21 = vpop.f32.mrf.mxu0  ;;  %v4411_v10 = vld [vmem:[%s5069_s1 + $0x10] sm:$0xff]  ;;  %v4417_v31 = vld [vmem:[%s5069_s1 + $0x18] sm:$0xff] }
 0x14e   :  { %3164 = vrcp.f32 %v1440_v18  ;;  %v1238_v26 = vpop.f32.mrf.mxu1  ;;  %v3141_v45 = vpop.eup %3140  ;;  %2984 = vmatprep.mubr.f32.mxu0 %v1544_v8  ;;  %v1547_v30 = vmul.f32 %v4417_v31, %v3139_v20 }
 0x14f   :  { %3166 = vpow2.f32 %v2327_v0  ;;  %v2329_v40 = vmul.f32 -1.442695, %v1322_v49  ;;  %v1325_v53 = vadd.f32 %v4372_v3, %v1244_v14  ;;  %v1239_v27 = vadd.f32 %v1238_v26, %v1013_v21  ;;  %v3143_v63 = vpop.eup %3142  ;;  %v2859_v55 = vpop.f32.mrf.mxu0  ;;  %2985 = vmatmul.mubr.f32.vlgmr.msra.gmra.mxu0 %v1545_v35 }
 0x150   :  { %3168 = vrcp.f32 %v1443_v15  ;;  %v1442_v1 = vadd.f32 1.0, %v3141_v45  ;;  %v2939_v50 = vpop.f32.mrf.mxu1  ;;  %v3145_v33 = vpop.eup %3144  ;;  %v1546_v12 = vmul.f32 %v4411_v10, %v3143_v63 }
 0x151   :  { %3170 = vpow2.f32 %v2330_v48  ;;  %v2332_v13 = vmul.f32 -1.442695, %v1325_v53  ;;  %v1324_v58 = vadd.f32 %v4372_v3, %v1239_v27  ;;  %v1254_v19 = vadd.f32 %v2939_v50, %v2859_v55  ;;  %v3147_v44 = vpop.eup %3146  ;;  %v1023_v18 = vpop.f32.mrf.mxu0 }
 0x152   :  { %3172 = vrcp.f32 %v1442_v1  ;;  %v1445_v0 = vadd.f32 1.0, %v3145_v33  ;;  %v1248_v22 = vpop.f32.mrf.mxu1  ;;  %v3149_v48 = vpop.eup %3148  ;;  %2987 = vmatprep.mubr.f32.mxu0 %v1546_v12  ;;  %v4425_v1 = vld [vmem:[%s5069_s1 + $0x20] sm:$0xff] }
 0x153   :  { %3174 = vpow2.f32 %v2329_v40  ;;  %v2331_v49 = vmul.f32 -1.442695, %v1324_v58  ;;  %v1327_v14 = vadd.f32 %v4372_v3, %v1254_v19  ;;  %v1249_v15 = vadd.f32 %v1248_v22, %v1023_v18  ;;  %v3151_v8 = vpop.eup %3150  ;;  %v2862_v26 = vpop.f32.mrf.mxu0  ;;  %2988 = vmatmul.mubr.f32.gmra.mxu0 %v1547_v30 }
 0x154   :  { %3176 = vrcp.f32 %v1445_v0  ;;  %v1444_v21 = vadd.f32 1.0, %v3149_v48  ;;  %v2942_v35 = vpop.f32.mrf.mxu1  ;;  %v3153_v45 = vpop.eup %3152  ;;  %v1548_v55 = vmul.f32 %v4425_v1, %v3151_v8 }
 0x155   :  { %3178 = vpow2.f32 %v2332_v13  ;;  %v2334_v53 = vmul.f32 -1.442695, %v1327_v14  ;;  %v1326_v27 = vadd.f32 %v4372_v3, %v1249_v15  ;;  %v1264_v63 = vadd.f32 %v2942_v35, %v2862_v26  ;;  %v3155_v20 = vpop.eup %3154  ;;  %v1033_v50 = vpop.f32.mrf.mxu0  ;;  %v4431_v13 = vld [vmem:[%s5069_s1 + $0x28] sm:$0xff] }
 0x156   :  { %3180 = vrcp.f32 %v1444_v21  ;;  %v1447_v40 = vadd.f32 1.0, %v3153_v45  ;;  %v1258_v33 = vpop.f32.mrf.mxu1  ;;  %v1549_v58 = vmul.f32 %v4431_v13, %v3147_v44  ;;  %v3157_v19 = vpop.eup %3156  ;;  %2990 = vmatprep.mubr.f32.mxu0 %v1548_v55 }
 0x157   :  { %3182 = vpow2.f32 %v2331_v49  ;;  %v2333_v0 = vmul.f32 -1.442695, %v1326_v27  ;;  %v1329_v12 = vadd.f32 %v4372_v3, %v1264_v63  ;;  %v1259_v18 = vadd.f32 %v1258_v33, %v1033_v50  ;;  %v3159_v22 = vpop.eup %3158  ;;  %v2865_v48 = vpop.f32.mrf.mxu0  ;;  %v4439_v49 = vld [vmem:[%s5069_s1 + $0x30] sm:$0xff] }
 0x158   :  { %3184 = vrcp.f32 %v1447_v40  ;;  %v1446_v30 = vadd.f32 1.0, %v3157_v19  ;;  %v2945_v14 = vpop.f32.mrf.mxu1  ;;  %v3161_v15 = vpop.eup %3160  ;;  %2991 = vmatmul.mubr.f32.gmra.mxu0 %v1549_v58  ;;  %v1550_v35 = vmul.f32 %v4439_v49, %v3159_v22  ;;  %v4452_v22 = vld [vmem:[%s5069_s1 + $0x40] sm:$0xff] }
 0x159   :  { %3186 = vpow2.f32 %v2334_v53  ;;  %v2336_v8 = vmul.f32 -1.442695, %v1329_v12  ;;  %v1328_v21 = vadd.f32 %v4372_v3, %v1259_v18  ;;  %v1274_v26 = vadd.f32 %v2945_v14, %v2865_v48  ;;  %v3163_v44 = vpop.eup %3162  ;;  %v1043_v45 = vpop.f32.mrf.mxu0  ;;  %v4445_v53 = vld [vmem:[%s5069_s1 + $0x38] sm:$0xff] }
 0x15a   :  { %3188 = vrcp.f32 %v1446_v30  ;;  %v1268_v27 = vpop.f32.mrf.mxu1  ;;  %v1551_v63 = vmul.f32 %v4445_v53, %v3155_v20  ;;  %v1449_v55 = vadd.f32 1.0, %v3163_v44  ;;  %2993 = vmatprep.mubr.f32.mxu0 %v1550_v35  ;;  %v4459_v35 = vld [vmem:[%s5069_s1 + $0x48] sm:$0xff] }
 0x15b   :  { %v3165_v40 = vpop.eup %3164  ;;  %3190 = vpow2.f32 %v2333_v0  ;;  %v2335_v50 = vmul.f32 -1.442695, %v1328_v21  ;;  %v1331_v33 = vadd.f32 %v4372_v3, %v1274_v26  ;;  %v1269_v19 = vadd.f32 %v1268_v27, %v1043_v45  ;;  %v2868_v12 = vpop.f32.mrf.mxu0 }
 0x15c   :  { %v3167_v58 = vpop.eup %3166  ;;  %3192 = vpow2.f32 %v2336_v8  ;;  %v2948_v18 = vpop.f32.mrf.mxu1  ;;  %v1552_v30 = vmul.f32 %v4452_v22, %v3165_v40  ;;  %2994 = vmatmul.mubr.f32.gmra.mxu0 %v1551_v63  ;;  %v1553_v45 = vmul.f32 %v4459_v35, %v3161_v15 }
 0x15d   :  { %v3169_v20 = vpop.eup %3168  ;;  %3194 = vrcp.f32 %v1449_v55  ;;  %v1448_v48 = vadd.f32 1.0, %v3167_v58  ;;  %v2338_v0 = vmul.f32 -1.442695, %v1331_v33  ;;  %v1284_v14 = vadd.f32 %v2948_v18, %v2868_v12  ;;  %v1053_v26 = vpop.f32.mrf.mxu0  ;;  %v4466_v12 = vld [vmem:[%s5069_s1 + $0x50] sm:$0xff] }
 0x15e   :  { %v3171_v21 = vpop.eup %3170  ;;  %3196 = vpow2.f32 %v2335_v50  ;;  %v1330_v8 = vadd.f32 %v4372_v3, %v1269_v19  ;;  %2996 = vmatprep.mubr.f32.mxu0 %v1552_v30  ;;  %v1278_v44 = vpop.f32.mrf.mxu1  ;;  %5101 = vst [vmem:[#allocation2_spill] sm:$0xff] %v4466_v12 }
 0x15f   :  { %v3173_v27 = vpop.eup %3172  ;;  %3198 = vrcp.f32 %v1448_v48  ;;  %v1451_v40 = vadd.f32 1.0, %v3171_v21  ;;  %v1333_v63 = vadd.f32 %v4372_v3, %v1284_v14  ;;  %v1279_v55 = vadd.f32 %v1278_v44, %v1053_v26  ;;  %v2871_v58 = vpop.f32.mrf.mxu0  ;;  %v4473_v44 = vld [vmem:[%s5069_s1 + $0x58] sm:$0xff] }
 0x160   :  { %v3175_v33 = vpop.eup %3174  ;;  %3200 = vpow2.f32 %v2338_v0  ;;  %v2337_v50 = vmul.f32 -1.442695, %v1330_v8  ;;  %v2951_v19 = vpop.f32.mrf.mxu1  ;;  %v1554_v18 = vmul.f32 %v4466_v12, %v3173_v27  ;;  %2997 = vmatmul.mubr.f32.gmra.mxu0 %v1553_v45  ;;  %v1555_v27 = vmul.f32 %v4473_v44, %v3169_v20 }
 0x161   :  { %v3177_v30 = vpop.eup %3176  ;;  %3202 = vrcp.f32 %v1451_v40  ;;  %v1450_v15 = vadd.f32 1.0, %v3175_v33  ;;  %v2340_v48 = vmul.f32 -1.442695, %v1333_v63  ;;  %v1332_v21 = vadd.f32 %v4372_v3, %v1279_v55  ;;  %v1063_v8 = vpop.f32.mrf.mxu0 }
 0x162   :  { %v3179_v14 = vpop.eup %3178  ;;  %3204 = vpow2.f32 %v2337_v50  ;;  %v1294_v0 = vadd.f32 %v2951_v19, %v2871_v58  ;;  %2999 = vmatprep.mubr.f32.mxu0 %v1554_v18  ;;  %v1288_v26 = vpop.f32.mrf.mxu1  ;;  %v4480_v50 = vld [vmem:[%s5069_s1 + $0x60] sm:$0xff] }
 0x163   :  { %v3181_v12 = vpop.eup %3180  ;;  %3206 = vrcp.f32 %v1450_v15  ;;  %v1453_v40 = vadd.f32 1.0, %v3179_v14  ;;  %v2339_v63 = vmul.f32 -1.442695, %v1332_v21  ;;  %v1289_v33 = vadd.f32 %v1288_v26, %v1063_v8  ;;  %5102 = vst [vmem:[#allocation3_spill] sm:$0xff] %v4480_v50  ;;  %v4487_v8 = vld [vmem:[%s5069_s1 + $0x68] sm:$0xff] }
 0x164   :  { %v3183_v55 = vpop.eup %3182  ;;  %3208 = vpow2.f32 %v2340_v48  ;;  %v1335_v45 = vadd.f32 %v4372_v3, %v1294_v0  ;;  %v1556_v58 = vmul.f32 %v4480_v50, %v3181_v12  ;;  %3000 = vmatmul.mubr.f32.gmra.mxu0 %v1555_v27  ;;  %v1557_v12 = vmul.f32 %v4487_v8, %v3177_v30  ;;  %v4499_v30 = vld [vmem:[%s5069_s1 + $0x78] sm:$0xff] }
 0x165   :  { %v3185_v19 = vpop.eup %3184  ;;  %3210 = vrcp.f32 %v1453_v40  ;;  %v1452_v18 = vadd.f32 1.0, %v3183_v55  ;;  %v1334_v20 = vadd.f32 %v4372_v3, %v1289_v33  ;;  %v4493_v3 = vld [vmem:[%s5069_s1 + $0x70] sm:$0xff]  ;;  %5104 = vst [vmem:[#allocation5_spill] sm:$0xff] %v4499_v30 }
 0x166   :  { %v3187_v15 = vpop.eup %3186  ;;  %3212 = vpow2.f32 %v2339_v63  ;;  %v2342_v21 = vmul.f32 -1.442695, %v1335_v45  ;;  %3002 = vmatprep.mubr.f32.mxu0 %v1556_v58  ;;  %5103 = vst [vmem:[#allocation4_spill] sm:$0xff] %v4493_v3  ;;  %v1559_v58 = vmul.f32 %v4499_v30, %v3185_v19  ;;  %v4511_v19 = vld [vmem:[%s5069_s1 + $0x88] sm:$0xff] }
 0x167   :  { %v3189_v48 = vpop.eup %3188  ;;  %3214 = vrcp.f32 %v1452_v18  ;;  %v1455_v14 = vadd.f32 1.0, %v3187_v15  ;;  %v2341_v0 = vmul.f32 -1.442695, %v1334_v20  ;;  %5106 = vst [vmem:[#allocation7_spill] sm:$0xff] %v4511_v19 }
 0x168   :  { %v3191_v26 = vpop.eup %3190  ;;  %3216 = vpow2.f32 %v2342_v21  ;;  %v1558_v27 = vmul.f32 %v4493_v3, %v3189_v48  ;;  %3003 = vmatmul.mubr.f32.gmra.mxu0 %v1557_v12  ;;  %v4505_v21 = vld [vmem:[%s5069_s1 + $0x80] sm:$0xff] }
 0x169   :  { %v3193_v40 = vpop.eup %3192  ;;  %3218 = vrcp.f32 %v1455_v14  ;;  %v1454_v63 = vadd.f32 1.0, %v3191_v26  ;;  %5105 = vst [vmem:[#allocation6_spill] sm:$0xff] %v4505_v21 }
 0x16a   :  { %v3195_v33 = vpop.eup %3194  ;;  %3220 = vpow2.f32 %v2341_v0  ;;  %3005 = vmatprep.mubr.f32.mxu0 %v1558_v27  ;;  %v1457_v45 = vadd.f32 1.0, %v3193_v40 }
 0x16b   :  { %v3197_v55 = vpop.eup %3196  ;;  %3222 = vrcp.f32 %v1454_v63  ;;  %v1561_v26 = vmul.f32 %v4511_v19, %v3195_v33 }
 0x16c   :  { %v3199_v18 = vpop.eup %3198  ;;  %v1456_v20 = vadd.f32 1.0, %v3197_v55  ;;  %3006 = vmatmul.mubr.f32.gmra.mxu0 %v1559_v58  ;;  %v3450_v55 = vld [vmem:[%s5069_s1 + $0x90] sm:$0xff] }
 0x16d   :  { %v3201_v15 = vpop.eup %3200  ;;  %v1560_v48 = vmul.f32 %v4505_v21, %v3199_v18 }
 0x16e   :  { %v3203_v14 = vpop.eup %3202  ;;  %3224 = vrcp.f32 %v1456_v20  ;;  %v1459_v12 = vadd.f32 1.0, %v3201_v15  ;;  %v4520_v15 = vld [vmem:[%s5069_s1 + $0x98] sm:$0xff] }
 0x16f   :  { %v3205_v0 = vpop.eup %3204  ;;  %3226 = vrcp.f32 %v1457_v45  ;;  %3008 = vmatprep.mubr.f32.mxu0 %v1560_v48  ;;  %5107 = vst [vmem:[#allocation8_spill] sm:$0xff] %v4520_v15  ;;  %v1563_v33 = vmul.f32 %v4520_v15, %v3203_v14 }
 0x170   :  { %v3207_v27 = vpop.eup %3206  ;;  %v1458_v40 = vadd.f32 1.0, %v3205_v0  ;;  %3009 = vmatmul.mubr.f32.gmra.mxu0 %v1561_v26 }
 0x171   :  { %v3209_v63 = vpop.eup %3208  ;;  %v1562_v58 = vmul.f32 %v3450_v55, %v3207_v27  ;;  %v3452_v27 = vld [vmem:[%s5069_s1 + $0xa0] sm:$0xff] }
 0x172   :  { %v3211_v18 = vpop.eup %3210  ;;  %3228 = vrcp.f32 %v1458_v40  ;;  %v1461_v20 = vadd.f32 1.0, %v3209_v63 }
 0x173   :  { %v3213_v45 = vpop.eup %3212  ;;  %3230 = vrcp.f32 %v1459_v12  ;;  %3011 = vmatprep.mubr.f32.mxu0 %v1562_v58  ;;  %v3453_v58 = vld [vmem:[%s5069_s1 + $0xa8] sm:$0xff] }
 0x174   :  { %v3215_v48 = vpop.eup %3214  ;;  %v1460_v0 = vadd.f32 1.0, %v3213_v45  ;;  %3012 = vmatmul.mubr.f32.gmra.mxu0 %v1563_v33  ;;  %v1565_v14 = vmul.f32 %v3453_v58, %v3211_v18  ;;  %v3454_v33 = vld [vmem:[%s5069_s1 + $0xb0] sm:$0xff]  ;;  %v3456_v18 = vld [vmem:[%s5069_s1 + $0xc0] sm:$0xff] }
 0x175   :  { %v3217_v26 = vpop.eup %3216  ;;  %v1564_v40 = vmul.f32 %v3452_v27, %v3215_v48 }
 0x176   :  { %v3219_v55 = vpop.eup %3218  ;;  %3232 = vrcp.f32 %v1460_v0  ;;  %v1463_v63 = vadd.f32 1.0, %v3217_v26 }
 0x177   :  { %v3221_v12 = vpop.eup %3220  ;;  %3234 = vrcp.f32 %v1461_v20  ;;  %3014 = vmatprep.mubr.f32.mxu0 %v1564_v40  ;;  %v3455_v20 = vld [vmem:[%s5069_s1 + $0xb8] sm:$0xff] }
 0x178   :  { %v3223_v15 = vpop.eup %3222  ;;  %v1462_v45 = vadd.f32 1.0, %v3221_v12  ;;  %3015 = vmatmul.mubr.f32.gmra.mxu0 %v1565_v14  ;;  %v1567_v0 = vmul.f32 %v3455_v20, %v3219_v55  ;;  %v3459_v14 = vld [vmem:[%s5069_s1 + $0xd8] sm:$0xff] }
 0x179   :  { %v1566_v21 = vmul.f32 %v3454_v33, %v3223_v15  ;;  %v3457_v15 = vld [vmem:[%s5069_s1 + $0xc8] sm:$0xff] }
 0x17a   :  { %3236 = vrcp.f32 %v1462_v45 }
 0x17b   :  { %v3225_v48 = vpop.eup %3224  ;;  %3238 = vrcp.f32 %v1463_v63  ;;  %3017 = vmatprep.mubr.f32.mxu0 %v1566_v21  ;;  %v3458_v63 = vld [vmem:[%s5069_s1 + $0xd0] sm:$0xff] }
 0x17c   :  { %v3227_v26 = vpop.eup %3226  ;;  %v1568_v27 = vmul.f32 %v3456_v18, %v3225_v48  ;;  %3018 = vmatmul.mubr.f32.gmra.mxu0 %v1567_v0  ;;  %v3460_v48 = vld [vmem:[%s5069_s1 + $0xe0] sm:$0xff] }
 0x17d   :  { %v1569_v12 = vmul.f32 %v3457_v15, %v3227_v26  ;;  %v3461_v26 = vld [vmem:[%s5069_s1 + $0xe8] sm:$0xff] }
 0x17e   :  { %3020 = vmatprep.mubr.f32.mxu0 %v1568_v27 }
 0x17f   :  { %v3229_v40 = vpop.eup %3228 }
 0x180   :  { %v3231_v21 = vpop.eup %3230  ;;  %v1570_v55 = vmul.f32 %v3458_v63, %v3229_v40  ;;  %3021 = vmatmul.mubr.f32.gmra.mxu0 %v1569_v12  ;;  %v3462_v40 = vld [vmem:[%s5069_s1 + $0xf0] sm:$0xff]  ;;  %v3463_v12 = vld [vmem:[%s5069_s1 + $0xf8] sm:$0xff]  ;;  %v4559_v63 = vpop.f32.mrf.mxu1 }
 0x181   :  { %v1571_v45 = vmul.f32 %v3459_v14, %v3231_v21 }
 0x182   :  { %3023 = vmatprep.mubr.f32.mxu0 %v1570_v55  ;;  %v4561_v55 = vpop.f32.mrf.mxu1 }
 0x183   :  { %v3233_v58 = vpop.eup %3232 }
 0x184   :  { %v3235_v33 = vpop.eup %3234  ;;  %v1572_v20 = vmul.f32 %v3460_v48, %v3233_v58  ;;  %3024 = vmatmul.mubr.f32.gmra.mxu0 %v1571_v45  ;;  %v4566_v58 = vld [vmem:[%s5076_s8] ss:$0 sm:$0xff]  ;;  %v4568_v14 = vpop.f32.mrf.mxu1 }
 0x185   :  { %v1573_v18 = vmul.f32 %v3461_v26, %v3235_v33  ;;  %v592_v45 = vadd.f32 %v4566_v58, %v4286_v41  ;;  %v591_v48 = vadd.f32 %v4566_v58, %v4289_v51  ;;  %v617_v30 = vadd.f32 %v4566_v58, %v4359_v6 }
 0x186   :  { %3026 = vmatprep.mubr.f32.mxu0 %v1572_v20  ;;  %v4572_v33 = vpop.f32.mrf.mxu1 }
 0x187   :  { %v3237_v0 = vpop.eup %3236  ;;  %v2279_v20 = vmul.f32 -1.442695, %v592_v45  ;;  %v597_v45 = vadd.f32 %v4566_v58, %v4307_v17  ;;  %v601_v17 = vadd.f32 %v4566_v58, %v4319_v29 }
 0x188   :  { %v3239_v27 = vpop.eup %3238  ;;  %v1574_v15 = vmul.f32 %v3462_v40, %v3237_v0  ;;  %3027 = vmatmul.mubr.f32.gmra.mxu0 %v1573_v18  ;;  %v594_v0 = vadd.f32 %v4566_v58, %v4292_v59  ;;  %v4578_v26 = vpop.f32.mrf.mxu1  ;;  %v2278_v18 = vmul.f32 -1.442695, %v591_v48  ;;  %v596_v40 = vadd.f32 %v4566_v58, %v4298_v46 }
 0x189   :  { %v1575_v21 = vmul.f32 %v3463_v12, %v3239_v27  ;;  %v593_v27 = vadd.f32 %v4566_v58, %v4295_v5  ;;  %3240 = vpow2.f32 %v2279_v20  ;;  %v598_v59 = vadd.f32 %v4566_v58, %v4304_v56 }
 0x18a   :  { %3029 = vmatprep.mubr.f32.mxu0 %v1574_v15  ;;  %v2281_v41 = vmul.f32 -1.442695, %v594_v0  ;;  %v595_v15 = vadd.f32 %v4566_v58, %v4301_v11  ;;  %v4586_v12 = vpop.f32.mrf.mxu1  ;;  %3242 = vpow2.f32 %v2278_v18  ;;  %v600_v46 = vadd.f32 %v4566_v58, %v4310_v4 }
 0x18b   :  { %v2280_v51 = vmul.f32 -1.442695, %v593_v27  ;;  %v2285_v11 = vmul.f32 -1.442695, %v598_v59  ;;  %v599_v20 = vadd.f32 %v4566_v58, %v4313_v23  ;;  %v2284_v0 = vmul.f32 -1.442695, %v597_v45 }
 0x18c   :  { %3030 = vmatmul.mubr.f32.gmra.mxu0 %v1575_v21  ;;  %v2283_v21 = vmul.f32 -1.442695, %v596_v40  ;;  %3244 = vpow2.f32 %v2281_v41  ;;  %v2282_v5 = vmul.f32 -1.442695, %v595_v15  ;;  %v4594_v48 = vpop.f32.mrf.mxu1  ;;  %v602_v56 = vadd.f32 %v4566_v58, %v4316_v16 }
 0x18d   :  { %3246 = vpow2.f32 %v2280_v51  ;;  %v2287_v18 = vmul.f32 -1.442695, %v600_v46  ;;  %v2286_v4 = vmul.f32 -1.442695, %v599_v20  ;;  %v604_v41 = vadd.f32 %v4566_v58, %v4322_v28 }
 0x18e   :  { %3248 = vpow2.f32 %v2283_v21  ;;  %v4602_v27 = vpop.f32.mrf.mxu1  ;;  %v2289_v40 = vmul.f32 -1.442695, %v602_v56  ;;  %v2288_v15 = vmul.f32 -1.442695, %v601_v17  ;;  %v603_v16 = vadd.f32 %v4566_v58, %v4326_v43 }
 0x18f   :  { %3250 = vpow2.f32 %v2282_v5  ;;  %v2291_v29 = vmul.f32 -1.442695, %v604_v41  ;;  %v606_v21 = vadd.f32 %v4566_v58, %v4328_v60  ;;  %v605_v28 = vadd.f32 %v4566_v58, %v4331_v61 }
 0x190   :  { %3252 = vpow2.f32 %v2285_v11  ;;  %v4608_v51 = vpop.f32.mrf.mxu1  ;;  %v2290_v46 = vmul.f32 -1.442695, %v603_v16  ;;  %v608_v60 = vadd.f32 %v4566_v58, %v4334_v36 }
 0x191   :  { %3254 = vpow2.f32 %v2284_v0  ;;  %v2293_v0 = vmul.f32 -1.442695, %v606_v21  ;;  %v607_v21 = vadd.f32 %v4566_v58, %v4337_v37 }
 0x192   :  { %3256 = vpow2.f32 %v2287_v18  ;;  %v4614_v11 = vpop.f32.mrf.mxu1 }
 0x193   :  { %3258 = vpow2.f32 %v2286_v4  ;;  %v2292_v4 = vmul.f32 -1.442695, %v605_v28 }
 0x194   :  { %3260 = vpow2.f32 %v2289_v40  ;;  %v4618_v40 = vpop.f32.mrf.mxu1 }
 0x195   :  { %3262 = vpow2.f32 %v2288_v15 }
 0x196   :  { %v3241_v23 = vpop.eup %3240  ;;  %3264 = vpow2.f32 %v2291_v29  ;;  %v2295_v29 = vmul.f32 -1.442695, %v608_v60 }
 0x197   :  { %v3243_v59 = vpop.eup %3242  ;;  %v720_v45 = vadd.f32 1.0, %v3241_v23 }
 0x198   :  { %v719_v20 = vadd.f32 1.0, %v3243_v59 }
 0x199   :  { %v3245_v5 = vpop.eup %3244  ;;  %3266 = vrcp.f32 %v720_v45  ;;  %v4622_v45 = vpop.f32.mrf.mxu1 }
 0x19a   :  { %v3247_v43 = vpop.eup %3246  ;;  %v722_v18 = vadd.f32 1.0, %v3245_v5  ;;  %3268 = vpow2.f32 %v2290_v46 }
 0x19b   :  { %v3249_v56 = vpop.eup %3248  ;;  %3270 = vrcp.f32 %v719_v20  ;;  %v721_v41 = vadd.f32 1.0, %v3247_v43  ;;  %v610_v43 = vadd.f32 %v4566_v58, %v4340_v9 }
 0x19c   :  { %v3251_v17 = vpop.eup %3250  ;;  %v724_v23 = vadd.f32 1.0, %v3249_v56  ;;  %3272 = vpow2.f32 %v2293_v0  ;;  %v2294_v0 = vmul.f32 -1.442695, %v607_v21  ;;  %v4626_v56 = vpop.f32.mrf.mxu1 }
 0x19d   :  { %v3253_v61 = vpop.eup %3252  ;;  %3274 = vrcp.f32 %v722_v18  ;;  %v723_v16 = vadd.f32 1.0, %v3251_v17  ;;  %v609_v17 = vadd.f32 %v4566_v58, %v4343_v34  ;;  %v611_v34 = vadd.f32 %v4566_v58, %v4347_v47 }
 0x19e   :  { %v3255_v15 = vpop.eup %3254  ;;  %3276 = vpow2.f32 %v2292_v4  ;;  %v726_v36 = vadd.f32 1.0, %v3253_v61  ;;  %v612_v61 = vadd.f32 %v4566_v58, %v4345_v39  ;;  %v614_v39 = vadd.f32 %v4566_v58, %v4349_v57 }
 0x19f   :  { %v3257_v59 = vpop.eup %3256  ;;  %3278 = vrcp.f32 %v721_v41  ;;  %v725_v46 = vadd.f32 1.0, %v3255_v15  ;;  %v2297_v41 = vmul.f32 -1.442695, %v610_v43  ;;  %v4634_v15 = vpop.f32.mrf.mxu1  ;;  %v613_v47 = vadd.f32 %v4566_v58, %v4351_v38 }
 0x1a0   :  { %v3259_v5 = vpop.eup %3258  ;;  %3280 = vrcp.f32 %v724_v23  ;;  %v728_v20 = vadd.f32 1.0, %v3257_v59  ;;  %v2296_v59 = vmul.f32 -1.442695, %v609_v17  ;;  %v616_v17 = vadd.f32 %v4566_v58, %v4353_v7 }
 0x1a1   :  { %v3261_v28 = vpop.eup %3260  ;;  %3282 = vrcp.f32 %v723_v16  ;;  %v727_v37 = vadd.f32 1.0, %v3259_v5  ;;  %v2299_v5 = vmul.f32 -1.442695, %v612_v61  ;;  %v2300_v38 = vmul.f32 -1.442695, %v613_v47 }
 0x1a2   :  { %3284 = vpow2.f32 %v2295_v29  ;;  %v3263_v18 = vpop.eup %3262  ;;  %v730_v4 = vadd.f32 1.0, %v3261_v28  ;;  %v615_v7 = vadd.f32 %v4566_v58, %v4355_v52 }
 0x1a3   :  { %3286 = vrcp.f32 %v726_v36  ;;  %v3265_v60 = vpop.eup %3264  ;;  %v729_v9 = vadd.f32 1.0, %v3263_v18 }
 0x1a4   :  { %3288 = vrcp.f32 %v725_v46  ;;  %v732_v21 = vadd.f32 1.0, %v3265_v60  ;;  %v2302_v19 = vmul.f32 -1.442695, %v615_v7 }
 0x1a5   :  { %3290 = vrcp.f32 %v728_v20  ;;  %v4644_v20 = vpop.f32.mrf.mxu1 }
 0x1a6   :  { %v4632_v23 = vpop.eup %3266  ;;  %3292 = vpow2.f32 %v2294_v0  ;;  %v2298_v0 = vmul.f32 -1.442695, %v611_v34 }
 0x1a7   :  { %v3269_v16 = vpop.eup %3268  ;;  %3294 = vrcp.f32 %v727_v37  ;;  %v4656_v61 = vpop.f32.mrf.mxu1 }
 0x1a8   :  { %v4638_v29 = vpop.eup %3270  ;;  %3296 = vrcp.f32 %v730_v4  ;;  %v731_v28 = vadd.f32 1.0, %v3269_v16  ;;  %v2301_v4 = vmul.f32 -1.442695, %v614_v39 }
 0x1a9   :  { %v3273_v36 = vpop.eup %3272  ;;  %3298 = vpow2.f32 %v2297_v41 }
 0x1aa   :  { %v4642_v46 = vpop.eup %3274  ;;  %3300 = vrcp.f32 %v729_v9  ;;  %v734_v37 = vadd.f32 1.0, %v3273_v36 }
 0x1ab   :  { %v3277_v43 = vpop.eup %3276  ;;  %3302 = vpow2.f32 %v2296_v59  ;;  %v2303_v59 = vmul.f32 -1.442695, %v616_v17 }
 0x1ac   :  { %v4648_v18 = vpop.eup %3278  ;;  %3304 = vrcp.f32 %v732_v21  ;;  %v733_v41 = vadd.f32 1.0, %v3277_v43  ;;  %v4665_v21 = vld [vmem:[%s5077_s10] ss:$0 sm:$0xff] }
 0x1ad   :  { %v4652_v57 = vpop.eup %3280  ;;  %3306 = vpow2.f32 %v2299_v5 }
 0x1ae   :  { %v4654_v60 = vpop.eup %3282  ;;  %3308 = vrcp.f32 %v731_v28 }
 0x1af   :  { %v3285_v9 = vpop.eup %3284  ;;  %3310 = vpow2.f32 %v2298_v0  ;;  %v4672_v0 = vpop.f32.mrf.mxu1 }
 0x1b0   :  { %v4658_v16 = vpop.eup %3286  ;;  %3312 = vrcp.f32 %v734_v37  ;;  %v736_v28 = vadd.f32 1.0, %v3285_v9 }
 0x1b1   :  { %v4667_v36 = vpop.eup %3288  ;;  %3314 = vpow2.f32 %v2301_v4  ;;  %v4686_v7 = vpop.f32.mrf.mxu1 }
 0x1b2   :  { %v4670_v39 = vpop.eup %3290  ;;  %3316 = vrcp.f32 %v733_v41  ;;  %5108 = vst [vmem:[#allocation9_spill] sm:$0xff] %v4686_v7 }
 0x1b3   :  { %v3293_v47 = vpop.eup %3292  ;;  %3318 = vpow2.f32 %v2300_v38 }
 0x1b4   :  { %v4676_v17 = vpop.eup %3294  ;;  %3320 = vpow2.f32 %v2303_v59 }
 0x20f   :  { %v2986_v34 = vpop.f32.mrf.mxu0 }
 0x210   :  { %v1889_v5 = vadd.f32 %v4559_v63, %v2986_v34  ;;  %v618_v63 = vadd.f32 %v4566_v58, %v4357_v62  ;;  %v4680_v34 = vpop.eup %3296 }
 0x211   :  { %v1658_v43 = vpop.f32.mrf.mxu0  ;;  %v3299_v38 = vpop.eup %3298 }
 0x212   :  { %v2050_v52 = vadd.f32 %v4665_v21, %v1889_v5  ;;  %v1884_v37 = vadd.f32 %v4561_v55, %v1658_v43  ;;  %v2146_v5 = vsub.f32 1.0, %v4632_v23  ;;  %v2145_v55 = vsub.f32 1.0, %v4638_v29  ;;  %v4688_v3 = vpop.eup %3300 }
 0x213   :  { %v2989_v4 = vpop.f32.mrf.mxu0  ;;  %v735_v43 = vadd.f32 1.0, %v3293_v47 }
 0x214   :  { %3322 = vtanh.f32 %v2050_v52  ;;  %v2049_v41 = vadd.f32 %v4665_v21, %v1884_v37  ;;  %v1899_v9 = vadd.f32 %v4568_v14, %v2989_v4  ;;  %v3303_v37 = vpop.eup %3302  ;;  %v2148_v14 = vsub.f32 1.0, %v4642_v46 }
 0x215   :  { %3324 = vrcp.f32 %v736_v28  ;;  %v1668_v59 = vpop.f32.mrf.mxu0  ;;  %v2305_v4 = vmul.f32 -1.442695, %v618_v63  ;;  %v4695_v47 = vpop.eup %3304 }
 0x216   :  { %3326 = vtanh.f32 %v2049_v41  ;;  %v2052_v62 = vadd.f32 %v4665_v21, %v1899_v9  ;;  %v1894_v52 = vadd.f32 %v4572_v33, %v1668_v59  ;;  %v3307_v7 = vpop.eup %3306  ;;  %v738_v9 = vadd.f32 1.0, %v3299_v38  ;;  %v4705_v59 = vpop.f32.mrf.mxu1 }
 0x217   :  { %3328 = vpow2.f32 %v2302_v19  ;;  %v4700_v33 = vmul.f32 %v4403_v32, %v2146_v5  ;;  %v4703_v19 = vmul.f32 %v4397_v54, %v2145_v55  ;;  %5109 = vst [vmem:[#allocation10_spill] sm:$0xff] %v4705_v59  ;;  %v4707_v6 = vpop.eup %3308  ;;  %v2304_v32 = vmul.f32 -1.442695, %v617_v30 }
 0x218   :  { %v2992_v28 = vpop.f32.mrf.mxu0  ;;  %3330 = vtanh.f32 %v2052_v62  ;;  %v2051_v50 = vadd.f32 %v4665_v21, %v1894_v52  ;;  %v2147_v62 = vsub.f32 1.0, %v4648_v18  ;;  %v620_v54 = vadd.f32 %v4566_v58, %v4361_v25 }
 0x219   :  { %v1909_v41 = vadd.f32 %v4578_v26, %v2992_v28  ;;  %3332 = vrcp.f32 %v735_v43  ;;  %v4712_v43 = vpop.eup %3310  ;;  %v4717_v38 = vmul.f32 %v4417_v31, %v2148_v14  ;;  %v2150_v28 = vsub.f32 1.0, %v4652_v57  ;;  %v4728_v14 = vpop.f32.mrf.mxu1 }
 0x21a   :  { %v1678_v63 = vpop.f32.mrf.mxu0  ;;  %3334 = vtanh.f32 %v2051_v50  ;;  %v4719_v55 = vpop.eup %3312  ;;  %v2149_v30 = vsub.f32 1.0, %v4654_v60  ;;  %v737_v25 = vadd.f32 1.0, %v3303_v37  ;;  %5111 = vst [vmem:[#allocation12_spill] sm:$0xff] %v4728_v14  ;;  %v4733_v59 = vmul.f32 %v4411_v10, %v2147_v62 }
 0x21b   :  { %v2054_v52 = vadd.f32 %v4665_v21, %v1909_v41  ;;  %v1904_v26 = vadd.f32 %v4586_v12, %v1678_v63  ;;  %3336 = vpow2.f32 %v2305_v4  ;;  %5110 = vst [vmem:[#allocation11_spill] sm:$0xff] %v4719_v55  ;;  %v4724_v41 = vpop.eup %3314  ;;  %v2152_v4 = vsub.f32 1.0, %v4658_v16 }
 0x21c   :  { %v2995_v5 = vpop.f32.mrf.mxu0  ;;  %v4730_v63 = vpop.eup %3316  ;;  %v619_v37 = vadd.f32 %v4566_v58, %v4363_v24  ;;  %v4745_v10 = vmul.f32 %v4431_v13, %v2150_v28 }
 0x21d   :  { %3338 = vtanh.f32 %v2054_v52  ;;  %v2053_v50 = vadd.f32 %v4665_v21, %v1904_v26  ;;  %v1919_v12 = vadd.f32 %v4594_v48, %v2995_v5  ;;  %v4737_v26 = vpop.eup %3318  ;;  %v2151_v5 = vsub.f32 1.0, %v4667_v36 }
 0x21e   :  { %3340 = vrcp.f32 %v738_v9  ;;  %v1688_v31 = vpop.f32.mrf.mxu0  ;;  %v2307_v9 = vmul.f32 -1.442695, %v620_v54  ;;  %v4742_v55 = vpop.eup %3320  ;;  %v4753_v54 = vmul.f32 %v4445_v53, %v2152_v4 }
 0x21f   :  { %3342 = vtanh.f32 %v2053_v50  ;;  %v2056_v52 = vadd.f32 %v4665_v21, %v1919_v12  ;;  %v1914_v48 = vadd.f32 %v4602_v27, %v1688_v31  ;;  %5112 = vst [vmem:[#allocation13_spill] sm:$0xff] %v4742_v55  ;;  %v740_v12 = vadd.f32 1.0, %v3307_v7  ;;  %v4755_v31 = vpop.f32.mrf.mxu1 }
 0x220   :  { %3344 = vpow2.f32 %v2304_v32  ;;  %v2998_v14 = vpop.f32.mrf.mxu0  ;;  %v4750_v32 = vmul.f32 %v4425_v1, %v2149_v30  ;;  %v2154_v7 = vsub.f32 1.0, %v4670_v39  ;;  %v2306_v1 = vmul.f32 -1.442695, %v619_v37 }
 0x221   :  { %3346 = vtanh.f32 %v2056_v52  ;;  %v2055_v62 = vadd.f32 %v4665_v21, %v1914_v48  ;;  %v1929_v27 = vadd.f32 %v4608_v51, %v2998_v14  ;;  %v3323_v50 = vpop.eup %3322  ;;  %v4764_v53 = vmul.f32 %v4439_v49, %v2151_v5  ;;  %v4775_v37 = vpop.f32.mrf.mxu1 }
 0x222   :  { %3348 = vrcp.f32 %v737_v25  ;;  %v1698_v24 = vpop.f32.mrf.mxu0  ;;  %v4757_v55 = vpop.eup %3324  ;;  %v2114_v13 = vmul.f32 %v3323_v50, %v4632_v23 }
 0x223   :  { %3350 = vtanh.f32 %v2055_v62  ;;  %v2058_v28 = vadd.f32 %v4665_v21, %v1929_v27  ;;  %v1924_v51 = vadd.f32 %v4614_v11, %v1698_v24  ;;  %v3327_v25 = vpop.eup %3326  ;;  %v2153_v11 = vsub.f32 1.0, %v4676_v17 }
 0x224   :  { %3352 = vpow2.f32 %v2307_v9  ;;  %v3001_v30 = vpop.f32.mrf.mxu0  ;;  %v4766_v4 = vpop.eup %3328  ;;  %v2210_v14 = vadd.f32 %v4700_v33, %v2114_v13  ;;  %v2113_v23 = vmul.f32 %v3327_v25, %v4638_v29  ;;  %v622_v9 = vadd.f32 %v4566_v58, %v4365_v42 }
 0x225   :  { %3354 = vtanh.f32 %v2058_v28  ;;  %v2057_v52 = vadd.f32 %v4665_v21, %v1924_v51  ;;  %v3331_v48 = vpop.eup %3330  ;;  %v1939_v49 = vadd.f32 %v4618_v40, %v3001_v30  ;;  %v739_v42 = vadd.f32 1.0, %v4712_v43 }
 0x226   :  { %3356 = vrcp.f32 %v740_v12  ;;  %v1708_v5 = vpop.f32.mrf.mxu0  ;;  %v4777_v62 = vpop.eup %3332  ;;  %2242 = vst [vmem:[%s5078_s11 + $0x8] sm:$0xff] %v2210_v14  ;;  %v2209_v29 = vadd.f32 %v4703_v19, %v2113_v23  ;;  %v2116_v33 = vmul.f32 %v3331_v48, %v4642_v46  ;;  %v4787_v40 = vmul.f32 %v4459_v35, %v2154_v7 }
 0x227   :  { %3358 = vtanh.f32 %v2057_v52  ;;  %v1934_v27 = vadd.f32 %v4622_v45, %v1708_v5  ;;  %v3335_v50 = vpop.eup %3334  ;;  %v2060_v12 = vadd.f32 %v4665_v21, %v1939_v49  ;;  %v2156_v35 = vsub.f32 1.0, %v4680_v34 }
 0x228   :  { %3360 = vpow2.f32 %v2306_v1  ;;  %v3004_v24 = vpop.f32.mrf.mxu0  ;;  %v4790_v13 = vpop.eup %3336  ;;  %2241 = vst [vmem:[%s5078_s11] sm:$0xff] %v2209_v29  ;;  %v2212_v46 = vadd.f32 %v4717_v38, %v2116_v33  ;;  %v2115_v45 = vmul.f32 %v3335_v50, %v4648_v18  ;;  %v2309_v51 = vmul.f32 -1.442695, %v622_v9 }
 0x229   :  { %v2059_v19 = vadd.f32 %v4665_v21, %v1934_v27  ;;  %v1949_v43 = vadd.f32 %v4626_v56, %v3004_v24  ;;  %v4801_v25 = vmul.f32 %v4452_v22, %v2153_v11  ;;  %3362 = vtanh.f32 %v2060_v12  ;;  %v4803_v1 = vpop.f32.mrf.mxu1  ;;  %v5113_v12 = vld [vmem:[#allocation2_spill] sm:$0xff] }
 0x22a   :  { %v3339_v28 = vpop.eup %3338  ;;  %v1718_v7 = vpop.f32.mrf.mxu0  ;;  %2244 = vst [vmem:[%s5078_s11 + $0x18] sm:$0xff] %v2212_v46  ;;  %v2211_v18 = vadd.f32 %v4733_v59, %v2115_v45  ;;  %v2155_v22 = vsub.f32 1.0, %v4688_v3  ;;  %v621_v23 = vadd.f32 %v4566_v58, %v4367_v2  ;;  %v2158_v5 = vsub.f32 1.0, %v4695_v47 }
 0x22b   :  { %v4805_v30 = vpop.eup %3340  ;;  %v2118_v56 = vmul.f32 %v3339_v28, %v4652_v57  ;;  %3364 = vtanh.f32 %v2059_v19  ;;  %v2062_v38 = vadd.f32 %v4665_v21, %v1949_v43  ;;  %v1944_v52 = vadd.f32 %v4634_v15, %v1718_v7  ;;  %v4828_v29 = vpop.f32.mrf.mxu1 }
 0x22c   :  { %v3343_v14 = vpop.eup %3342  ;;  %3366 = vrcp.f32 %v739_v42  ;;  %v3007_v48 = vpop.f32.mrf.mxu0  ;;  %2243 = vst [vmem:[%s5078_s11 + $0x10] sm:$0xff] %v2211_v18  ;;  %v742_v2 = vadd.f32 1.0, %v4724_v41  ;;  %v2308_v50 = vmul.f32 -1.442695, %v621_v23  ;;  %v2188_v42 = vmul.f32 %v4473_v44, %v2156_v35  ;;  %v5114_v18 = vld [vmem:[#allocation9_spill] sm:$0xff] }
 0x22d   :  { %v4817_v11 = vpop.eup %3344  ;;  %v2214_v57 = vadd.f32 %v4745_v10, %v2118_v56  ;;  %v2117_v59 = vmul.f32 %v3343_v14, %v4654_v60  ;;  %3368 = vtanh.f32 %v2062_v38  ;;  %v1959_v9 = vadd.f32 %v4644_v20, %v3007_v48  ;;  %v5115_v38 = vld [vmem:[#allocation11_spill] sm:$0xff] }
 0x22e   :  { %v3347_v49 = vpop.eup %3346  ;;  %3370 = vpow2.f32 %v2309_v51  ;;  %v2061_v58 = vadd.f32 %v4665_v21, %v1944_v52  ;;  %v1728_v15 = vpop.f32.mrf.mxu0  ;;  %v4841_v24 = vmul.f32 %v5113_v12, %v2155_v22  ;;  %v2157_v44 = vsub.f32 1.0, %v4707_v6 }
 0x22f   :  { %v4830_v33 = vpop.eup %3348  ;;  %2246 = vst [vmem:[%s5078_s11 + $0x28] sm:$0xff] %v2214_v57  ;;  %v2213_v60 = vadd.f32 %v4750_v32, %v2117_v59  ;;  %v2120_v20 = vmul.f32 %v3347_v49, %v4658_v16  ;;  %v2064_v10 = vadd.f32 %v4665_v21, %v1959_v9  ;;  %v1954_v41 = vadd.f32 %v4656_v61, %v1728_v15  ;;  %v4856_v51 = vpop.f32.mrf.mxu1  ;;  %v5116_v57 = vld [vmem:[#allocation10_spill] sm:$0xff]  ;;  %v5117_v9 = vld [vmem:[#allocation13_spill] sm:$0xff] }
 0x230   :  { %v3351_v27 = vpop.eup %3350  ;;  %3372 = vtanh.f32 %v2061_v58  ;;  %v3010_v46 = vpop.f32.mrf.mxu0  ;;  %v4853_v43 = vmul.f32 %v4487_v8, %v2158_v5  ;;  %v2160_v14 = vsub.f32 1.0, %v5115_v38  ;;  %v744_v49 = vadd.f32 1.0, %v5117_v9  ;;  %v5118_v5 = vld [vmem:[#allocation3_spill] sm:$0xff] }
 0x231   :  { %v4843_v45 = vpop.eup %3352  ;;  %2245 = vst [vmem:[%s5078_s11 + $0x20] sm:$0xff] %v2213_v60  ;;  %v2216_v16 = vadd.f32 %v4753_v54, %v2120_v20  ;;  %v2119_v32 = vmul.f32 %v3351_v27, %v4667_v36  ;;  %3374 = vtanh.f32 %v2064_v10  ;;  %v2063_v61 = vadd.f32 %v4665_v21, %v1954_v41  ;;  %v4881_v15 = vpop.f32.mrf.mxu1  ;;  %v5119_v20 = vld [vmem:[#allocation12_spill] sm:$0xff] }
 0x232   :  { %v3355_v19 = vpop.eup %3354  ;;  %3376 = vrcp.f32 %v742_v2  ;;  %v1969_v28 = vadd.f32 %v4672_v0, %v3010_v46  ;;  %v1738_v35 = vpop.f32.mrf.mxu0  ;;  %v741_v0 = vadd.f32 1.0, %v4737_v26  ;;  %v2159_v26 = vsub.f32 1.0, %v4730_v63 }
 0x233   :  { %v4858_v7 = vpop.eup %3356  ;;  %2248 = vst [vmem:[%s5078_s11 + $0x38] sm:$0xff] %v2216_v16  ;;  %v2215_v36 = vadd.f32 %v4764_v53, %v2119_v32  ;;  %v2122_v54 = vmul.f32 %v3355_v19, %v4670_v39  ;;  %3378 = vtanh.f32 %v2063_v61  ;;  %v1964_v56 = vadd.f32 %v5114_v18, %v1738_v35 }
 0x234   :  { %v3359_v8 = vpop.eup %3358  ;;  %3380 = vpow2.f32 %v2308_v50  ;;  %v2066_v22 = vadd.f32 %v4665_v21, %v1969_v28  ;;  %v3013_v23 = vpop.f32.mrf.mxu0  ;;  %v2189_v2 = vmul.f32 %v5118_v5, %v2157_v44  ;;  %v2162_v27 = vsub.f32 1.0, %v4757_v55 }
 0x235   :  { %v4869_v52 = vpop.eup %3360  ;;  %2247 = vst [vmem:[%s5078_s11 + $0x30] sm:$0xff] %v2215_v36  ;;  %v2218_v39 = vadd.f32 %v4787_v40, %v2122_v54  ;;  %v2121_v53 = vmul.f32 %v3359_v8, %v4676_v17  ;;  %v2065_v48 = vadd.f32 %v4665_v21, %v1964_v56  ;;  %v1979_v59 = vadd.f32 %v5116_v57, %v3013_v23  ;;  %v4902_v36 = vpop.f32.mrf.mxu1 }
 0x236   :  { %3382 = vtanh.f32 %v2066_v22  ;;  %v1748_v58 = vpop.f32.mrf.mxu0  ;;  %v3363_v60 = vpop.eup %3362  ;;  %v743_v50 = vadd.f32 1.0, %v4766_v4  ;;  %v746_v4 = vadd.f32 1.0, %v4790_v13  ;;  %v5121_v13 = vld [vmem:[#allocation4_spill] sm:$0xff]  ;;  %v747_v5 = vadd.f32 1.0, %v4869_v52 }
 0x237   :  { %2250 = vst [vmem:[%s5078_s11 + $0x48] sm:$0xff] %v2218_v39  ;;  %v2217_v17 = vadd.f32 %v4801_v25, %v2121_v53  ;;  %3384 = vtanh.f32 %v2065_v48  ;;  %v2068_v40 = vadd.f32 %v4665_v21, %v1979_v59  ;;  %v1974_v10 = vadd.f32 %v5119_v20, %v1748_v58 }
 0x238   :  { %v3365_v41 = vpop.eup %3364  ;;  %3386 = vrcp.f32 %v741_v0  ;;  %v2124_v12 = vmul.f32 %v3363_v60, %v4680_v34  ;;  %v3016_v46 = vpop.f32.mrf.mxu0  ;;  %v5120_v34 = vld [vmem:[#allocation5_spill] sm:$0xff]  ;;  %v2164_v53 = vsub.f32 1.0, %v4805_v30  ;;  %v745_v48 = vadd.f32 1.0, %v4817_v11 }
 0x239   :  { %v4892_v16 = vpop.eup %3366  ;;  %2249 = vst [vmem:[%s5078_s11 + $0x40] sm:$0xff] %v2217_v17  ;;  %v2123_v25 = vmul.f32 %v3365_v41, %v4688_v3  ;;  %3388 = vtanh.f32 %v2068_v40  ;;  %v2067_v32 = vadd.f32 %v4665_v21, %v1974_v10  ;;  %v1989_v61 = vadd.f32 %v4755_v31, %v3016_v46 }
 0x23a   :  { %v3369_v19 = vpop.eup %3368  ;;  %3390 = vrcp.f32 %v744_v49  ;;  %v2220_v44 = vadd.f32 %v2188_v42, %v2124_v12  ;;  %v2192_v28 = vmul.f32 %v5120_v34, %v2160_v14  ;;  %v1758_v35 = vpop.f32.mrf.mxu0  ;;  %v2161_v31 = vsub.f32 1.0, %v4777_v62 }
 0x23b   :  { %v3371_v54 = vpop.eup %3370  ;;  %v2219_v18 = vadd.f32 %v4841_v24, %v2123_v25  ;;  %v2126_v3 = vmul.f32 %v3369_v19, %v4695_v47  ;;  %3392 = vtanh.f32 %v2067_v32  ;;  %v2070_v56 = vadd.f32 %v4665_v21, %v1989_v61  ;;  %v5122_v24 = vld [vmem:[#allocation7_spill] sm:$0xff] }
 0x23c   :  { %3394 = vrcp.f32 %v743_v50  ;;  %2252 = vst [vmem:[%s5078_s11 + $0x58] sm:$0xff] %v2220_v44  ;;  %v2191_v42 = vmul.f32 %v5121_v13, %v2159_v26  ;;  %v1984_v8 = vadd.f32 %v4775_v37, %v1758_v35  ;;  %v3019_v14 = vpop.f32.mrf.mxu0  ;;  %v2194_v22 = vmul.f32 %v5122_v24, %v2162_v27  ;;  %v2013_v26 = vpop.f32.mrf.mxu1  ;;  %v5124_v50 = vld [vmem:[#allocation8_spill] sm:$0xff] }
 0x23d   :  { %v3373_v0 = vpop.eup %3372  ;;  %2251 = vst [vmem:[%s5078_s11 + $0x50] sm:$0xff] %v2219_v18  ;;  %v2222_v47 = vadd.f32 %v4853_v43, %v2126_v3  ;;  %3396 = vtanh.f32 %v2070_v56  ;;  %v1999_v23 = vadd.f32 %v4803_v1, %v3019_v14  ;;  %v2196_v12 = vmul.f32 %v5124_v50, %v2164_v53 }
 0x23e   :  { %v3375_v39 = vpop.eup %3374  ;;  %v2125_v37 = vmul.f32 %v3373_v0, %v4707_v6  ;;  %v2069_v57 = vadd.f32 %v4665_v21, %v1984_v8  ;;  %v1768_v59 = vpop.f32.mrf.mxu0  ;;  %3398 = vrcp.f32 %v746_v4  ;;  %v748_v6 = vadd.f32 1.0, %v4843_v45 }
 0x23f   :  { %v4923_v9 = vpop.eup %3376  ;;  %2254 = vst [vmem:[%s5078_s11 + $0x68] sm:$0xff] %v2222_v47  ;;  %v2128_v1 = vmul.f32 %v3375_v39, %v5115_v38  ;;  %v2072_v43 = vadd.f32 %v4665_v21, %v1999_v23  ;;  %v1994_v49 = vadd.f32 %v4828_v29, %v1768_v59  ;;  %v2163_v38 = vsub.f32 1.0, %v4830_v33  ;;  %v5123_v29 = vld [vmem:[#allocation6_spill] sm:$0xff]  ;;  %v3108_v41 = vpop.f32.mrf.mxu1 }
 0x240   :  { %v3379_v11 = vpop.eup %3378  ;;  %v2221_v58 = vadd.f32 %v2189_v2, %v2125_v37  ;;  %3400 = vtanh.f32 %v2069_v57  ;;  %v3022_v60 = vpop.f32.mrf.mxu0  ;;  %v2193_v45 = vmul.f32 %v5123_v29, %v2161_v31  ;;  %v750_v32 = vadd.f32 1.0, %v3371_v54  ;;  %v3467_v29 = vld [vmem:[%s5069_s1 + $0xb8] sm:$0xff] }
 0x241   :  { %v3381_v17 = vpop.eup %3380  ;;  %v2224_v40 = vadd.f32 %v2192_v28, %v2128_v1  ;;  %v2127_v20 = vmul.f32 %v3379_v11, %v4730_v63  ;;  %3402 = vtanh.f32 %v2072_v43  ;;  %v2071_v10 = vadd.f32 %v4665_v21, %v1994_v49  ;;  %v2023_v3 = vpop.f32.mrf.mxu1 }
 0x242   :  { %3404 = vrcp.f32 %v745_v48  ;;  %2253 = vst [vmem:[%s5078_s11 + $0x60] sm:$0xff] %v2221_v58  ;;  %v2009_v52 = vadd.f32 %v4856_v51, %v3022_v60  ;;  %v1778_v2 = vpop.f32.mrf.mxu0  ;;  %v2166_v35 = vsub.f32 1.0, %v4858_v7  ;;  %v2165_v8 = vsub.f32 1.0, %v4892_v16  ;;  %v3465_v48 = vld [vmem:[%s5069_s1 + $0xa8] sm:$0xff] }
 0x243   :  { %v3383_v27 = vpop.eup %3382  ;;  %2256 = vst [vmem:[%s5078_s11 + $0x78] sm:$0xff] %v2224_v40  ;;  %v2223_v63 = vadd.f32 %v2191_v42, %v2127_v20  ;;  %3406 = vtanh.f32 %v2071_v10  ;;  %v2004_v46 = vadd.f32 %v4881_v15, %v1778_v2  ;;  %v2168_v53 = vsub.f32 1.0, %v4923_v9  ;;  %v3466_v10 = vld [vmem:[%s5069_s1 + $0xa0] sm:$0xff] }
 0x244   :  { %v3385_v25 = vpop.eup %3384  ;;  %3408 = vrcp.f32 %v748_v6  ;;  %v2130_v61 = vmul.f32 %v3383_v27, %v4757_v55  ;;  %v2074_v51 = vadd.f32 %v4665_v21, %v2009_v52  ;;  %v3025_v19 = vpop.f32.mrf.mxu0  ;;  %v749_v55 = vadd.f32 1.0, %v3381_v17 }
 0x245   :  { %v4948_v4 = vpop.eup %3386  ;;  %3410 = vrcp.f32 %v747_v5  ;;  %2255 = vst [vmem:[%s5078_s11 + $0x70] sm:$0xff] %v2223_v63  ;;  %v2129_v44 = vmul.f32 %v3385_v25, %v4777_v62  ;;  %v2073_v34 = vadd.f32 %v4665_v21, %v2004_v46  ;;  %v2019_v15 = vadd.f32 %v4902_v36, %v3025_v19  ;;  %v3464_v36 = vld [vmem:[%s5069_s1 + $0x90] sm:$0xff] }
 0x246   :  { %v3389_v28 = vpop.eup %3388  ;;  %v2226_v54 = vadd.f32 %v2194_v22, %v2130_v61  ;;  %3412 = vtanh.f32 %v2074_v51  ;;  %v1788_v18 = vpop.f32.mrf.mxu0  ;;  %v2195_v14 = vmul.f32 %v3464_v36, %v2163_v38  ;;  %v2198_v37 = vmul.f32 %v3465_v48, %v2166_v35  ;;  %v3472_v48 = vld [vmem:[%s5069_s1 + $0xd0] sm:$0xff] }
 0x247   :  { %v4957_v56 = vpop.eup %3390  ;;  %v2225_v31 = vadd.f32 %v2193_v45, %v2129_v44  ;;  %v2132_v13 = vmul.f32 %v3389_v28, %v4805_v30  ;;  %3414 = vtanh.f32 %v2073_v34  ;;  %v2076_v62 = vadd.f32 %v4665_v21, %v2019_v15 }
 0x248   :  { %v3393_v42 = vpop.eup %3392  ;;  %3416 = vrcp.f32 %v750_v32  ;;  %2258 = vst [vmem:[%s5078_s11 + $0x88] sm:$0xff] %v2226_v54  ;;  %v2014_v0 = vadd.f32 %v2013_v26, %v1788_v18  ;;  %v3028_v47 = vpop.f32.mrf.mxu0  ;;  %v2167_v6 = vsub.f32 1.0, %v4948_v4  ;;  %v2197_v38 = vmul.f32 %v3466_v10, %v2165_v8  ;;  %v3468_v32 = vld [vmem:[%s5069_s1 + $0xb0] sm:$0xff] }
 0x249   :  { %v4968_v24 = vpop.eup %3394  ;;  %2257 = vst [vmem:[%s5078_s11 + $0x80] sm:$0xff] %v2225_v31  ;;  %v2228_v30 = vadd.f32 %v2196_v12, %v2132_v13  ;;  %v2131_v22 = vmul.f32 %v3393_v42, %v4830_v33  ;;  %3418 = vtanh.f32 %v2076_v62  ;;  %v2029_v23 = vadd.f32 %v3108_v41, %v3028_v47  ;;  %v3111_v26 = vpop.f32.mrf.mxu1  ;;  %v3470_v31 = vld [vmem:[%s5069_s1 + $0xc0] sm:$0xff]  ;;  %v3471_v47 = vld [vmem:[%s5069_s1 + $0xd8] sm:$0xff] }
 0x24a   :  { %v3397_v39 = vpop.eup %3396  ;;  %3420 = vrcp.f32 %v749_v55  ;;  %v2075_v57 = vadd.f32 %v4665_v21, %v2014_v0  ;;  %v1798_v59 = vpop.f32.mrf.mxu0  ;;  %v2200_v45 = vmul.f32 %v3467_v29, %v2168_v53  ;;  %v2170_v12 = vsub.f32 1.0, %v4957_v56 }
 0x24b   :  { %2260 = vst [vmem:[%s5078_s11 + $0x98] sm:$0xff] %v2228_v30  ;;  %v2227_v33 = vadd.f32 %v2195_v14, %v2131_v22  ;;  %v2134_v1 = vmul.f32 %v3397_v39, %v4858_v7  ;;  %v2078_v43 = vadd.f32 %v4665_v21, %v2029_v23  ;;  %v2024_v49 = vadd.f32 %v2023_v3, %v1798_v59  ;;  %v3399_v11 = vpop.eup %3398  ;;  %v2033_v52 = vpop.f32.mrf.mxu1 }
 0x24c   :  { %3422 = vtanh.f32 %v2075_v57  ;;  %v3031_v5 = vpop.f32.mrf.mxu0  ;;  %v2169_v46 = vsub.f32 1.0, %v4968_v24  ;;  %v2199_v61 = vmul.f32 %v3468_v32, %v2167_v6  ;;  %v2172_v28 = vsub.f32 1.0, %v3399_v11 }
 0x24d   :  { %v3401_v58 = vpop.eup %3400  ;;  %2259 = vst [vmem:[%s5078_s11 + $0x90] sm:$0xff] %v2227_v33  ;;  %v2230_v60 = vadd.f32 %v2198_v37, %v2134_v1  ;;  %3424 = vtanh.f32 %v2078_v43  ;;  %v2077_v17 = vadd.f32 %v4665_v21, %v2024_v49  ;;  %v2039_v40 = vadd.f32 %v3111_v26, %v3031_v5  ;;  %v3473_v26 = vld [vmem:[%s5069_s1 + $0xe8] sm:$0xff]  ;;  %v3474_v5 = vld [vmem:[%s5069_s1 + $0xe0] sm:$0xff] }
 0x24e   :  { %v3403_v20 = vpop.eup %3402  ;;  %v2133_v7 = vmul.f32 %v3401_v58, %v4892_v16  ;;  %v1808_v2 = vpop.f32.mrf.mxu0  ;;  %v2201_v13 = vmul.f32 %v3470_v31, %v2169_v46  ;;  %v2204_v30 = vmul.f32 %v3471_v47, %v2172_v28 }
 0x24f   :  { %v3405_v41 = vpop.eup %3404  ;;  %2262 = vst [vmem:[%s5078_s11 + $0xa8] sm:$0xff] %v2230_v60  ;;  %v2136_v27 = vmul.f32 %v3403_v20, %v4923_v9  ;;  %3426 = vtanh.f32 %v2077_v17  ;;  %v2080_v16 = vadd.f32 %v4665_v21, %v2039_v40  ;;  %v2034_v63 = vadd.f32 %v2033_v52, %v1808_v2  ;;  %v3475_v20 = vld [vmem:[%s5069_s1 + $0xf8] sm:$0xff] }
 0x250   :  { %v3407_v50 = vpop.eup %3406  ;;  %v2229_v25 = vadd.f32 %v2197_v38, %v2133_v7  ;;  %v2171_v42 = vsub.f32 1.0, %v3405_v41 }
 0x251   :  { %v3409_v51 = vpop.eup %3408  ;;  %v2232_v19 = vadd.f32 %v2200_v45, %v2136_v27  ;;  %v2135_v44 = vmul.f32 %v3407_v50, %v4948_v4  ;;  %3428 = vtanh.f32 %v2080_v16  ;;  %v2079_v9 = vadd.f32 %v4665_v21, %v2034_v63  ;;  %v3469_v21 = vld [vmem:[%s5069_s1 + $0xc8] sm:$0xff]  ;;  %v3476_v45 = vld [vmem:[%s5069_s1 + $0xf0] sm:$0xff] }
 0x252   :  { %v3411_v34 = vpop.eup %3410  ;;  %2261 = vst [vmem:[%s5078_s11 + $0xa0] sm:$0xff] %v2229_v25  ;;  %v2202_v4 = vmul.f32 %v3469_v21, %v2170_v12  ;;  %v2174_v36 = vsub.f32 1.0, %v3409_v51  ;;  %v2203_v37 = vmul.f32 %v3472_v48, %v2171_v42 }
 0x253   :  { %v3413_v15 = vpop.eup %3412  ;;  %2264 = vst [vmem:[%s5078_s11 + $0xb8] sm:$0xff] %v2232_v19  ;;  %v2231_v35 = vadd.f32 %v2199_v61, %v2135_v44  ;;  %3430 = vtanh.f32 %v2079_v9  ;;  %v2173_v22 = vsub.f32 1.0, %v3411_v34 }
 0x254   :  { %v3415_v55 = vpop.eup %3414  ;;  %v2138_v54 = vmul.f32 %v3413_v15, %v4957_v56  ;;  %v2206_v33 = vmul.f32 %v3473_v26, %v2174_v36 }
 0x255   :  { %v3417_v18 = vpop.eup %3416  ;;  %2263 = vst [vmem:[%s5078_s11 + $0xb0] sm:$0xff] %v2231_v35  ;;  %v2137_v3 = vmul.f32 %v3415_v55, %v4968_v24  ;;  %v2205_v58 = vmul.f32 %v3474_v5, %v2173_v22 }
 0x256   :  { %v3419_v62 = vpop.eup %3418  ;;  %v2234_v56 = vadd.f32 %v2202_v4, %v2138_v54  ;;  %v2176_v57 = vsub.f32 1.0, %v3417_v18 }
 0x257   :  { %v3421_v8 = vpop.eup %3420  ;;  %v2233_v14 = vadd.f32 %v2201_v13, %v2137_v3  ;;  %v2140_v0 = vmul.f32 %v3419_v62, %v3399_v11 }
 0x258   :  { %2266 = vst [vmem:[%s5078_s11 + $0xc8] sm:$0xff] %v2234_v56  ;;  %v2175_v49 = vsub.f32 1.0, %v3421_v8  ;;  %v2208_v7 = vmul.f32 %v3475_v20, %v2176_v57 }
 0x259   :  { %v3423_v24 = vpop.eup %3422  ;;  %2265 = vst [vmem:[%s5078_s11 + $0xc0] sm:$0xff] %v2233_v14  ;;  %v2236_v23 = vadd.f32 %v2204_v30, %v2140_v0 }
 0x25a   :  { %v3425_v39 = vpop.eup %3424  ;;  %v2139_v53 = vmul.f32 %v3423_v24, %v3405_v41  ;;  %v2207_v52 = vmul.f32 %v3476_v45, %v2175_v49 }
 0x25b   :  { %2268 = vst [vmem:[%s5078_s11 + $0xd8] sm:$0xff] %v2236_v23  ;;  %v2142_v59 = vmul.f32 %v3425_v39, %v3409_v51 }
 0x25c   :  { %v3427_v1 = vpop.eup %3426  ;;  %v2235_v43 = vadd.f32 %v2203_v37, %v2139_v53 }
 0x25d   :  { %v2238_v11 = vadd.f32 %v2206_v33, %v2142_v59  ;;  %v2141_v6 = vmul.f32 %v3427_v1, %v3411_v34 }
 0x25e   :  { %v3429_v60 = vpop.eup %3428  ;;  %2267 = vst [vmem:[%s5078_s11 + $0xd0] sm:$0xff] %v2235_v43 }
 0x25f   :  { %2270 = vst [vmem:[%s5078_s11 + $0xe8] sm:$0xff] %v2238_v11  ;;  %v2237_v17 = vadd.f32 %v2205_v58, %v2141_v6  ;;  %v2144_v40 = vmul.f32 %v3429_v60, %v3417_v18 }
 0x260   :  { %v3431_v10 = vpop.eup %3430 }
 0x261   :  { %2269 = vst [vmem:[%s5078_s11 + $0xe0] sm:$0xff] %v2237_v17  ;;  %v2240_v38 = vadd.f32 %v2208_v7, %v2144_v40  ;;  %v2143_v29 = vmul.f32 %v3431_v10, %v3421_v8 }
 0x263   :  { %2272 = vst [vmem:[%s5078_s11 + $0xf8] sm:$0xff] %v2240_v38  ;;  %v2239_v2 = vadd.f32 %v2207_v52, %v2143_v29 }
 0x265   :  { %2271 = vst [vmem:[%s5078_s11 + $0xf0] sm:$0xff] %v2239_v2 }

</bundles_post_ra>
